<compile_context>
chip_gen: v7x
topology: tpu7x:2x2x1
jax: 0.10.0
libtpu: 0.0.40
codegen_flags: <defaults>
</compile_context>

<pallas_src>
import functools

import numpy as np
import jax
import jax.numpy as jnp
from jax.experimental import pallas as pl
from jax.experimental.pallas import tpu as pltpu


def _round_up(v, m):
    return (v + m - 1) // m * m


# ----------------------------------------------------------------------------
# Parameter construction (deterministic numpy)
# ----------------------------------------------------------------------------
def _dft_np(n_fft, win_length):
    """Real/imag DFT bases with a periodic Hann window folded in, (W, F) each."""
    n_freqs = n_fft // 2 + 1
    n = np.arange(win_length)
    window = 0.5 - 0.5 * np.cos(2.0 * np.pi * n / win_length)
    k = np.arange(n_freqs)
    ang = 2.0 * np.pi * np.outer(n, k) / n_fft                  # (W, F)
    cos_b = (window[:, None] * np.cos(ang)).astype(np.float32)
    sin_b = (window[:, None] * np.sin(ang)).astype(np.float32)
    return cos_b, sin_b


def _mel_fb_np(n_freqs, n_mels, sr, fmin=0.0, fmax=None):
    """HTK-mel triangular filterbank, (F, n_mels)."""
    fmax = fmax if fmax is not None else sr / 2.0
    hz2mel = lambda f: 2595.0 * np.log10(1.0 + f / 700.0)
    mel2hz = lambda m: 700.0 * (10.0 ** (m / 2595.0) - 1.0)
    m_pts = np.linspace(hz2mel(fmin), hz2mel(fmax), n_mels + 2)
    f_pts = mel2hz(m_pts)
    freqs = np.linspace(0.0, sr / 2.0, n_freqs)
    fb = np.zeros((n_freqs, n_mels), dtype=np.float64)
    for m in range(n_mels):
        lo, ctr, hi = f_pts[m], f_pts[m + 1], f_pts[m + 2]
        up = (freqs - lo) / max(ctr - lo, 1e-10)
        down = (hi - freqs) / max(hi - ctr, 1e-10)
        fb[:, m] = np.maximum(0.0, np.minimum(up, down))
    return fb.astype(np.float32)


def _dct_np(n_mfcc, n_mels):
    """torchaudio.functional.create_dct(norm='ortho'), shape (n_mels, n_mfcc)."""
    n = np.arange(n_mels, dtype=np.float64)
    k = np.arange(n_mfcc, dtype=np.float64)[:, None]
    dct = np.cos(np.pi / n_mels * (n + 0.5) * k)                # (n_mfcc, n_mels)
    dct[0] *= 1.0 / np.sqrt(2.0)
    dct *= np.sqrt(2.0 / n_mels)
    return dct.T.astype(np.float32)                             # (n_mels, n_mfcc)


def frame_signal(x, n_fft, hop_length):
    """(B, L) -> windowless frames (B, T, n_fft); torch.stft center=True reflect pad."""
    pad = n_fft // 2
    xp = jnp.pad(x, ((0, 0), (pad, pad)), mode="reflect")
    L = xp.shape[-1]
    n_frames = 1 + (L - n_fft) // hop_length
    idx = (jnp.arange(n_frames)[:, None] * hop_length
           + jnp.arange(n_fft)[None, :])                        # (T, W)
    return xp[:, idx]                                           # (B, T, W)


# ----------------------------------------------------------------------------
# Pallas kernel: fused MFCC chain + per-tile lane-dense partial sum
# ----------------------------------------------------------------------------
def _mfcc_dist_kernel(fr_ref, basis_ref, mel_ref, dct_ref, out_ref,
                      *, f_pad, tm, eps, squared):
    fr = fr_ref[0]                                   # (2*TM, W): rows [0:TM)=x, [TM:2TM)=y
    # Fused real+imag DFT: one MXU pass, lane-aligned halves.
    z = jnp.dot(fr, basis_ref[...], preferred_element_type=jnp.float32)   # (2TM, 2*F_pad)
    re = z[:, :f_pad]
    im = z[:, f_pad:]
    power = re * re + im * im                                             # (2TM, F_pad)
    mel = jnp.dot(power, mel_ref[...], preferred_element_type=jnp.float32)  # (2TM, M_pad)
    logmel = jnp.log(mel + eps)
    c = jnp.dot(logmel, dct_ref[...], preferred_element_type=jnp.float32)   # (2TM, C_pad)

    # dct column 0 is zeroed at construction (drops c0); padded cols/rows are
    # identically zero / cancel, so a plain diff of the two halves is exact.
    d = c[:tm] - c[tm:]                                                    # (TM, C_pad)
    d = d * d if squared else jnp.abs(d)
    s = jnp.sum(d, axis=0, keepdims=True)                                  # (1, C_pad), lane-dense
    out_ref[0] = jnp.broadcast_to(s, (8, s.shape[-1]))


def mfcc_dist(x, y, *, sr=44100, n_fft=1024, win_length=1024, hop_length=512,
              n_mels=128, n_mfcc=40, fmin=0.0, fmax=None, eps=1e-8,
              distance="L1", row_tile=256):
    assert win_length == n_fft, "this kernel assumes win_length == n_fft"
    assert distance in ("L1", "L2")
    B = x.shape[0]
    W = n_fft
    n_freqs = n_fft // 2 + 1
    F_pad = _round_up(n_freqs, 128)
    M_pad = _round_up(n_mels, 128)
    C_pad = _round_up(n_mfcc, 128)

    # --- padded constants (all zero-padding kept out of the kernel) ---------
    cos_b, sin_b = _dft_np(n_fft, win_length)                   # (W, F) each
    basis = np.zeros((W, 2 * F_pad), np.float32)
    basis[:, :n_freqs] = cos_b
    basis[:, F_pad:F_pad + n_freqs] = sin_b

    mel_fb = np.zeros((F_pad, M_pad), np.float32)
    mel_fb[:n_freqs, :n_mels] = _mel_fb_np(n_freqs, n_mels, sr, fmin, fmax)

    dct_m = np.zeros((M_pad, C_pad), np.float32)
    dct_m[:n_mels, :n_mfcc] = _dct_np(n_mfcc, n_mels)
    dct_m[:, 0] = 0.0                                           # drop MFCC coefficient 0

    basis = jnp.asarray(basis)
    mel_fb = jnp.asarray(mel_fb)
    dct_m = jnp.asarray(dct_m)

    # --- framing + batch flattening -----------------------------------------
    fx = frame_signal(x.astype(jnp.float32), n_fft, hop_length)  # (B, T, W)
    fy = frame_signal(y.astype(jnp.float32), n_fft, hop_length)
    T = fx.shape[1]
    R = B * T
    fx = fx.reshape(R, W)
    fy = fy.reshape(R, W)

    TM = min(_round_up(row_tile, 8), _round_up(R, 8))            # rows per signal per tile
    R_pad = _round_up(R, TM)
    if R_pad != R:                                               # zero frames cancel in the diff
        fx = jnp.pad(fx, ((0, R_pad - R), (0, 0)))
        fy = jnp.pad(fy, ((0, R_pad - R), (0, 0)))
    num_tiles = R_pad // TM

    # Each grid tile gets [x_tile; y_tile] stacked along rows -> one matmul chain.
    frames = jnp.concatenate(
        [fx.reshape(num_tiles, TM, W), fy.reshape(num_tiles, TM, W)], axis=1
    )                                                            # (num_tiles, 2*TM, W)

    kernel = functools.partial(_mfcc_dist_kernel, f_pad=F_pad, tm=TM,
                               eps=float(eps), squared=(distance == "L2"))

    out = pl.pallas_call(
        kernel,
        out_shape=jax.ShapeDtypeStruct((num_tiles, 8, C_pad), jnp.float32),
        grid_spec=pltpu.PrefetchScalarGridSpec(
            num_scalar_prefetch=0,
            grid=(num_tiles,),
            in_specs=[
                pl.BlockSpec((1, 2 * TM, W), lambda i: (i, 0, 0)),
                pl.BlockSpec((W, 2 * F_pad), lambda i: (0, 0)),
                pl.BlockSpec((F_pad, M_pad), lambda i: (0, 0)),
                pl.BlockSpec((M_pad, C_pad), lambda i: (0, 0)),
            ],
            out_specs=pl.BlockSpec((1, 8, C_pad), lambda i: (i, 0, 0)),
        ),
        compiler_params=pltpu.CompilerParams(
            dimension_semantics=("parallel",)),
    )(frames, basis, mel_fb, dct_m)

    total = jnp.sum(out[:, 0, :])                # final lane reduction in the wrapper
    n_elems = B * T * (n_mfcc - 1)               # F.l1_loss / mse_loss reduction='mean'
    return total / n_elems


# ----------------------------------------------------------------------------
# Pure-JAX reference for sanity checking
# ----------------------------------------------------------------------------
def mfcc_dist_ref(x, y, *, sr=44100, n_fft=1024, win_length=1024, hop_length=512,
                  n_mels=128, n_mfcc=40, fmin=0.0, fmax=None, eps=1e-8,
                  distance="L1"):
    n_freqs = n_fft // 2 + 1
    cos_b, sin_b = _dft_np(n_fft, win_length)
    mel_fb = jnp.asarray(_mel_fb_np(n_freqs, n_mels, sr, fmin, fmax))
    dct_m = jnp.asarray(_dct_np(n_mfcc, n_mels))
    cos_b, sin_b = jnp.asarray(cos_b), jnp.asarray(sin_b)

    def mfcc(sig):
        fr = frame_signal(sig.astype(jnp.float32), n_fft, hop_length)  # (B, T, W)
        re = fr @ cos_b
        im = fr @ sin_b
        logmel = jnp.log((re * re + im * im) @ mel_fb + eps)
        return (logmel @ dct_m)[..., 1:]                               # (B, T, C-1)

    d = mfcc(x) - mfcc(y)
    return jnp.mean(d * d) if distance == "L2" else jnp.mean(jnp.abs(d))


if __name__ == "__main__":
    key = jax.random.PRNGKey(0)
    kx, ky = jax.random.split(key)
    B, L = 2, 4096
    x = jax.random.normal(kx, (B, L), dtype=jnp.float32)
    y = jax.random.normal(ky, (B, L), dtype=jnp.float32)

    d = mfcc_dist(x, y)          # module defaults: sr=44100, n_fft=1024, n_mels=128, n_mfcc=40
    jax.block_until_ready(d)

    d_ref = mfcc_dist_ref(x, y)
    np.testing.assert_allclose(np.asarray(d), np.asarray(d_ref), rtol=2e-3, atol=2e-3)

    print("KERNEL_OK")
</pallas_src>

<mosaic_0001>
module attributes {stable_mosaic.version = 11 : i64} {
  func.func @_mfcc_dist_kernel(%arg0: i32, %arg1: memref<1x48x1024xf32, #tpu.memory_space<vmem>>, %arg2: memref<1024x1280xf32, #tpu.memory_space<vmem>>, %arg3: memref<640x128xf32, #tpu.memory_space<vmem>>, %arg4: memref<128x128xf32, #tpu.memory_space<vmem>>, %arg5: memref<1x8x128xf32, #tpu.memory_space<vmem>>) attributes {dimension_semantics = [#tpu.dimension_semantics<parallel>], iteration_bounds = array<i64: 1>, scalar_prefetch = 0 : i64, scratch_operands = 0 : i64, tpu.core_type = #tpu.core_type<tc>, window_params = [{transform_indices = @transform_0, window_bounds = array<i64: 1, 48, 1024>}, {pipeline_mode = #tpu.pipeline_mode<synchronous>, transform_indices = @transform_1, window_bounds = array<i64: 1024, 1280>}, {pipeline_mode = #tpu.pipeline_mode<synchronous>, transform_indices = @transform_2, window_bounds = array<i64: 640, 128>}, {pipeline_mode = #tpu.pipeline_mode<synchronous>, transform_indices = @transform_3, window_bounds = array<i64: 128, 128>}, {transform_indices = @transform_4, window_bounds = array<i64: 1, 8, 128>}]} {
    %c0 = arith.constant 0 : index
    %c0_0 = arith.constant 0 : index
    %c0_1 = arith.constant 0 : index
    %0 = vector.load %arg1[%c0, %c0_0, %c0_1] : memref<1x48x1024xf32, #tpu.memory_space<vmem>>, vector<1x48x1024xf32>
    %1 = vector.shape_cast %0 : vector<1x48x1024xf32> to vector<48x1024xf32>
    %c0_2 = arith.constant 0 : index
    %c0_3 = arith.constant 0 : index
    %2 = vector.load %arg2[%c0_2, %c0_3] : memref<1024x1280xf32, #tpu.memory_space<vmem>>, vector<1024x1280xf32>
    %cst = arith.constant dense<0.000000e+00> : vector<48x1280xf32>
    %3 = tpu.matmul %1, %2, %cst {dimension_numbers = #tpu.dot_dimension_numbers<[1], [0], [0], [1], [0, 0, 1, 1], [], []>} : vector<48x1024xf32>, vector<1024x1280xf32>, vector<48x1280xf32> -> vector<48x1280xf32>
    %4 = vector.extract_strided_slice %3 {offsets = [0, 0], sizes = [48, 640], strides = [1, 1]} : vector<48x1280xf32> to vector<48x640xf32>
    %5 = vector.extract_strided_slice %3 {offsets = [0, 640], sizes = [48, 640], strides = [1, 1]} : vector<48x1280xf32> to vector<48x640xf32>
    %6 = arith.mulf %4, %4 : vector<48x640xf32>
    %7 = arith.mulf %5, %5 : vector<48x640xf32>
    %8 = arith.addf %6, %7 : vector<48x640xf32>
    %c0_4 = arith.constant 0 : index
    %c0_5 = arith.constant 0 : index
    %9 = vector.load %arg3[%c0_4, %c0_5] : memref<640x128xf32, #tpu.memory_space<vmem>>, vector<640x128xf32>
    %cst_6 = arith.constant dense<0.000000e+00> : vector<48x128xf32>
    %10 = tpu.matmul %8, %9, %cst_6 {dimension_numbers = #tpu.dot_dimension_numbers<[1], [0], [0], [1], [0, 0, 1, 1], [], []>} : vector<48x640xf32>, vector<640x128xf32>, vector<48x128xf32> -> vector<48x128xf32>
    %cst_7 = arith.constant 9.99999993E-9 : f32
    %11 = vector.broadcast %cst_7 : f32 to vector<48x128xf32>
    %12 = arith.addf %10, %11 : vector<48x128xf32>
    %13 = math.log %12 : vector<48x128xf32>
    %c0_8 = arith.constant 0 : index
    %c0_9 = arith.constant 0 : index
    %14 = vector.load %arg4[%c0_8, %c0_9] : memref<128x128xf32, #tpu.memory_space<vmem>>, vector<128x128xf32>
    %cst_10 = arith.constant dense<0.000000e+00> : vector<48x128xf32>
    %15 = tpu.matmul %13, %14, %cst_10 {dimension_numbers = #tpu.dot_dimension_numbers<[1], [0], [0], [1], [0, 0, 1, 1], [], []>} : vector<48x128xf32>, vector<128x128xf32>, vector<48x128xf32> -> vector<48x128xf32>
    %16 = vector.extract_strided_slice %15 {offsets = [0, 0], sizes = [24, 128], strides = [1, 1]} : vector<48x128xf32> to vector<24x128xf32>
    %17 = vector.extract_strided_slice %15 {offsets = [24, 0], sizes = [24, 128], strides = [1, 1]} : vector<48x128xf32> to vector<24x128xf32>
    %18 = arith.subf %16, %17 : vector<24x128xf32>
    %19 = math.absf %18 : vector<24x128xf32>
    %cst_11 = arith.constant dense<0.000000e+00> : vector<128xf32>
    %20 = vector.multi_reduction <add>, %19, %cst_11 [0] : vector<24x128xf32> to vector<128xf32>
    %21 = vector.shape_cast %20 : vector<128xf32> to vector<1x128xf32>
    %22 = vector.shape_cast %21 : vector<1x128xf32> to vector<1x128xf32>
    %23 = vector.broadcast %22 : vector<1x128xf32> to vector<8x128xf32>
    %c0_12 = arith.constant 0 : index
    %c0_13 = arith.constant 0 : index
    %c0_14 = arith.constant 0 : index
    %24 = vector.load %arg5[%c0_12, %c0_13, %c0_14] : memref<1x8x128xf32, #tpu.memory_space<vmem>>, vector<1x8x128xf32>
    %25 = vector.shape_cast %24 : vector<1x8x128xf32> to vector<8x128xf32>
    %26 = vector.shape_cast %23 : vector<8x128xf32> to vector<1x8x128xf32>
    tpu.vector_store %arg5[%c0_12, %c0_13, %c0_14], %26 {strides = array<i32>} : memref<1x8x128xf32, #tpu.memory_space<vmem>>, vector<1x8x128xf32>,
    return
  }
  func.func @transform_0(%arg0: i32) -> (i32, i32, i32) {
    %c0_i32 = arith.constant 0 : i32
    %c0_i32_0 = arith.constant 0 : i32
    %c0_i32_1 = arith.constant 0 : i32
    return %arg0, %c0_i32, %c0_i32_0 : i32, i32, i32
  }
  func.func @transform_1(%arg0: i32) -> (i32, i32) {
    %c0_i32 = arith.constant 0 : i32
    %c0_i32_0 = arith.constant 0 : i32
    %c0_i32_1 = arith.constant 0 : i32
    return %c0_i32, %c0_i32_0 : i32, i32
  }
  func.func @transform_2(%arg0: i32) -> (i32, i32) {
    %c0_i32 = arith.constant 0 : i32
    %c0_i32_0 = arith.constant 0 : i32
    %c0_i32_1 = arith.constant 0 : i32
    return %c0_i32, %c0_i32_0 : i32, i32
  }
  func.func @transform_3(%arg0: i32) -> (i32, i32) {
    %c0_i32 = arith.constant 0 : i32
    %c0_i32_0 = arith.constant 0 : i32
    %c0_i32_1 = arith.constant 0 : i32
    return %c0_i32, %c0_i32_0 : i32, i32
  }
  func.func @transform_4(%arg0: i32) -> (i32, i32, i32) {
    %c0_i32 = arith.constant 0 : i32
    %c0_i32_0 = arith.constant 0 : i32
    %c0_i32_1 = arith.constant 0 : i32
    return %arg0, %c0_i32, %c0_i32_0 : i32, i32, i32
  }
}

</mosaic_0001>

<bundles_post_ra>
// kernel: tpu_custom_call.1
= control target key start
LH: loop header
LB: loop body
LE: loop exit
PB: predicated region body
PF: predicated region fallthrough
CT: control target
= control target key end

     0   :  { %9 = vsyncpa [#allocation3], 0  ;;  %s6604_s0 = inlined_call_operand.hbm [shape: f32[1,48,1024], index: 0, kind: input, shape index: {}]   ;;  %s6605_s1 = inlined_call_operand.hbm [shape: f32[1024,1280], index: 1, kind: input, shape index: {}]   ;;  %s6606_s2 = inlined_call_operand.hbm [shape: f32[640,128], index: 2, kind: input, shape index: {}]   ;;  %s6607_s3 = inlined_call_operand.hbm [shape: f32[128,128], index: 3, kind: input, shape index: {}]   ;;  %s6608_s4 = inlined_call_operand.hbm [shape: f32[1,8,128], index: 4, kind: output, shape index: {}]  }
   0x1   :  { %10 = vsyncpa [#allocation6], 0 }
   0x2   :  { %11 = vsyncpa [#allocation9], 0 }
   0x3   :  { %12 = vsyncpa [#allocation4], 0  ;;  %s6135_s15 = smov [#allocation5]   ;;  %s6017_s19 = scalar_lea.hbm %s6605_s1, 163840 }
   0x4   :  { %s30_s16 = sshll.u32 %s6135_s15, 4  ;;  %p6018_p0 = scmp.ne.s32.totalorder %s6605_s1, %s6017_s19  ;;  %s31_s16 = int_to_ptr.vmem [resolvable:$true] %s30_s16 }
   0x5   :  { %p6021_p1 = scmp.lt.u32.totalorder %s6017_s19, %s6605_s1 }
   0x7   :  { %p6023_p2 = pnand %p6021_p1, %p6018_p0 }
   0x9   :  { %6026 = shalt.err (!%p6023_p2)
}
   0xa   :  { %s6027_s24 = scalar_lea.vmem %s31_s16, 163840  ;;  %p6032_p4 = scmp.lt.s32.totalorder %s31_s16, %s31_s16 }
   0xb   :  { %p6028_p3 = scmp.ne.s32.totalorder %s31_s16, %s6027_s24  ;;  %p6033_p5 = scmp.lt.s32.totalorder %s6027_s24, %s6027_s24 }
   0xd   :  { %p6034_p6 = por %p6033_p5, %p6032_p4 }
   0xf   :  { %p6035_p7 = pnand %p6034_p6, %p6028_p3 }
  0x11   :  { %6038 = shalt.err (!%p6035_p7)
}
  0x12   :  { %s6136_s25 = smov 1280   ;;  %s6137_s26 = smov 80  }
  0x13   :  { %36 = dma.hbm_to_vmem [thread:$0]  %s6605_s1, 163840, %s31_s16, [#allocation6], %s6136_s25, %s6136_s25, %s6137_s26  }
  0x14   :  { %s6138_s29 = smov [#allocation2]   ;;  %s6039_s7 = scalar_lea.hbm %s6604_s0, 6144 }
  0x15   :  { %s18_s30 = sshll.u32 %s6138_s29, 4  ;;  %p6040_p8 = scmp.ne.s32.totalorder %s6604_s0, %s6039_s7  ;;  %s19_s30 = int_to_ptr.vmem [resolvable:$true] %s18_s30 }
  0x16   :  { %p6043_p9 = scmp.lt.u32.totalorder %s6039_s7, %s6604_s0 }
  0x18   :  { %p6045_p10 = pnand %p6043_p9, %p6040_p8 }
  0x1a   :  { %6048 = shalt.err (!%p6045_p10)
}
  0x1b   :  { %s6049_s12 = scalar_lea.vmem %s19_s30, 6144  ;;  %p6054_p12 = scmp.lt.s32.totalorder %s19_s30, %s19_s30 }
  0x1c   :  { %p6050_p11 = scmp.ne.s32.totalorder %s19_s30, %s6049_s12  ;;  %p6055_p13 = scmp.lt.s32.totalorder %s6049_s12, %s6049_s12 }
  0x1e   :  { %p6056_p0 = por %p6055_p13, %p6054_p12 }
  0x20   :  { %p6057_p1 = pnand %p6056_p0, %p6050_p11 }
  0x22   :  { %6060 = shalt.err (!%p6057_p1)
}
  0x23   :  { %s6139_s1 = smov 1024   ;;  %s6140_s13 = smov 64  }
  0x24   :  { %24 = dma.hbm_to_vmem [thread:$0]  %s6604_s0, 6144, %s19_s30, [#allocation3], %s6139_s1, %s6139_s1, %s6140_s13  }
  0x25   :  { %s6141_s16 = smov [#allocation7]   ;;  %s6061_s20 = scalar_lea.hbm %s6606_s2, 10240 }
  0x26   :  { %s42_s17 = sshll.u32 %s6141_s16, 4  ;;  %p6062_p2 = scmp.ne.s32.totalorder %s6606_s2, %s6061_s20  ;;  %s43_s17 = int_to_ptr.vmem [resolvable:$true] %s42_s17 }
  0x27   :  { %p6065_p3 = scmp.lt.u32.totalorder %s6061_s20, %s6606_s2 }
  0x29   :  { %p6067_p4 = pnand %p6065_p3, %p6062_p2 }
  0x2b   :  { %6070 = shalt.err (!%p6067_p4)
}
  0x2c   :  { %s6071_s25 = scalar_lea.vmem %s43_s17, 10240  ;;  %p6076_p6 = scmp.lt.s32.totalorder %s43_s17, %s43_s17 }
  0x2d   :  { %p6072_p5 = scmp.ne.s32.totalorder %s43_s17, %s6071_s25  ;;  %p6077_p7 = scmp.lt.s32.totalorder %s6071_s25, %s6071_s25 }
  0x2f   :  { %p6078_p8 = por %p6077_p7, %p6076_p6 }
  0x31   :  { %p6079_p9 = pnand %p6078_p8, %p6072_p5 }
  0x33   :  { %6082 = shalt.err (!%p6079_p9)
}
  0x34   :  { %s6142_s0 = smov 128   ;;  %s6143_s26 = smov 8  }
  0x35   :  { %48 = dma.hbm_to_vmem [thread:$0]  %s6606_s2, 10240, %s43_s17, [#allocation6], %s6142_s0, %s6142_s0, %s6143_s26  }
  0x36   :  { %s6144_s29 = smov [#allocation8]   ;;  %s6083_s7 = scalar_lea.hbm %s6607_s3, 2048 }
  0x37   :  { %s54_s30 = sshll.u32 %s6144_s29, 4  ;;  %p6084_p10 = scmp.ne.s32.totalorder %s6607_s3, %s6083_s7  ;;  %s55_s30 = int_to_ptr.vmem [resolvable:$true] %s54_s30 }
  0x38   :  { %p6087_p11 = scmp.lt.u32.totalorder %s6083_s7, %s6607_s3 }
  0x3a   :  { %p6089_p12 = pnand %p6087_p11, %p6084_p10 }
  0x3c   :  { %6092 = shalt.err (!%p6089_p12)
}
  0x3d   :  { %s6093_s12 = scalar_lea.vmem %s55_s30, 2048  ;;  %p6098_p0 = scmp.lt.s32.totalorder %s55_s30, %s55_s30 }
  0x3e   :  { %p6094_p13 = scmp.ne.s32.totalorder %s55_s30, %s6093_s12  ;;  %p6099_p1 = scmp.lt.s32.totalorder %s6093_s12, %s6093_s12 }
  0x40   :  { %p6100_p2 = por %p6099_p1, %p6098_p0 }
  0x42   :  { %p6101_p3 = pnand %p6100_p2, %p6094_p13 }
  0x44   :  { %6104 = shalt.err (!%p6101_p3)
}
  0x45   :  { %60 = dma.hbm_to_vmem [thread:$0]  %s6607_s3, 2048, %s55_s30, [#allocation9], %s6142_s0, %s6142_s0, %s6143_s26  }
  0x46   :  { %6127 = dma.done.wait [#allocation3], 6144  }
  0x47   :  { %6128 = vsyncadd [#allocation3], 4294961152 }
  0x48   :  { %6129 = dma.done.wait [#allocation6], 174080  }
  0x49   :  { %6130 = vsyncadd [#allocation6], 4294793216 }
  0x4a   :  { %6131 = dma.done.wait [#allocation9], 2048  }
  0x4b   :  { %6132 = vsyncadd [#allocation9], 4294965248  ;;  %v122_v0 = vld [vmem:[#allocation5 + $0x8] sm:$0xff]  ;;  %v132_v1 = vld [vmem:[#allocation5 + $0x58] sm:$0xff]  ;;  %s6145_s3 = smov [#allocation10]  }
  0x4c   :  { %v442_v2 = vld [vmem:[#allocation5 + $0xa08] sm:$0xff]  ;;  %v4257_v3 = vpack.c.bf16 %v132_v1, %v122_v0  ;;  %v452_v4 = vld [vmem:[#allocation5 + $0xa58] sm:$0xff]  ;;  %v121_v5 = vld [vmem:[#allocation5] sm:$0xff]  ;;  %s4020_s13 = sshll.u32 %s6145_s3, 4  ;;  %s4021_s13 = int_to_ptr.vmem [resolvable:$true] %s4020_s13 }
  0x4d   :  { %v131_v6 = vld [vmem:[#allocation5 + $0x50] sm:$0xff]  ;;  %v4321_v7 = vpack.c.bf16 %v452_v4, %v442_v2  ;;  %v441_v9 = vld [vmem:[#allocation5 + $0xa00] sm:$0xff]  ;;  %v142_v11 = vld [vmem:[#allocation5 + $0xa8] sm:$0xff]  ;;  %s6105_s14 = scalar_lea.vmem %s4021_s13, 128  ;;  %p6110_p5 = scmp.lt.s32.totalorder %s4021_s13, %s4021_s13 }
  0x4e   :  { %v4259_v8 = vpack.c.bf16 %v131_v6, %v121_v5  ;;  %v451_v10 = vld [vmem:[#allocation5 + $0xa50] sm:$0xff]  ;;  %4258 = vmatprep.subr.bf16.mxu1 %v4257_v3  ;;  %v152_v13 = vld [vmem:[#allocation5 + $0xf8] sm:$0xff]  ;;  %v462_v14 = vld [vmem:[#allocation5 + $0xaa8] sm:$0xff]  ;;  %p6106_p4 = scmp.ne.s32.totalorder %s4021_s13, %s6105_s14  ;;  %p6111_p6 = scmp.lt.s32.totalorder %s6105_s14, %s6105_s14 }
  0x4f   :  { %v4323_v12 = vpack.c.bf16 %v451_v10, %v441_v9  ;;  %v472_v15 = vld [vmem:[#allocation5 + $0xaf8] sm:$0xff]  ;;  %4322 = vmatprep.subr.bf16.mxu0 %v4321_v7  ;;  %v4261_v16 = vpack.c.bf16 %v152_v13, %v142_v11  ;;  %v141_v18 = vld [vmem:[#allocation5 + $0xa0] sm:$0xff]  ;;  %v151_v19 = vld [vmem:[#allocation5 + $0xf0] sm:$0xff] }
  0x50   :  { %4260 = vmatpush1.bf16.msra.mxu1 %v4259_v8  ;;  %v4325_v17 = vpack.c.bf16 %v472_v15, %v462_v14  ;;  %v461_v20 = vld [vmem:[#allocation5 + $0xaa0] sm:$0xff]  ;;  %v4263_v21 = vpack.c.bf16 %v151_v19, %v141_v18  ;;  %v471_v22 = vld [vmem:[#allocation5 + $0xaf0] sm:$0xff]  ;;  %v162_v23 = vld [vmem:[#allocation5 + $0x148] sm:$0xff]  ;;  %p6112_p7 = por %p6111_p6, %p6110_p5 }
  0x51   :  { %4324 = vmatpush1.bf16.msra.mxu0 %v4323_v12  ;;  %v172_v24 = vld [vmem:[#allocation5 + $0x198] sm:$0xff]  ;;  %4262 = vmatprep.subr.bf16.mxu1 %v4261_v16  ;;  %v4327_v25 = vpack.c.bf16 %v471_v22, %v461_v20  ;;  %v482_v27 = vld [vmem:[#allocation5 + $0xb48] sm:$0xff]  ;;  %v161_v29 = vld [vmem:[#allocation5 + $0x140] sm:$0xff] }
  0x52   :  { %4326 = vmatprep.subr.bf16.mxu0 %v4325_v17  ;;  %v4265_v26 = vpack.c.bf16 %v172_v24, %v162_v23  ;;  %v492_v28 = vld [vmem:[#allocation5 + $0xb98] sm:$0xff]  ;;  %v171_v31 = vld [vmem:[#allocation5 + $0x190] sm:$0xff]  ;;  %v481_v32 = vld [vmem:[#allocation5 + $0xb40] sm:$0xff]  ;;  %p6113_p8 = pnand %p6112_p7, %p6106_p4 }
  0x53   :  { %v4329_v30 = vpack.c.bf16 %v492_v28, %v482_v27  ;;  %v491_v33 = vld [vmem:[#allocation5 + $0xb90] sm:$0xff]  ;;  %v4267_v34 = vpack.c.bf16 %v171_v31, %v161_v29  ;;  %v182_v35 = vld [vmem:[#allocation5 + $0x1e8] sm:$0xff]  ;;  %v192_v36 = vld [vmem:[#allocation5 + $0x238] sm:$0xff] }
  0x54   :  { %4264 = vmatpush1.bf16.msra.mxu1 %v4263_v21  ;;  %v502_v37 = vld [vmem:[#allocation5 + $0xbe8] sm:$0xff]  ;;  %v4331_v38 = vpack.c.bf16 %v491_v33, %v481_v32  ;;  %v4269_v39 = vpack.c.bf16 %v192_v36, %v182_v35  ;;  %v512_v40 = vld [vmem:[#allocation5 + $0xc38] sm:$0xff]  ;;  %v181_v41 = vld [vmem:[#allocation5 + $0x1e0] sm:$0xff] }
  0x55   :  { %4328 = vmatpush1.bf16.msra.mxu0 %v4327_v25  ;;  %4266 = vmatprep.subr.bf16.mxu1 %v4265_v26  ;;  %v191_v42 = vld [vmem:[#allocation5 + $0x230] sm:$0xff]  ;;  %v4333_v43 = vpack.c.bf16 %v512_v40, %v502_v37  ;;  %v501_v44 = vld [vmem:[#allocation5 + $0xbe0] sm:$0xff]  ;;  %v202_v46 = vld [vmem:[#allocation5 + $0x288] sm:$0xff] }
  0x56   :  { %4330 = vmatprep.subr.bf16.mxu0 %v4329_v30  ;;  %v511_v45 = vld [vmem:[#allocation5 + $0xc30] sm:$0xff]  ;;  %v212_v47 = vld [vmem:[#allocation5 + $0x2d8] sm:$0xff]  ;;  %v522_v48 = vld [vmem:[#allocation5 + $0xc88] sm:$0xff]  ;;  %v4271_v50 = vpack.c.bf16 %v191_v42, %v181_v41 }
  0x57   :  { %v532_v49 = vld [vmem:[#allocation5 + $0xcd8] sm:$0xff]  ;;  %v4335_v51 = vpack.c.bf16 %v511_v45, %v501_v44  ;;  %v4273_v52 = vpack.c.bf16 %v212_v47, %v202_v46  ;;  %v201_v53 = vld [vmem:[#allocation5 + $0x280] sm:$0xff]  ;;  %v211_v54 = vld [vmem:[#allocation5 + $0x2d0] sm:$0xff] }
  0x58   :  { %4268 = vmatpush1.bf16.msra.mxu1 %v4267_v34  ;;  %v521_v55 = vld [vmem:[#allocation5 + $0xc80] sm:$0xff]  ;;  %v4337_v56 = vpack.c.bf16 %v532_v49, %v522_v48  ;;  %v531_v57 = vld [vmem:[#allocation5 + $0xcd0] sm:$0xff]  ;;  %v222_v58 = vld [vmem:[#allocation5 + $0x328] sm:$0xff]  ;;  %v4275_v62 = vpack.c.bf16 %v211_v54, %v201_v53 }
  0x59   :  { %4332 = vmatpush1.bf16.msra.mxu0 %v4331_v38  ;;  %4270 = vmatprep.subr.bf16.mxu1 %v4269_v39  ;;  %v232_v59 = vld [vmem:[#allocation5 + $0x378] sm:$0xff]  ;;  %v542_v60 = vld [vmem:[#allocation5 + $0xd28] sm:$0xff]  ;;  %v4339_v63 = vpack.c.bf16 %v531_v57, %v521_v55  ;;  %v221_v1 = vld [vmem:[#allocation5 + $0x320] sm:$0xff] }
  0x5a   :  { %4334 = vmatprep.subr.bf16.mxu0 %v4333_v43  ;;  %v552_v61 = vld [vmem:[#allocation5 + $0xd78] sm:$0xff]  ;;  %v4277_v0 = vpack.c.bf16 %v232_v59, %v222_v58  ;;  %v231_v2 = vld [vmem:[#allocation5 + $0x370] sm:$0xff]  ;;  %v541_v3 = vld [vmem:[#allocation5 + $0xd20] sm:$0xff] }
  0x5b   :  { %v4341_v4 = vpack.c.bf16 %v552_v61, %v542_v60  ;;  %v551_v5 = vld [vmem:[#allocation5 + $0xd70] sm:$0xff]  ;;  %v242_v6 = vld [vmem:[#allocation5 + $0x3c8] sm:$0xff]  ;;  %v252_v7 = vld [vmem:[#allocation5 + $0x418] sm:$0xff]  ;;  %v4279_v10 = vpack.c.bf16 %v231_v2, %v221_v1 }
  0x5c   :  { %4272 = vmatpush1.bf16.msra.mxu1 %v4271_v50  ;;  %v562_v8 = vld [vmem:[#allocation5 + $0xdc8] sm:$0xff]  ;;  %v572_v9 = vld [vmem:[#allocation5 + $0xe18] sm:$0xff]  ;;  %v4343_v11 = vpack.c.bf16 %v551_v5, %v541_v3  ;;  %v4281_v12 = vpack.c.bf16 %v252_v7, %v242_v6  ;;  %v241_v13 = vld [vmem:[#allocation5 + $0x3c0] sm:$0xff] }
  0x5d   :  { %4336 = vmatpush1.bf16.msra.mxu0 %v4335_v51  ;;  %4274 = vmatprep.subr.bf16.mxu1 %v4273_v52  ;;  %v251_v14 = vld [vmem:[#allocation5 + $0x410] sm:$0xff]  ;;  %v561_v15 = vld [vmem:[#allocation5 + $0xdc0] sm:$0xff]  ;;  %v4345_v16 = vpack.c.bf16 %v572_v9, %v562_v8  ;;  %v262_v18 = vld [vmem:[#allocation5 + $0x468] sm:$0xff] }
  0x5e   :  { %4338 = vmatprep.subr.bf16.mxu0 %v4337_v56  ;;  %v571_v17 = vld [vmem:[#allocation5 + $0xe10] sm:$0xff]  ;;  %v272_v19 = vld [vmem:[#allocation5 + $0x4b8] sm:$0xff]  ;;  %v582_v20 = vld [vmem:[#allocation5 + $0xe68] sm:$0xff]  ;;  %v4283_v22 = vpack.c.bf16 %v251_v14, %v241_v13 }
  0x5f   :  { %v592_v21 = vld [vmem:[#allocation5 + $0xeb8] sm:$0xff]  ;;  %v4347_v23 = vpack.c.bf16 %v571_v17, %v561_v15  ;;  %v4285_v24 = vpack.c.bf16 %v272_v19, %v262_v18  ;;  %v261_v25 = vld [vmem:[#allocation5 + $0x460] sm:$0xff]  ;;  %v271_v26 = vld [vmem:[#allocation5 + $0x4b0] sm:$0xff] }
  0x60   :  { %4276 = vmatpush1.bf16.msra.mxu1 %v4275_v62  ;;  %v581_v27 = vld [vmem:[#allocation5 + $0xe60] sm:$0xff]  ;;  %v4349_v28 = vpack.c.bf16 %v592_v21, %v582_v20  ;;  %v591_v29 = vld [vmem:[#allocation5 + $0xeb0] sm:$0xff]  ;;  %v282_v30 = vld [vmem:[#allocation5 + $0x508] sm:$0xff]  ;;  %v4287_v34 = vpack.c.bf16 %v271_v26, %v261_v25 }
  0x61   :  { %4340 = vmatpush1.bf16.msra.mxu0 %v4339_v63  ;;  %4278 = vmatprep.subr.bf16.mxu1 %v4277_v0  ;;  %v292_v31 = vld [vmem:[#allocation5 + $0x558] sm:$0xff]  ;;  %v602_v32 = vld [vmem:[#allocation5 + $0xf08] sm:$0xff]  ;;  %v4351_v35 = vpack.c.bf16 %v591_v29, %v581_v27  ;;  %v281_v37 = vld [vmem:[#allocation5 + $0x500] sm:$0xff] }
  0x62   :  { %4342 = vmatprep.subr.bf16.mxu0 %v4341_v4  ;;  %v612_v33 = vld [vmem:[#allocation5 + $0xf58] sm:$0xff]  ;;  %v4289_v36 = vpack.c.bf16 %v292_v31, %v282_v30  ;;  %v291_v38 = vld [vmem:[#allocation5 + $0x550] sm:$0xff]  ;;  %v601_v39 = vld [vmem:[#allocation5 + $0xf00] sm:$0xff] }
  0x63   :  { %v4353_v40 = vpack.c.bf16 %v612_v33, %v602_v32  ;;  %v611_v41 = vld [vmem:[#allocation5 + $0xf50] sm:$0xff]  ;;  %v302_v42 = vld [vmem:[#allocation5 + $0x5a8] sm:$0xff]  ;;  %v312_v43 = vld [vmem:[#allocation5 + $0x5f8] sm:$0xff]  ;;  %v4291_v46 = vpack.c.bf16 %v291_v38, %v281_v37 }
  0x64   :  { %4280 = vmatpush1.bf16.msra.mxu1 %v4279_v10  ;;  %v622_v44 = vld [vmem:[#allocation5 + $0xfa8] sm:$0xff]  ;;  %v632_v45 = vld [vmem:[#allocation5 + $0xff8] sm:$0xff]  ;;  %v4355_v47 = vpack.c.bf16 %v611_v41, %v601_v39  ;;  %v4293_v48 = vpack.c.bf16 %v312_v43, %v302_v42  ;;  %v301_v49 = vld [vmem:[#allocation5 + $0x5a0] sm:$0xff] }
  0x65   :  { %4344 = vmatpush1.bf16.msra.mxu0 %v4343_v11  ;;  %4282 = vmatprep.subr.bf16.mxu1 %v4281_v12  ;;  %v311_v50 = vld [vmem:[#allocation5 + $0x5f0] sm:$0xff]  ;;  %v621_v51 = vld [vmem:[#allocation5 + $0xfa0] sm:$0xff]  ;;  %v4357_v52 = vpack.c.bf16 %v632_v45, %v622_v44  ;;  %v322_v54 = vld [vmem:[#allocation5 + $0x648] sm:$0xff] }
  0x66   :  { %4346 = vmatprep.subr.bf16.mxu0 %v4345_v16  ;;  %v631_v53 = vld [vmem:[#allocation5 + $0xff0] sm:$0xff]  ;;  %v332_v55 = vld [vmem:[#allocation5 + $0x698] sm:$0xff]  ;;  %v642_v56 = vld [vmem:[#allocation5 + $0x1048] sm:$0xff]  ;;  %v4295_v58 = vpack.c.bf16 %v311_v50, %v301_v49 }
  0x67   :  { %v652_v57 = vld [vmem:[#allocation5 + $0x1098] sm:$0xff]  ;;  %v4359_v59 = vpack.c.bf16 %v631_v53, %v621_v51  ;;  %v4297_v60 = vpack.c.bf16 %v332_v55, %v322_v54  ;;  %v321_v61 = vld [vmem:[#allocation5 + $0x640] sm:$0xff]  ;;  %v331_v62 = vld [vmem:[#allocation5 + $0x690] sm:$0xff] }
  0x68   :  { %4284 = vmatpush1.bf16.msra.mxu1 %v4283_v22  ;;  %v641_v63 = vld [vmem:[#allocation5 + $0x1040] sm:$0xff]  ;;  %v4361_v0 = vpack.c.bf16 %v652_v57, %v642_v56  ;;  %v651_v1 = vld [vmem:[#allocation5 + $0x1090] sm:$0xff]  ;;  %v342_v2 = vld [vmem:[#allocation5 + $0x6e8] sm:$0xff]  ;;  %v4299_v6 = vpack.c.bf16 %v331_v62, %v321_v61 }
  0x69   :  { %4348 = vmatpush1.bf16.msra.mxu0 %v4347_v23  ;;  %4286 = vmatprep.subr.bf16.mxu1 %v4285_v24  ;;  %v352_v3 = vld [vmem:[#allocation5 + $0x738] sm:$0xff]  ;;  %v662_v4 = vld [vmem:[#allocation5 + $0x10e8] sm:$0xff]  ;;  %v341_v7 = vld [vmem:[#allocation5 + $0x6e0] sm:$0xff]  ;;  %v4363_v8 = vpack.c.bf16 %v651_v1, %v641_v63 }
  0x6a   :  { %4350 = vmatprep.subr.bf16.mxu0 %v4349_v28  ;;  %v672_v5 = vld [vmem:[#allocation5 + $0x1138] sm:$0xff]  ;;  %v4301_v9 = vpack.c.bf16 %v352_v3, %v342_v2  ;;  %v351_v10 = vld [vmem:[#allocation5 + $0x730] sm:$0xff]  ;;  %v661_v11 = vld [vmem:[#allocation5 + $0x10e0] sm:$0xff] }
  0x6b   :  { %v671_v12 = vld [vmem:[#allocation5 + $0x1130] sm:$0xff]  ;;  %v4365_v13 = vpack.c.bf16 %v672_v5, %v662_v4  ;;  %v362_v14 = vld [vmem:[#allocation5 + $0x788] sm:$0xff]  ;;  %v372_v15 = vld [vmem:[#allocation5 + $0x7d8] sm:$0xff]  ;;  %v4303_v20 = vpack.c.bf16 %v351_v10, %v341_v7 }
  0x6c   :  { %4288 = vmatpush1.bf16.msra.mxu1 %v4287_v34  ;;  %v6219_v16 = vld [vmem:[#allocation2 + $0x8] sm:$0xff]  ;;  %v692_v18 = vld [vmem:[#allocation5 + $0x11d8] sm:$0xff]  ;;  %v4367_v21 = vpack.c.bf16 %v671_v12, %v661_v11  ;;  %v4305_v22 = vpack.c.bf16 %v372_v15, %v362_v14  ;;  %v361_v23 = vld [vmem:[#allocation5 + $0x780] sm:$0xff] }
  0x6d   :  { %4352 = vmatpush1.bf16.msra.mxu0 %v4351_v35  ;;  %4290 = vmatprep.subr.bf16.mxu1 %v4289_v36  ;;  %v682_v17 = vld [vmem:[#allocation5 + $0x1188] sm:$0xff]  ;;  %v76_v19 = vld [vmem:[#allocation2 + $0x18] sm:$0xff]  ;;  %v371_v24 = vld [vmem:[#allocation5 + $0x7d0] sm:$0xff] }
  0x6e   :  { %4354 = vmatprep.subr.bf16.mxu0 %v4353_v40  ;;  %1465 = vmatprep.mubr.f32.mxu1 %v6219_v16  ;;  %v681_v25 = vld [vmem:[#allocation5 + $0x1180] sm:$0xff]  ;;  %v4369_v26 = vpack.c.bf16 %v692_v18, %v682_v17  ;;  %v691_v27 = vld [vmem:[#allocation5 + $0x11d0] sm:$0xff]  ;;  %v382_v28 = vld [vmem:[#allocation5 + $0x828] sm:$0xff]  ;;  %v4307_v32 = vpack.c.bf16 %v371_v24, %v361_v23 }
  0x6f   :  { %1566 = vmatprep.mubr.f32.mxu0 %v76_v19  ;;  %v392_v29 = vld [vmem:[#allocation5 + $0x878] sm:$0xff]  ;;  %v702_v30 = vld [vmem:[#allocation5 + $0x1228] sm:$0xff]  ;;  %v4371_v33 = vpack.c.bf16 %v691_v27, %v681_v25  ;;  %v381_v35 = vld [vmem:[#allocation5 + $0x820] sm:$0xff] }
  0x70   :  { %4292 = vmatpush1.bf16.msra.mxu1 %v4291_v46  ;;  %v712_v31 = vld [vmem:[#allocation5 + $0x1278] sm:$0xff]  ;;  %v4309_v34 = vpack.c.bf16 %v392_v29, %v382_v28  ;;  %v391_v36 = vld [vmem:[#allocation5 + $0x870] sm:$0xff]  ;;  %v701_v37 = vld [vmem:[#allocation5 + $0x1220] sm:$0xff] }
  0x71   :  { %4356 = vmatpush1.bf16.msra.mxu0 %v4355_v47  ;;  %4294 = vmatprep.subr.bf16.mxu1 %v4293_v48  ;;  %v4373_v38 = vpack.c.bf16 %v712_v31, %v702_v30  ;;  %v711_v39 = vld [vmem:[#allocation5 + $0x1270] sm:$0xff]  ;;  %v402_v40 = vld [vmem:[#allocation5 + $0x8c8] sm:$0xff]  ;;  %v412_v41 = vld [vmem:[#allocation5 + $0x918] sm:$0xff]  ;;  %v4311_v44 = vpack.c.bf16 %v391_v36, %v381_v35 }
  0x72   :  { %4358 = vmatprep.subr.bf16.mxu0 %v4357_v52  ;;  %v722_v42 = vld [vmem:[#allocation5 + $0x12c8] sm:$0xff]  ;;  %v732_v43 = vld [vmem:[#allocation5 + $0x1318] sm:$0xff]  ;;  %v4375_v45 = vpack.c.bf16 %v711_v39, %v701_v37  ;;  %v4313_v46 = vpack.c.bf16 %v412_v41, %v402_v40  ;;  %v401_v47 = vld [vmem:[#allocation5 + $0x8c0] sm:$0xff] }
  0x73   :  { %v411_v48 = vld [vmem:[#allocation5 + $0x910] sm:$0xff]  ;;  %v721_v49 = vld [vmem:[#allocation5 + $0x12c0] sm:$0xff]  ;;  %v4377_v50 = vpack.c.bf16 %v732_v43, %v722_v42  ;;  %v422_v52 = vld [vmem:[#allocation5 + $0x968] sm:$0xff] }
  0x74   :  { %4296 = vmatpush1.bf16.msra.mxu1 %v4295_v58  ;;  %v731_v51 = vld [vmem:[#allocation5 + $0x1310] sm:$0xff]  ;;  %v432_v53 = vld [vmem:[#allocation5 + $0x9b8] sm:$0xff]  ;;  %v742_v54 = vld [vmem:[#allocation5 + $0x1368] sm:$0xff]  ;;  %v4315_v56 = vpack.c.bf16 %v411_v48, %v401_v47 }
  0x75   :  { %4360 = vmatpush1.bf16.msra.mxu0 %v4359_v59  ;;  %4298 = vmatprep.subr.bf16.mxu1 %v4297_v60  ;;  %v752_v55 = vld [vmem:[#allocation5 + $0x13b8] sm:$0xff]  ;;  %v4379_v57 = vpack.c.bf16 %v731_v51, %v721_v49  ;;  %v4317_v58 = vpack.c.bf16 %v432_v53, %v422_v52  ;;  %v421_v59 = vld [vmem:[#allocation5 + $0x960] sm:$0xff]  ;;  %v431_v60 = vld [vmem:[#allocation5 + $0x9b0] sm:$0xff] }
  0x76   :  { %4362 = vmatprep.subr.bf16.mxu0 %v4361_v0  ;;  %v741_v61 = vld [vmem:[#allocation5 + $0x1360] sm:$0xff]  ;;  %v4381_v62 = vpack.c.bf16 %v752_v55, %v742_v54  ;;  %v751_v63 = vld [vmem:[#allocation5 + $0x13b0] sm:$0xff]  ;;  %v124_v0 = vld [vmem:[#allocation5 + $0x18] sm:$0xff]  ;;  %v4319_v4 = vpack.c.bf16 %v431_v60, %v421_v59 }
  0x77   :  { %v134_v1 = vld [vmem:[#allocation5 + $0x68] sm:$0xff]  ;;  %v772_v3 = vld [vmem:[#allocation5 + $0x1458] sm:$0xff]  ;;  %v4383_v5 = vpack.c.bf16 %v751_v63, %v741_v61  ;;  %v761_v7 = vld [vmem:[#allocation5 + $0x1400] sm:$0xff] }
  0x78   :  { %4300 = vmatpush1.bf16.msra.mxu1 %v4299_v6  ;;  %v762_v2 = vld [vmem:[#allocation5 + $0x1408] sm:$0xff]  ;;  %v4513_v6 = vpack.c.bf16 %v134_v1, %v124_v0  ;;  %v771_v11 = vld [vmem:[#allocation5 + $0x1450] sm:$0xff]  ;;  %v144_v12 = vld [vmem:[#allocation5 + $0xb8] sm:$0xff] }
  0x79   :  { %4364 = vmatpush1.bf16.msra.mxu0 %v4363_v8  ;;  %4302 = vmatprep.subr.bf16.mxu1 %v4301_v9  ;;  %v123_v8 = vld [vmem:[#allocation5 + $0x10] sm:$0xff]  ;;  %v133_v9 = vld [vmem:[#allocation5 + $0x60] sm:$0xff]  ;;  %v4385_v10 = vpack.c.bf16 %v772_v3, %v762_v2  ;;  %v782_v14 = vld [vmem:[#allocation5 + $0x14a8] sm:$0xff] }
  0x7a   :  { %4366 = vmatprep.subr.bf16.mxu0 %v4365_v13  ;;  %v154_v13 = vld [vmem:[#allocation5 + $0x108] sm:$0xff]  ;;  %v792_v15 = vld [vmem:[#allocation5 + $0x14f8] sm:$0xff]  ;;  %v6222_v17 = vld [vmem:[#allocation2] sm:$0xff]  ;;  %v4515_v19 = vpack.c.bf16 %v133_v9, %v123_v8 }
  0x7b   :  { %v75_v18 = vld [vmem:[#allocation2 + $0x10] sm:$0xff]  ;;  %v153_v24 = vld [vmem:[#allocation5 + $0x100] sm:$0xff]  ;;  %v4389_v25 = vpack.c.bf16 %v792_v15, %v782_v14  ;;  %v164_v27 = vld [vmem:[#allocation5 + $0x158] sm:$0xff] }
  0x7c   :  { %4304 = vmatpush1.bf16.msra.mxu1 %v4303_v20  ;;  %v4387_v20 = vpack.c.bf16 %v771_v11, %v761_v7  ;;  %v143_v23 = vld [vmem:[#allocation5 + $0xb0] sm:$0xff]  ;;  %v174_v28 = vld [vmem:[#allocation5 + $0x1a8] sm:$0xff]  ;;  %v812_v30 = vld [vmem:[#allocation5 + $0x1598] sm:$0xff] }
  0x7d   :  { %4368 = vmatpush1.bf16.msra.mxu0 %v4367_v21  ;;  %4306 = vmatprep.subr.bf16.mxu1 %v4305_v22  ;;  %v4517_v21 = vpack.c.bf16 %v154_v13, %v144_v12  ;;  %v781_v22 = vld [vmem:[#allocation5 + $0x14a0] sm:$0xff]  ;;  %v802_v29 = vld [vmem:[#allocation5 + $0x1548] sm:$0xff]  ;;  %v4519_v31 = vpack.c.bf16 %v153_v24, %v143_v23  ;;  %v163_v35 = vld [vmem:[#allocation5 + $0x150] sm:$0xff] }
  0x7e   :  { %4370 = vmatprep.subr.bf16.mxu0 %v4369_v26  ;;  %v791_v26 = vld [vmem:[#allocation5 + $0x14f0] sm:$0xff]  ;;  %v173_v36 = vld [vmem:[#allocation5 + $0x1a0] sm:$0xff]  ;;  %v4393_v37 = vpack.c.bf16 %v812_v30, %v802_v29  ;;  %v184_v39 = vld [vmem:[#allocation5 + $0x1f8] sm:$0xff] }
  0x7f   :  { %v194_v40 = vld [vmem:[#allocation5 + $0x248] sm:$0xff]  ;;  %v832_v42 = vld [vmem:[#allocation5 + $0x1638] sm:$0xff]  ;;  %v4523_v43 = vpack.c.bf16 %v173_v36, %v163_v35  ;;  %v193_v49 = vld [vmem:[#allocation5 + $0x240] sm:$0xff] }
  0x80   :  { %4308 = vmatpush1.bf16.msra.mxu1 %v4307_v32  ;;  %v4391_v32 = vpack.c.bf16 %v791_v26, %v781_v22  ;;  %v822_v41 = vld [vmem:[#allocation5 + $0x15e8] sm:$0xff]  ;;  %v4525_v48 = vpack.c.bf16 %v194_v40, %v184_v39  ;;  %v84_v51 = vld [vmem:[#allocation2 + $0x58] sm:$0xff]  ;;  %v841_v60 = vld [vmem:[#allocation5 + $0x1680] sm:$0xff] }
  0x81   :  { %4372 = vmatpush1.bf16.msra.mxu0 %v4371_v33  ;;  %4310 = vmatprep.subr.bf16.mxu1 %v4309_v34  ;;  %v4521_v33 = vpack.c.bf16 %v174_v28, %v164_v27  ;;  %v801_v34 = vld [vmem:[#allocation5 + $0x1540] sm:$0xff]  ;;  %v4397_v52 = vpack.c.bf16 %v832_v42, %v822_v41  ;;  %v842_v53 = vld [vmem:[#allocation5 + $0x1688] sm:$0xff]  ;;  %v204_v54 = vld [vmem:[#allocation5 + $0x298] sm:$0xff] }
  0x82   :  { %4374 = vmatprep.subr.bf16.mxu0 %v4373_v38  ;;  %v811_v38 = vld [vmem:[#allocation5 + $0x1590] sm:$0xff]  ;;  %v214_v55 = vld [vmem:[#allocation5 + $0x2e8] sm:$0xff]  ;;  %v213_v1 = vld [vmem:[#allocation5 + $0x2e0] sm:$0xff] }
  0x83   :  { %v4395_v47 = vpack.c.bf16 %v811_v38, %v801_v34  ;;  %v851_v61 = vld [vmem:[#allocation5 + $0x16d0] sm:$0xff]  ;;  %v4529_v0 = vpack.c.bf16 %v214_v55, %v204_v54  ;;  %v6230_v2 = vld [vmem:[#allocation2 + $0x88] sm:$0xff]  ;;  %v92_v3 = vld [vmem:[#allocation2 + $0x98] sm:$0xff] }
  0x84   :  { %4312 = vmatpush1.bf16.msra.mxu1 %v4311_v44  ;;  %v821_v44 = vld [vmem:[#allocation5 + $0x15e0] sm:$0xff]  ;;  %v234_v7 = vld [vmem:[#allocation5 + $0x388] sm:$0xff]  ;;  %v872_v8 = vld [vmem:[#allocation5 + $0x1778] sm:$0xff]  ;;  %v4403_v15 = vpack.c.bf16 %v851_v61, %v841_v60 }
  0x85   :  { %4376 = vmatpush1.bf16.msra.mxu0 %v4375_v45  ;;  %4314 = vmatprep.subr.bf16.mxu1 %v4313_v46  ;;  %v831_v45 = vld [vmem:[#allocation5 + $0x1630] sm:$0xff]  ;;  %v6234_v9 = vld [vmem:[#allocation2 + $0x80] sm:$0xff]  ;;  %v882_v23 = vld [vmem:[#allocation5 + $0x17c8] sm:$0xff] }
  0x86   :  { %4378 = vmatprep.subr.bf16.mxu0 %v4377_v50  ;;  %v183_v46 = vld [vmem:[#allocation5 + $0x1f0] sm:$0xff]  ;;  %v6225_v50 = vld [vmem:[#allocation2 + $0x48] sm:$0xff]  ;;  %v4399_v63 = vpack.c.bf16 %v831_v45, %v821_v44  ;;  %v861_v12 = vld [vmem:[#allocation5 + $0x1720] sm:$0xff] }
  0x87   :  { %v4527_v59 = vpack.c.bf16 %v193_v49, %v183_v46  ;;  %v871_v13 = vld [vmem:[#allocation5 + $0x1770] sm:$0xff]  ;;  %v244_v24 = vld [vmem:[#allocation5 + $0x3d8] sm:$0xff]  ;;  %v6240_v27 = vld [vmem:[#allocation2 + $0xc0] sm:$0xff] }
  0x88   :  { %4316 = vmatpush1.bf16.msra.mxu1 %v4315_v56  ;;  %v852_v56 = vld [vmem:[#allocation5 + $0x16d8] sm:$0xff]  ;;  %v223_v14 = vld [vmem:[#allocation5 + $0x330] sm:$0xff]  ;;  %v881_v30 = vld [vmem:[#allocation5 + $0x17c0] sm:$0xff] }
  0x89   :  { %4380 = vmatpush1.bf16.msra.mxu0 %v4379_v57  ;;  %4318 = vmatprep.subr.bf16.mxu1 %v4317_v58  ;;  %v6228_v57 = vld [vmem:[#allocation2 + $0x40] sm:$0xff]  ;;  %v83_v58 = vld [vmem:[#allocation2 + $0x50] sm:$0xff]  ;;  %v892_v26 = vld [vmem:[#allocation5 + $0x1818] sm:$0xff] }
  0x8a   :  { %4382 = vmatprep.subr.bf16.mxu0 %v4381_v62  ;;  %v203_v62 = vld [vmem:[#allocation5 + $0x290] sm:$0xff]  ;;  %v253_v35 = vld [vmem:[#allocation5 + $0x420] sm:$0xff]  ;;  %v6242_v36 = vld [vmem:[#allocation2 + $0x108] sm:$0xff]  ;;  %v4409_v38 = vpack.c.bf16 %v892_v26, %v882_v23 }
  0x8b   :  { %v4531_v11 = vpack.c.bf16 %v213_v1, %v203_v62  ;;  %v99_v28 = vld [vmem:[#allocation2 + $0xd0] sm:$0xff]  ;;  %v902_v39 = vld [vmem:[#allocation5 + $0x1868] sm:$0xff]  ;;  %v264_v40 = vld [vmem:[#allocation5 + $0x478] sm:$0xff] }
  0x8c   :  { %4320 = vmatpush1.bf16.msra.mxu1 %v4319_v4  ;;  %v4401_v4 = vpack.c.bf16 %v852_v56, %v842_v53  ;;  %v274_v41 = vld [vmem:[#allocation5 + $0x4c8] sm:$0xff]  ;;  %v912_v42 = vld [vmem:[#allocation5 + $0x18b8] sm:$0xff]  ;;  %v107_v44 = vld [vmem:[#allocation2 + $0x110] sm:$0xff] }
  0x8d   :  { %4384 = vmatpush1.bf16.msra.mxu0 %v4383_v5  ;;  %4514 = vmatprep.subr.bf16.mxu1 %v4513_v6  ;;  %v862_v5 = vld [vmem:[#allocation5 + $0x1728] sm:$0xff]  ;;  %v224_v6 = vld [vmem:[#allocation5 + $0x338] sm:$0xff]  ;;  %v901_v46 = vld [vmem:[#allocation5 + $0x1860] sm:$0xff]  ;;  %v4413_v55 = vpack.c.bf16 %v912_v42, %v902_v39 }
  0x8e   :  { %4386 = vmatprep.subr.bf16.mxu0 %v4385_v10  ;;  %v91_v10 = vld [vmem:[#allocation2 + $0x90] sm:$0xff]  ;;  %v4405_v22 = vpack.c.bf16 %v872_v8, %v862_v5  ;;  %v6248_v53 = vld [vmem:[#allocation2 + $0x148] sm:$0xff]  ;;  %v116_v54 = vld [vmem:[#allocation2 + $0x158] sm:$0xff] }
  0x8f   :  { %1466 = vmatmul.mubr.f32.vlgmr.msra.gmra.mrb[0].mxu1 %v6222_v17  ;;  %v922_v56 = vld [vmem:[#allocation5 + $0x1908] sm:$0xff]  ;;  %v932_v60 = vld [vmem:[#allocation5 + $0x1958] sm:$0xff]  ;;  %v6252_v61 = vld [vmem:[#allocation2 + $0x140] sm:$0xff] }
  0x90   :  { %1567 = vmatmul.mubr.f32.vlgmr.msra.gmra.mrb[0].mxu0 %v75_v18  ;;  %4516 = vmatpush1.bf16.msra.mxu1 %v4515_v19  ;;  %v4533_v18 = vpack.c.bf16 %v234_v7, %v224_v6  ;;  %v233_v19 = vld [vmem:[#allocation5 + $0x380] sm:$0xff]  ;;  %v115_v62 = vld [vmem:[#allocation2 + $0x150] sm:$0xff]  ;;  %v78_v6 = vld [vmem:[#allocation2 + $0x28] sm:$0xff]  ;;  %v4417_v7 = vpack.c.bf16 %v932_v60, %v922_v56 }
  0x91   :  { %4388 = vmatpush1.bf16.msra.mxu0 %v4387_v20  ;;  %4518 = vmatprep.subr.bf16.mxu1 %v4517_v21  ;;  %v6236_v20 = vld [vmem:[#allocation2 + $0xc8] sm:$0xff]  ;;  %v100_v21 = vld [vmem:[#allocation2 + $0xd8] sm:$0xff]  ;;  %v4535_v29 = vpack.c.bf16 %v233_v19, %v223_v14  ;;  %v293_v5 = vld [vmem:[#allocation5 + $0x560] sm:$0xff] }
  0x92   :  { %4390 = vmatprep.subr.bf16.mxu0 %v4389_v25  ;;  %1471 = vmatprep.mubr.f32.mxu1 %v6225_v50  ;;  %v254_v25 = vld [vmem:[#allocation5 + $0x428] sm:$0xff]  ;;  %v931_v8 = vld [vmem:[#allocation5 + $0x1950] sm:$0xff]  ;;  %v941_v19 = vld [vmem:[#allocation5 + $0x19a0] sm:$0xff] }
  0x93   :  { %1572 = vmatprep.mubr.f32.mxu0 %v84_v51  ;;  %1472 = vmatmul.mubr.f32.gmra.mrb[2].mxu1 %v6228_v57  ;;  %v4537_v34 = vpack.c.bf16 %v254_v25, %v244_v24  ;;  %v4541_v51 = vpack.c.bf16 %v274_v41, %v264_v40  ;;  %v951_v24 = vld [vmem:[#allocation5 + $0x19f0] sm:$0xff]  ;;  %v324_v25 = vld [vmem:[#allocation5 + $0x658] sm:$0xff]  ;;  %v334_v26 = vld [vmem:[#allocation5 + $0x6a8] sm:$0xff] }
  0x94   :  { %4520 = vmatpush1.bf16.msra.mxu1 %v4519_v31  ;;  %1573 = vmatmul.mubr.f32.gmra.mrb[2].mxu0 %v83_v58  ;;  %v891_v31 = vld [vmem:[#allocation5 + $0x1810] sm:$0xff]  ;;  %v284_v58 = vld [vmem:[#allocation5 + $0x518] sm:$0xff]  ;;  %v354_v39 = vld [vmem:[#allocation5 + $0x748] sm:$0xff] }
  0x95   :  { %4392 = vmatpush1.bf16.msra.mxu0 %v4391_v32  ;;  %4522 = vmatprep.subr.bf16.mxu1 %v4521_v33  ;;  %v243_v32 = vld [vmem:[#allocation5 + $0x3d0] sm:$0xff]  ;;  %v4407_v33 = vpack.c.bf16 %v871_v13, %v861_v12  ;;  %v4411_v49 = vpack.c.bf16 %v891_v31, %v881_v30  ;;  %v942_v12 = vld [vmem:[#allocation5 + $0x19a8] sm:$0xff]  ;;  %v952_v13 = vld [vmem:[#allocation5 + $0x19f8] sm:$0xff]  ;;  %v4553_v31 = vpack.c.bf16 %v334_v26, %v324_v25 }
  0x96   :  { %4394 = vmatprep.subr.bf16.mxu0 %v4393_v37  ;;  %1477 = vmatprep.mubr.f32.mxu1 %v6230_v2  ;;  %v108_v37 = vld [vmem:[#allocation2 + $0x118] sm:$0xff]  ;;  %v4539_v45 = vpack.c.bf16 %v253_v35, %v243_v32  ;;  %v4421_v23 = vpack.c.bf16 %v952_v13, %v942_v12  ;;  %v961_v32 = vld [vmem:[#allocation5 + $0x1a40] sm:$0xff]  ;;  %v982_v40 = vld [vmem:[#allocation5 + $0x1ae8] sm:$0xff] }
  0x97   :  { %1578 = vmatprep.mubr.f32.mxu0 %v92_v3  ;;  %1478 = vmatmul.mubr.f32.gmra.mrb[4].mxu1 %v6234_v9  ;;  %v992_v41 = vld [vmem:[#allocation5 + $0x1b38] sm:$0xff]  ;;  %v1021_v12 = vld [vmem:[#allocation5 + $0x1c20] sm:$0xff]  ;;  %v383_v13 = vld [vmem:[#allocation5 + $0x830] sm:$0xff] }
  0x98   :  { %4524 = vmatpush1.bf16.msra.mxu1 %v4523_v43  ;;  %1579 = vmatmul.mubr.f32.gmra.mrb[4].mxu0 %v91_v10  ;;  %v6246_v43 = vld [vmem:[#allocation2 + $0x100] sm:$0xff]  ;;  %v304_v10 = vld [vmem:[#allocation5 + $0x5b8] sm:$0xff] }
  0x99   :  { %4396 = vmatpush1.bf16.msra.mxu0 %v4395_v47  ;;  %4526 = vmatprep.subr.bf16.mxu1 %v4525_v48  ;;  %v911_v47 = vld [vmem:[#allocation5 + $0x18b0] sm:$0xff]  ;;  %v1012_v56 = vld [vmem:[#allocation5 + $0x1bd8] sm:$0xff] }
  0x9a   :  { %4398 = vmatprep.subr.bf16.mxu0 %v4397_v52  ;;  %1483 = vmatprep.mubr.f32.mxu1 %v6236_v20  ;;  %v263_v48 = vld [vmem:[#allocation5 + $0x470] sm:$0xff]  ;;  %v273_v52 = vld [vmem:[#allocation5 + $0x4c0] sm:$0xff]  ;;  %v4415_v1 = vpack.c.bf16 %v911_v47, %v901_v46 }
  0x9b   :  { %1584 = vmatprep.mubr.f32.mxu0 %v100_v21  ;;  %1484 = vmatmul.mubr.f32.gmra.mrb[6].mxu1 %v6240_v27  ;;  %v303_v21 = vld [vmem:[#allocation5 + $0x5b0] sm:$0xff]  ;;  %v981_v46 = vld [vmem:[#allocation5 + $0x1ae0] sm:$0xff] }
  0x9c   :  { %4528 = vmatpush1.bf16.msra.mxu1 %v4527_v59  ;;  %1585 = vmatmul.mubr.f32.gmra.mrb[6].mxu0 %v99_v28  ;;  %v294_v59 = vld [vmem:[#allocation5 + $0x568] sm:$0xff]  ;;  %v343_v47 = vld [vmem:[#allocation5 + $0x6f0] sm:$0xff] }
  0x9d   :  { %4400 = vmatpush1.bf16.msra.mxu0 %v4399_v63  ;;  %4530 = vmatprep.subr.bf16.mxu1 %v4529_v0  ;;  %v4543_v63 = vpack.c.bf16 %v273_v52, %v263_v48  ;;  %v921_v0 = vld [vmem:[#allocation5 + $0x1900] sm:$0xff]  ;;  %v4545_v3 = vpack.c.bf16 %v294_v59, %v284_v58  ;;  %v962_v28 = vld [vmem:[#allocation5 + $0x1a48] sm:$0xff]  ;;  %v364_v52 = vld [vmem:[#allocation5 + $0x798] sm:$0xff] }
  0x9e   :  { %4402 = vmatprep.subr.bf16.mxu0 %v4401_v4  ;;  %1489 = vmatprep.mubr.f32.mxu1 %v6242_v36  ;;  %v283_v4 = vld [vmem:[#allocation5 + $0x510] sm:$0xff]  ;;  %v353_v48 = vld [vmem:[#allocation5 + $0x740] sm:$0xff] }
  0x9f   :  { %1590 = vmatprep.mubr.f32.mxu0 %v108_v37  ;;  %1490 = vmatmul.mubr.f32.gmra.mrb[8].mxu1 %v6246_v43  ;;  %v4547_v14 = vpack.c.bf16 %v293_v5, %v283_v4  ;;  %v971_v37 = vld [vmem:[#allocation5 + $0x1a90] sm:$0xff]  ;;  %v4559_v58 = vpack.c.bf16 %v353_v48, %v343_v47  ;;  %v384_v4 = vld [vmem:[#allocation5 + $0x838] sm:$0xff]  ;;  %v394_v5 = vld [vmem:[#allocation5 + $0x888] sm:$0xff] }
  0xa0   :  { %4532 = vmatpush1.bf16.msra.mxu1 %v4531_v11  ;;  %1591 = vmatmul.mubr.f32.gmra.mrb[8].mxu0 %v107_v44  ;;  %v314_v11 = vld [vmem:[#allocation5 + $0x608] sm:$0xff]  ;;  %v4427_v44 = vpack.c.bf16 %v971_v37, %v961_v32  ;;  %v424_v32 = vld [vmem:[#allocation5 + $0x978] sm:$0xff] }
  0xa1   :  { %4404 = vmatpush1.bf16.msra.mxu0 %v4403_v15  ;;  %4534 = vmatprep.subr.bf16.mxu1 %v4533_v18  ;;  %v4419_v15 = vpack.c.bf16 %v931_v8, %v921_v0  ;;  %v4549_v18 = vpack.c.bf16 %v314_v11, %v304_v10  ;;  %v373_v0 = vld [vmem:[#allocation5 + $0x7e0] sm:$0xff]  ;;  %v4565_v11 = vpack.c.bf16 %v394_v5, %v384_v4  ;;  %v454_v47 = vld [vmem:[#allocation5 + $0xa68] sm:$0xff] }
  0xa2   :  { %4406 = vmatprep.subr.bf16.mxu0 %v4405_v22  ;;  %1495 = vmatprep.mubr.f32.mxu1 %v6248_v53  ;;  %v313_v22 = vld [vmem:[#allocation5 + $0x600] sm:$0xff]  ;;  %v1082_v48 = vld [vmem:[#allocation5 + $0x1e08] sm:$0xff] }
  0xa3   :  { %1596 = vmatprep.mubr.f32.mxu0 %v116_v54  ;;  %1496 = vmatmul.mubr.f32.gmra.mrb[10].mxu1 %v6252_v61  ;;  %v4551_v30 = vpack.c.bf16 %v313_v22, %v303_v21  ;;  %v374_v54 = vld [vmem:[#allocation5 + $0x7e8] sm:$0xff] }
  0xa4   :  { %4536 = vmatpush1.bf16.msra.mxu1 %v4535_v29  ;;  %1597 = vmatmul.mubr.f32.gmra.mrb[10].mxu0 %v115_v62  ;;  %v972_v29 = vld [vmem:[#allocation5 + $0x1a98] sm:$0xff]  ;;  %v4561_v60 = vpack.c.bf16 %v374_v54, %v364_v52  ;;  %v1001_v62 = vld [vmem:[#allocation5 + $0x1b80] sm:$0xff]  ;;  %v414_v21 = vld [vmem:[#allocation5 + $0x928] sm:$0xff] }
  0xa5   :  { %4408 = vmatpush1.bf16.msra.mxu0 %v4407_v33  ;;  %4538 = vmatprep.subr.bf16.mxu1 %v4537_v34  ;;  %v323_v33 = vld [vmem:[#allocation5 + $0x650] sm:$0xff]  ;;  %v333_v34 = vld [vmem:[#allocation5 + $0x6a0] sm:$0xff]  ;;  %v4425_v35 = vpack.c.bf16 %v972_v29, %v962_v28  ;;  %v1042_v22 = vld [vmem:[#allocation5 + $0x1cc8] sm:$0xff] }
  0xa6   :  { %4410 = vmatprep.subr.bf16.mxu0 %v4409_v38  ;;  %1667 = vmatprep.mubr.f32.mxu0 %v78_v6  ;;  %v344_v38 = vld [vmem:[#allocation5 + $0x6f8] sm:$0xff]  ;;  %v4555_v42 = vpack.c.bf16 %v333_v34, %v323_v33  ;;  %v1022_v6 = vld [vmem:[#allocation5 + $0x1c28] sm:$0xff]  ;;  %v1041_v28 = vld [vmem:[#allocation5 + $0x1cc0] sm:$0xff] }
  0xa7   :  { %1869 = vmatprep.mubr.f32.mxu1 %v6219_v16  ;;  %v4423_v16 = vpack.c.bf16 %v951_v24, %v941_v19  ;;  %v404_v19 = vld [vmem:[#allocation5 + $0x8d8] sm:$0xff]  ;;  %v403_v29 = vld [vmem:[#allocation5 + $0x8d0] sm:$0xff]  ;;  %v434_v33 = vld [vmem:[#allocation5 + $0x9c8] sm:$0xff] }
  0xa8   :  { %4540 = vmatpush1.bf16.msra.mxu1 %v4539_v45  ;;  %v4557_v45 = vpack.c.bf16 %v354_v39, %v344_v38  ;;  %v4569_v26 = vpack.c.bf16 %v414_v21, %v404_v19  ;;  %v1062_v34 = vld [vmem:[#allocation5 + $0x1d68] sm:$0xff]  ;;  %v4573_v39 = vpack.c.bf16 %v434_v33, %v424_v32  ;;  %v1152_v32 = vld [vmem:[#allocation5 + $0x2038] sm:$0xff] }
  0xa9   :  { %4412 = vmatpush1.bf16.msra.mxu0 %v4411_v49  ;;  %4542 = vmatprep.subr.bf16.mxu1 %v4541_v51  ;;  %v4429_v49 = vpack.c.bf16 %v992_v41, %v982_v40  ;;  %v991_v51 = vld [vmem:[#allocation5 + $0x1b30] sm:$0xff]  ;;  %v1061_v40 = vld [vmem:[#allocation5 + $0x1d60] sm:$0xff]  ;;  %v86_v19 = vld [vmem:[#allocation2 + $0x68] sm:$0xff] }
  0xaa   :  { %4414 = vmatprep.subr.bf16.mxu0 %v4413_v55  ;;  %v1002_v55 = vld [vmem:[#allocation5 + $0x1b88] sm:$0xff]  ;;  %v4431_v59 = vpack.c.bf16 %v991_v51, %v981_v46  ;;  %v423_v41 = vld [vmem:[#allocation5 + $0x970] sm:$0xff]  ;;  %v444_v46 = vld [vmem:[#allocation5 + $0xa18] sm:$0xff] }
  0xab   :  { %v4577_v54 = vpack.c.bf16 %v454_v47, %v444_v46  ;;  %v534_v46 = vld [vmem:[#allocation5 + $0xce8] sm:$0xff]  ;;  %v1172_v47 = vld [vmem:[#allocation5 + $0x20d8] sm:$0xff] }
  0xac   :  { %4544 = vmatpush1.bf16.msra.mxu1 %v4543_v63  ;;  %v363_v63 = vld [vmem:[#allocation5 + $0x790] sm:$0xff] }
  0xad   :  { %4416 = vmatpush1.bf16.msra.mxu0 %v4415_v1  ;;  %4546 = vmatprep.subr.bf16.mxu1 %v4545_v3  ;;  %v4433_v1 = vpack.c.bf16 %v1012_v56, %v1002_v55  ;;  %v1011_v3 = vld [vmem:[#allocation5 + $0x1bd0] sm:$0xff]  ;;  %v4563_v8 = vpack.c.bf16 %v373_v0, %v363_v63  ;;  %v1081_v55 = vld [vmem:[#allocation5 + $0x1e00] sm:$0xff]  ;;  %v474_v63 = vld [vmem:[#allocation5 + $0xb08] sm:$0xff] }
  0xae   :  { %4418 = vmatprep.subr.bf16.mxu0 %v4417_v7  ;;  %v1032_v7 = vld [vmem:[#allocation5 + $0x1c78] sm:$0xff]  ;;  %v4435_v10 = vpack.c.bf16 %v1011_v3, %v1001_v62  ;;  %v443_v56 = vld [vmem:[#allocation5 + $0xa10] sm:$0xff]  ;;  %v1102_v0 = vld [vmem:[#allocation5 + $0x1ea8] sm:$0xff] }
  0xaf   :  { %v464_v62 = vld [vmem:[#allocation5 + $0xab8] sm:$0xff]  ;;  %v77_v3 = vld [vmem:[#allocation2 + $0x20] sm:$0xff] }
  0xb0   :  { %4548 = vmatpush1.bf16.msra.mxu1 %v4547_v14  ;;  %v393_v14 = vld [vmem:[#allocation5 + $0x880] sm:$0xff] }
  0xb1   :  { %4420 = vmatpush1.bf16.msra.mxu0 %v4419_v15  ;;  %4550 = vmatprep.subr.bf16.mxu1 %v4549_v18  ;;  %v4437_v15 = vpack.c.bf16 %v1032_v7, %v1022_v6  ;;  %v1031_v18 = vld [vmem:[#allocation5 + $0x1c70] sm:$0xff]  ;;  %v4567_v24 = vpack.c.bf16 %v393_v14, %v383_v13  ;;  %v4581_v6 = vpack.c.bf16 %v474_v63, %v464_v62  ;;  %v1101_v7 = vld [vmem:[#allocation5 + $0x1ea0] sm:$0xff]  ;;  %v484_v13 = vld [vmem:[#allocation5 + $0xb58] sm:$0xff] }
  0xb2   :  { %4422 = vmatprep.subr.bf16.mxu0 %v4421_v23  ;;  %v1052_v23 = vld [vmem:[#allocation5 + $0x1d18] sm:$0xff]  ;;  %v4439_v25 = vpack.c.bf16 %v1031_v18, %v1021_v12  ;;  %v1111_v12 = vld [vmem:[#allocation5 + $0x1ef0] sm:$0xff]  ;;  %v494_v14 = vld [vmem:[#allocation5 + $0xba8] sm:$0xff] }
  0xb3   :  { %v1132_v18 = vld [vmem:[#allocation5 + $0x1f98] sm:$0xff]  ;;  %v554_v62 = vld [vmem:[#allocation5 + $0xd88] sm:$0xff] }
  0xb4   :  { %4552 = vmatpush1.bf16.msra.mxu1 %v4551_v30  ;;  %v413_v30 = vld [vmem:[#allocation5 + $0x920] sm:$0xff]  ;;  %v1192_v63 = vld [vmem:[#allocation5 + $0x2178] sm:$0xff] }
  0xb5   :  { %4424 = vmatpush1.bf16.msra.mxu0 %v4423_v16  ;;  %4554 = vmatprep.subr.bf16.mxu1 %v4553_v31  ;;  %v4441_v16 = vpack.c.bf16 %v1052_v23, %v1042_v22  ;;  %v1051_v31 = vld [vmem:[#allocation5 + $0x1d10] sm:$0xff]  ;;  %v4571_v37 = vpack.c.bf16 %v413_v30, %v403_v29  ;;  %v1121_v22 = vld [vmem:[#allocation5 + $0x1f40] sm:$0xff]  ;;  %v4455_v23 = vpack.c.bf16 %v1111_v12, %v1101_v7  ;;  %v574_v12 = vld [vmem:[#allocation5 + $0xe28] sm:$0xff] }
  0xb6   :  { %4426 = vmatprep.subr.bf16.mxu0 %v4425_v35  ;;  %v1072_v35 = vld [vmem:[#allocation5 + $0x1db8] sm:$0xff]  ;;  %v4443_v38 = vpack.c.bf16 %v1051_v31, %v1041_v28  ;;  %v85_v28 = vld [vmem:[#allocation2 + $0x60] sm:$0xff]  ;;  %v1131_v30 = vld [vmem:[#allocation5 + $0x1f90] sm:$0xff] }
  0xb7   :  { %v514_v31 = vld [vmem:[#allocation5 + $0xc48] sm:$0xff]  ;;  %v553_v7 = vld [vmem:[#allocation5 + $0xd80] sm:$0xff] }
  0xb8   :  { %4556 = vmatpush1.bf16.msra.mxu1 %v4555_v42  ;;  %v433_v42 = vld [vmem:[#allocation5 + $0x9c0] sm:$0xff] }
  0xb9   :  { %4428 = vmatpush1.bf16.msra.mxu0 %v4427_v44  ;;  %4558 = vmatprep.subr.bf16.mxu1 %v4557_v45  ;;  %v4445_v44 = vpack.c.bf16 %v1072_v35, %v1062_v34  ;;  %v1071_v45 = vld [vmem:[#allocation5 + $0x1db0] sm:$0xff]  ;;  %v4575_v51 = vpack.c.bf16 %v433_v42, %v423_v41  ;;  %v1141_v34 = vld [vmem:[#allocation5 + $0x1fe0] sm:$0xff]  ;;  %v94_v35 = vld [vmem:[#allocation2 + $0xa8] sm:$0xff] }
  0xba   :  { %4430 = vmatprep.subr.bf16.mxu0 %v4429_v49  ;;  %v1092_v49 = vld [vmem:[#allocation5 + $0x1e58] sm:$0xff]  ;;  %v4447_v52 = vpack.c.bf16 %v1071_v45, %v1061_v40  ;;  %v513_v40 = vld [vmem:[#allocation5 + $0xc40] sm:$0xff] }
  0xbb   :  { %v93_v41 = vld [vmem:[#allocation2 + $0xa0] sm:$0xff]  ;;  %v524_v45 = vld [vmem:[#allocation5 + $0xc98] sm:$0xff] }
  0xbc   :  { %4560 = vmatpush1.bf16.msra.mxu1 %v4559_v58  ;;  %v453_v58 = vld [vmem:[#allocation5 + $0xa60] sm:$0xff] }
  0xbd   :  { %4432 = vmatpush1.bf16.msra.mxu0 %v4431_v59  ;;  %4562 = vmatprep.subr.bf16.mxu1 %v4561_v60  ;;  %v4449_v59 = vpack.c.bf16 %v1092_v49, %v1082_v48  ;;  %v1091_v60 = vld [vmem:[#allocation5 + $0x1e50] sm:$0xff]  ;;  %v4579_v4 = vpack.c.bf16 %v453_v58, %v443_v56  ;;  %v1161_v49 = vld [vmem:[#allocation5 + $0x2080] sm:$0xff] }
  0xbe   :  { %4434 = vmatprep.subr.bf16.mxu0 %v4433_v1  ;;  %v1112_v1 = vld [vmem:[#allocation5 + $0x1ef8] sm:$0xff]  ;;  %v4451_v5 = vpack.c.bf16 %v1091_v60, %v1081_v55  ;;  %v523_v55 = vld [vmem:[#allocation5 + $0xc90] sm:$0xff]  ;;  %v533_v56 = vld [vmem:[#allocation5 + $0xce0] sm:$0xff] }
  0xbf   :  { %v101_v58 = vld [vmem:[#allocation2 + $0xe0] sm:$0xff]  ;;  %v544_v60 = vld [vmem:[#allocation5 + $0xd38] sm:$0xff] }
  0xc0   :  { %4564 = vmatpush1.bf16.msra.mxu1 %v4563_v8  ;;  %v463_v8 = vld [vmem:[#allocation5 + $0xab0] sm:$0xff] }
  0xc1   :  { %4436 = vmatpush1.bf16.msra.mxu0 %v4435_v10  ;;  %4566 = vmatprep.subr.bf16.mxu1 %v4565_v11  ;;  %v473_v10 = vld [vmem:[#allocation5 + $0xb00] sm:$0xff]  ;;  %v4453_v11 = vpack.c.bf16 %v1112_v1, %v1102_v0  ;;  %v4595_v0 = vpack.c.bf16 %v533_v56, %v523_v55 }
  0xc2   :  { %4438 = vmatprep.subr.bf16.mxu0 %v4437_v15  ;;  %v1122_v15 = vld [vmem:[#allocation5 + $0x1f48] sm:$0xff]  ;;  %v4583_v21 = vpack.c.bf16 %v473_v10, %v463_v8  ;;  %v1181_v1 = vld [vmem:[#allocation5 + $0x2120] sm:$0xff] }
  0xc3   :  { %v4457_v29 = vpack.c.bf16 %v1132_v18, %v1122_v15  ;;  %v109_v8 = vld [vmem:[#allocation2 + $0x120] sm:$0xff]  ;;  %v118_v18 = vld [vmem:[#allocation2 + $0x168] sm:$0xff] }
  0xc4   :  { %4568 = vmatpush1.bf16.msra.mxu1 %v4567_v24  ;;  %v4585_v24 = vpack.c.bf16 %v494_v14, %v484_v13  ;;  %v1212_v13 = vld [vmem:[#allocation5 + $0x2218] sm:$0xff]  ;;  %v1201_v15 = vld [vmem:[#allocation5 + $0x21c0] sm:$0xff] }
  0xc5   :  { %4440 = vmatpush1.bf16.msra.mxu0 %v4439_v25  ;;  %4570 = vmatprep.subr.bf16.mxu1 %v4569_v26  ;;  %v483_v25 = vld [vmem:[#allocation5 + $0xb50] sm:$0xff]  ;;  %v493_v26 = vld [vmem:[#allocation5 + $0xba0] sm:$0xff] }
  0xc6   :  { %4442 = vmatprep.subr.bf16.mxu0 %v4441_v16  ;;  %v504_v16 = vld [vmem:[#allocation5 + $0xbf8] sm:$0xff]  ;;  %v4587_v33 = vpack.c.bf16 %v493_v26, %v483_v25 }
  0xc7   :  { %v584_v26 = vld [vmem:[#allocation5 + $0xe78] sm:$0xff] }
  0xc8   :  { %4572 = vmatpush1.bf16.msra.mxu1 %v4571_v37  ;;  %v4459_v37 = vpack.c.bf16 %v1131_v30, %v1121_v22  ;;  %v563_v22 = vld [vmem:[#allocation5 + $0xdd0] sm:$0xff] }
  0xc9   :  { %4444 = vmatpush1.bf16.msra.mxu0 %v4443_v38  ;;  %4574 = vmatprep.subr.bf16.mxu1 %v4573_v39  ;;  %v4589_v38 = vpack.c.bf16 %v514_v31, %v504_v16  ;;  %v503_v39 = vld [vmem:[#allocation5 + $0xbf0] sm:$0xff]  ;;  %v80_v16 = vld [vmem:[#allocation2 + $0x38] sm:$0xff] }
  0xca   :  { %4446 = vmatprep.subr.bf16.mxu0 %v4445_v44  ;;  %v1151_v44 = vld [vmem:[#allocation5 + $0x2030] sm:$0xff]  ;;  %v4591_v48 = vpack.c.bf16 %v513_v40, %v503_v39  ;;  %v1242_v39 = vld [vmem:[#allocation5 + $0x2308] sm:$0xff]  ;;  %v5868_v40 = vld [vmem:[#allocation2 + $0x18] sm:$0xff] }
  0xcc   :  { %4576 = vmatpush1.bf16.msra.mxu1 %v4575_v51  ;;  %v102_v51 = vld [vmem:[#allocation2 + $0xe8] sm:$0xff] }
  0xcd   :  { %4448 = vmatpush1.bf16.msra.mxu0 %v4447_v52  ;;  %4578 = vmatprep.subr.bf16.mxu1 %v4577_v54  ;;  %v4463_v52 = vpack.c.bf16 %v1151_v44, %v1141_v34  ;;  %v4593_v54 = vpack.c.bf16 %v534_v46, %v524_v45  ;;  %v593_v34 = vld [vmem:[#allocation5 + $0xec0] sm:$0xff]  ;;  %v603_v46 = vld [vmem:[#allocation5 + $0xf10] sm:$0xff] }
  0xce   :  { %4450 = vmatprep.subr.bf16.mxu0 %v4449_v59  ;;  %v1241_v45 = vld [vmem:[#allocation5 + $0x2300] sm:$0xff] }
  0xcf   :  { %1870 = vmatmul.mubr.f32.vlgmr.msra.gmra.mrb[12].mxu1 %v6222_v17  ;;  %v1142_v17 = vld [vmem:[#allocation5 + $0x1fe8] sm:$0xff] }
  0xd0   :  { %1668 = vmatmul.mubr.f32.vlgmr.msra.gmra.mrb[0].mxu0 %v77_v3  ;;  %4580 = vmatpush1.bf16.msra.mxu1 %v4579_v4  ;;  %v4461_v42 = vpack.c.bf16 %v1152_v32, %v1142_v17  ;;  %v110_v3 = vld [vmem:[#allocation2 + $0x128] sm:$0xff]  ;;  %v1221_v32 = vld [vmem:[#allocation5 + $0x2260] sm:$0xff] }
  0xd1   :  { %4452 = vmatpush1.bf16.msra.mxu0 %v4451_v5  ;;  %4582 = vmatprep.subr.bf16.mxu1 %v4581_v6  ;;  %v4597_v5 = vpack.c.bf16 %v554_v62, %v544_v60  ;;  %v543_v6 = vld [vmem:[#allocation5 + $0xd30] sm:$0xff] }
  0xd2   :  { %4454 = vmatprep.subr.bf16.mxu0 %v4453_v11  ;;  %1673 = vmatprep.mubr.f32.mxu0 %v86_v19  ;;  %v564_v11 = vld [vmem:[#allocation5 + $0xdd8] sm:$0xff]  ;;  %v4599_v14 = vpack.c.bf16 %v553_v7, %v543_v6  ;;  %v1271_v62 = vld [vmem:[#allocation5 + $0x23f0] sm:$0xff]  ;;  %v1281_v6 = vld [vmem:[#allocation5 + $0x2440] sm:$0xff] }
  0xd3   :  { %1875 = vmatprep.mubr.f32.mxu1 %v6225_v50  ;;  %v1162_v50 = vld [vmem:[#allocation5 + $0x2088] sm:$0xff]  ;;  %v643_v7 = vld [vmem:[#allocation5 + $0x1050] sm:$0xff] }
  0xd4   :  { %4584 = vmatpush1.bf16.msra.mxu1 %v4583_v21  ;;  %1674 = vmatmul.mubr.f32.gmra.mrb[2].mxu0 %v85_v28  ;;  %v4465_v59 = vpack.c.bf16 %v1172_v47, %v1162_v50  ;;  %v4601_v21 = vpack.c.bf16 %v574_v12, %v564_v11  ;;  %v594_v28 = vld [vmem:[#allocation5 + $0xec8] sm:$0xff]  ;;  %v613_v50 = vld [vmem:[#allocation5 + $0xf60] sm:$0xff]  ;;  %v664_v11 = vld [vmem:[#allocation5 + $0x10f8] sm:$0xff] }
  0xd5   :  { %4456 = vmatpush1.bf16.msra.mxu0 %v4455_v23  ;;  %4586 = vmatprep.subr.bf16.mxu1 %v4585_v24  ;;  %v573_v23 = vld [vmem:[#allocation5 + $0xe20] sm:$0xff]  ;;  %v4605_v17 = vpack.c.bf16 %v594_v28, %v584_v26  ;;  %v674_v12 = vld [vmem:[#allocation5 + $0x1148] sm:$0xff]  ;;  %v1332_v28 = vld [vmem:[#allocation5 + $0x25d8] sm:$0xff] }
  0xd6   :  { %4458 = vmatprep.subr.bf16.mxu0 %v4457_v29  ;;  %1876 = vmatmul.mubr.f32.gmra.mrb[14].mxu1 %v6228_v57  ;;  %v1171_v57 = vld [vmem:[#allocation5 + $0x20d0] sm:$0xff]  ;;  %v117_v24 = vld [vmem:[#allocation2 + $0x160] sm:$0xff]  ;;  %v1232_v29 = vld [vmem:[#allocation5 + $0x22b8] sm:$0xff]  ;;  %v4603_v30 = vpack.c.bf16 %v573_v23, %v563_v22 }
  0xd7   :  { %1679 = vmatprep.mubr.f32.mxu0 %v94_v35  ;;  %1881 = vmatprep.mubr.f32.mxu1 %v6230_v2  ;;  %v1182_v2 = vld [vmem:[#allocation5 + $0x2128] sm:$0xff]  ;;  %v4467_v4 = vpack.c.bf16 %v1171_v57, %v1161_v49  ;;  %v624_v49 = vld [vmem:[#allocation5 + $0xfb8] sm:$0xff]  ;;  %v633_v57 = vld [vmem:[#allocation5 + $0x1000] sm:$0xff] }
  0xd8   :  { %4588 = vmatpush1.bf16.msra.mxu1 %v4587_v33  ;;  %1680 = vmatmul.mubr.f32.gmra.mrb[4].mxu0 %v93_v41  ;;  %v4469_v10 = vpack.c.bf16 %v1192_v63, %v1182_v2  ;;  %v583_v33 = vld [vmem:[#allocation5 + $0xe70] sm:$0xff]  ;;  %v644_v2 = vld [vmem:[#allocation5 + $0x1058] sm:$0xff]  ;;  %v654_v63 = vld [vmem:[#allocation5 + $0x10a8] sm:$0xff] }
  0xd9   :  { %4460 = vmatpush1.bf16.msra.mxu0 %v4459_v37  ;;  %4590 = vmatprep.subr.bf16.mxu1 %v4589_v38  ;;  %v1231_v37 = vld [vmem:[#allocation5 + $0x22b0] sm:$0xff]  ;;  %v614_v38 = vld [vmem:[#allocation5 + $0xf68] sm:$0xff]  ;;  %v4607_v41 = vpack.c.bf16 %v593_v34, %v583_v33  ;;  %v673_v22 = vld [vmem:[#allocation5 + $0x1140] sm:$0xff] }
  0xda   :  { %4462 = vmatprep.subr.bf16.mxu0 %v4461_v42  ;;  %1882 = vmatmul.mubr.f32.gmra.mrb[16].mxu1 %v6234_v9  ;;  %v1191_v9 = vld [vmem:[#allocation5 + $0x2170] sm:$0xff]  ;;  %v4479_v42 = vpack.c.bf16 %v1231_v37, %v1221_v32  ;;  %v1322_v26 = vld [vmem:[#allocation5 + $0x2588] sm:$0xff]  ;;  %v704_v34 = vld [vmem:[#allocation5 + $0x1238] sm:$0xff] }
  0xdb   :  { %1685 = vmatprep.mubr.f32.mxu0 %v102_v51  ;;  %1887 = vmatprep.mubr.f32.mxu1 %v6236_v20  ;;  %v1202_v20 = vld [vmem:[#allocation5 + $0x21c8] sm:$0xff]  ;;  %v4471_v19 = vpack.c.bf16 %v1191_v9, %v1181_v1  ;;  %v1292_v1 = vld [vmem:[#allocation5 + $0x2498] sm:$0xff]  ;;  %v1291_v9 = vld [vmem:[#allocation5 + $0x2490] sm:$0xff]  ;;  %v4497_v32 = vpack.c.bf16 %v1332_v28, %v1322_v26 }
  0xdc   :  { %4592 = vmatpush1.bf16.msra.mxu1 %v4591_v48  ;;  %1686 = vmatmul.mubr.f32.gmra.mrb[6].mxu0 %v101_v58  ;;  %v4473_v25 = vpack.c.bf16 %v1212_v13, %v1202_v20  ;;  %v1251_v48 = vld [vmem:[#allocation5 + $0x2350] sm:$0xff]  ;;  %v634_v51 = vld [vmem:[#allocation5 + $0x1008] sm:$0xff]  ;;  %v1261_v58 = vld [vmem:[#allocation5 + $0x23a0] sm:$0xff] }
  0xdd   :  { %4464 = vmatpush1.bf16.msra.mxu0 %v4463_v52  ;;  %4594 = vmatprep.subr.bf16.mxu1 %v4593_v54  ;;  %v1272_v52 = vld [vmem:[#allocation5 + $0x23f8] sm:$0xff]  ;;  %v4611_v54 = vpack.c.bf16 %v613_v50, %v603_v46  ;;  %v4483_v55 = vpack.c.bf16 %v1251_v48, %v1241_v45  ;;  %v4613_v56 = vpack.c.bf16 %v634_v51, %v624_v49  ;;  %v1302_v20 = vld [vmem:[#allocation5 + $0x24e8] sm:$0xff]  ;;  %v1331_v33 = vld [vmem:[#allocation5 + $0x25d0] sm:$0xff] }
  0xde   :  { %4466 = vmatprep.subr.bf16.mxu0 %v4465_v59  ;;  %1888 = vmatmul.mubr.f32.gmra.mrb[18].mxu1 %v6240_v27  ;;  %v1211_v27 = vld [vmem:[#allocation5 + $0x2210] sm:$0xff]  ;;  %v1312_v13 = vld [vmem:[#allocation5 + $0x2538] sm:$0xff]  ;;  %v1342_v37 = vld [vmem:[#allocation5 + $0x2628] sm:$0xff] }
  0xdf   :  { %1691 = vmatprep.mubr.f32.mxu0 %v110_v3  ;;  %1893 = vmatprep.mubr.f32.mxu1 %v6242_v36  ;;  %v1222_v36 = vld [vmem:[#allocation5 + $0x2268] sm:$0xff]  ;;  %v4475_v31 = vpack.c.bf16 %v1211_v27, %v1201_v15  ;;  %v623_v59 = vld [vmem:[#allocation5 + $0xfb0] sm:$0xff]  ;;  %v4491_v15 = vpack.c.bf16 %v1291_v9, %v1281_v6  ;;  %v4493_v23 = vpack.c.bf16 %v1312_v13, %v1302_v20  ;;  %v724_v46 = vld [vmem:[#allocation5 + $0x12d8] sm:$0xff] }
  0xe0   :  { %4596 = vmatpush1.bf16.msra.mxu1 %v4595_v0  ;;  %1692 = vmatmul.mubr.f32.gmra.mrb[8].mxu0 %v109_v8  ;;  %v4477_v35 = vpack.c.bf16 %v1232_v29, %v1222_v36  ;;  %v1282_v0 = vld [vmem:[#allocation5 + $0x2448] sm:$0xff]  ;;  %v4615_v3 = vpack.c.bf16 %v633_v57, %v623_v59  ;;  %v653_v8 = vld [vmem:[#allocation5 + $0x10a0] sm:$0xff]  ;;  %v1351_v45 = vld [vmem:[#allocation5 + $0x2670] sm:$0xff] }
  0xe1   :  { %4468 = vmatpush1.bf16.msra.mxu0 %v4467_v4  ;;  %4598 = vmatprep.subr.bf16.mxu1 %v4597_v5  ;;  %v4487_v4 = vpack.c.bf16 %v1271_v62, %v1261_v58  ;;  %v4617_v5 = vpack.c.bf16 %v654_v63, %v644_v2  ;;  %v694_v27 = vld [vmem:[#allocation5 + $0x11e8] sm:$0xff]  ;;  %v1372_v48 = vld [vmem:[#allocation5 + $0x2718] sm:$0xff]  ;;  %v1371_v58 = vld [vmem:[#allocation5 + $0x2710] sm:$0xff] }
  0xe2   :  { %4470 = vmatprep.subr.bf16.mxu0 %v4469_v10  ;;  %1894 = vmatmul.mubr.f32.gmra.mrb[20].mxu1 %v6246_v43  ;;  %v604_v43 = vld [vmem:[#allocation5 + $0xf18] sm:$0xff]  ;;  %v4489_v10 = vpack.c.bf16 %v1292_v1, %v1282_v0  ;;  %v734_v50 = vld [vmem:[#allocation5 + $0x1328] sm:$0xff]  ;;  %v1381_v1 = vld [vmem:[#allocation5 + $0x2760] sm:$0xff] }
  0xe3   :  { %1697 = vmatprep.mubr.f32.mxu0 %v118_v18  ;;  %1899 = vmatprep.mubr.f32.mxu1 %v6248_v53  ;;  %v1252_v53 = vld [vmem:[#allocation5 + $0x2358] sm:$0xff]  ;;  %v4609_v44 = vpack.c.bf16 %v614_v38, %v604_v43  ;;  %v4621_v18 = vpack.c.bf16 %v674_v12, %v664_v11  ;;  %v754_v57 = vld [vmem:[#allocation5 + $0x13c8] sm:$0xff]  ;;  %v1391_v6 = vld [vmem:[#allocation5 + $0x27b0] sm:$0xff] }
  0xe4   :  { %4600 = vmatpush1.bf16.msra.mxu1 %v4599_v14  ;;  %1698 = vmatmul.mubr.f32.gmra.mrb[10].mxu0 %v117_v24  ;;  %v4481_v47 = vpack.c.bf16 %v1252_v53, %v1242_v39  ;;  %v4619_v14 = vpack.c.bf16 %v653_v8, %v643_v7  ;;  %v1311_v24 = vld [vmem:[#allocation5 + $0x2530] sm:$0xff]  ;;  %v1352_v43 = vld [vmem:[#allocation5 + $0x2678] sm:$0xff]  ;;  %v774_v8 = vld [vmem:[#allocation5 + $0x1468] sm:$0xff]  ;;  %v4511_v12 = vpack.c.bf16 %v1391_v6, %v1381_v1 }
  0xe5   :  { %4472 = vmatpush1.bf16.msra.mxu0 %v4471_v19  ;;  %4602 = vmatprep.subr.bf16.mxu1 %v4601_v21  ;;  %v1301_v19 = vld [vmem:[#allocation5 + $0x24e0] sm:$0xff]  ;;  %v663_v21 = vld [vmem:[#allocation5 + $0x10f0] sm:$0xff]  ;;  %v744_v59 = vld [vmem:[#allocation5 + $0x1378] sm:$0xff] }
  0xe6   :  { %4474 = vmatprep.subr.bf16.mxu0 %v4473_v25  ;;  %1900 = vmatmul.mubr.f32.gmra.mrb[22].mxu1 %v6252_v61  ;;  %v1262_v61 = vld [vmem:[#allocation5 + $0x23a8] sm:$0xff]  ;;  %v684_v25 = vld [vmem:[#allocation5 + $0x1198] sm:$0xff]  ;;  %v4623_v36 = vpack.c.bf16 %v673_v22, %v663_v21  ;;  %v4495_v29 = vpack.c.bf16 %v1311_v24, %v1301_v19  ;;  %v4637_v0 = vpack.c.bf16 %v754_v57, %v744_v59  ;;  %v763_v13 = vld [vmem:[#allocation5 + $0x1410] sm:$0xff] }
  0xe7   :  { %1768 = vmatprep.mubr.f32.mxu0 %v80_v16  ;;  %1970 = vmatprep.mubr.f32.mxu1 %v5868_v40  ;;  %v4485_v60 = vpack.c.bf16 %v1272_v52, %v1262_v61  ;;  %v1321_v16 = vld [vmem:[#allocation5 + $0x2580] sm:$0xff]  ;;  %v4633_v61 = vpack.c.bf16 %v734_v50, %v724_v46  ;;  %v1392_v62 = vld [vmem:[#allocation5 + $0x27b8] sm:$0xff]  ;;  %v135_v19 = vld [vmem:[#allocation5 + $0x70] sm:$0xff] }
  0xe8   :  { %4604 = vmatpush1.bf16.msra.mxu1 %v4603_v30  ;;  %v4625_v30 = vpack.c.bf16 %v694_v27, %v684_v25  ;;  %v4499_v39 = vpack.c.bf16 %v1331_v33, %v1321_v16  ;;  %v1341_v40 = vld [vmem:[#allocation5 + $0x2620] sm:$0xff]  ;;  %v764_v7 = vld [vmem:[#allocation5 + $0x1418] sm:$0xff]  ;;  %v794_v22 = vld [vmem:[#allocation5 + $0x1508] sm:$0xff] }
  0xe9   :  { %4476 = vmatpush1.bf16.msra.mxu0 %v4475_v31  ;;  %4606 = vmatprep.subr.bf16.mxu1 %v4605_v17  ;;  %v683_v31 = vld [vmem:[#allocation5 + $0x1190] sm:$0xff]  ;;  %v693_v17 = vld [vmem:[#allocation5 + $0x11e0] sm:$0xff]  ;;  %v4503_v51 = vpack.c.bf16 %v1351_v45, %v1341_v40  ;;  %v136_v9 = vld [vmem:[#allocation5 + $0x78] sm:$0xff]  ;;  %v4641_v20 = vpack.c.bf16 %v774_v8, %v764_v7 }
  0xea   :  { %4478 = vmatprep.subr.bf16.mxu0 %v4477_v35  ;;  %v714_v35 = vld [vmem:[#allocation5 + $0x1288] sm:$0xff]  ;;  %v4627_v38 = vpack.c.bf16 %v693_v17, %v683_v31  ;;  %v1361_v52 = vld [vmem:[#allocation5 + $0x26c0] sm:$0xff]  ;;  %v784_v21 = vld [vmem:[#allocation5 + $0x14b8] sm:$0xff] }
  0xeb   :  { %v4629_v53 = vpack.c.bf16 %v714_v35, %v704_v34  ;;  %v4507_v63 = vpack.c.bf16 %v1371_v58, %v1361_v52  ;;  %v156_v24 = vld [vmem:[#allocation5 + $0x118] sm:$0xff]  ;;  %v79_v25 = vld [vmem:[#allocation2 + $0x30] sm:$0xff]  ;;  %v145_v31 = vld [vmem:[#allocation5 + $0xc0] sm:$0xff] }
  0xec   :  { %4608 = vmatpush1.bf16.msra.mxu1 %v4607_v41  ;;  %v703_v41 = vld [vmem:[#allocation5 + $0x1230] sm:$0xff]  ;;  %v88_v28 = vld [vmem:[#allocation2 + $0x78] sm:$0xff]  ;;  %v814_v34 = vld [vmem:[#allocation5 + $0x15a8] sm:$0xff] }
  0xed   :  { %4480 = vmatpush1.bf16.msra.mxu0 %v4479_v42  ;;  %4610 = vmatprep.subr.bf16.mxu1 %v4609_v44  ;;  %v713_v42 = vld [vmem:[#allocation5 + $0x1280] sm:$0xff]  ;;  %v4501_v44 = vpack.c.bf16 %v1352_v43, %v1342_v37  ;;  %v155_v17 = vld [vmem:[#allocation5 + $0x110] sm:$0xff]  ;;  %v166_v35 = vld [vmem:[#allocation5 + $0x168] sm:$0xff] }
  0xee   :  { %4482 = vmatprep.subr.bf16.mxu0 %v4481_v47  ;;  %v1362_v47 = vld [vmem:[#allocation5 + $0x26c8] sm:$0xff]  ;;  %v4631_v49 = vpack.c.bf16 %v713_v42, %v703_v41  ;;  %v5869_v33 = vld [vmem:[#allocation2 + $0x10] sm:$0xff]  ;;  %v176_v37 = vld [vmem:[#allocation5 + $0x1b8] sm:$0xff] }
  0xef   :  { %v87_v43 = vld [vmem:[#allocation2 + $0x70] sm:$0xff]  ;;  %v813_v41 = vld [vmem:[#allocation5 + $0x15a0] sm:$0xff]  ;;  %v824_v50 = vld [vmem:[#allocation5 + $0x15f8] sm:$0xff] }
  0xf0   :  { %4612 = vmatpush1.bf16.msra.mxu1 %v4611_v54  ;;  %v723_v54 = vld [vmem:[#allocation5 + $0x12d0] sm:$0xff]  ;;  %v165_v45 = vld [vmem:[#allocation5 + $0x160] sm:$0xff]  ;;  %v216_v1 = vld [vmem:[#allocation5 + $0x2f8] sm:$0xff] }
  0xf1   :  { %4484 = vmatpush1.bf16.msra.mxu0 %v4483_v55  ;;  %4614 = vmatprep.subr.bf16.mxu1 %v4613_v56  ;;  %v733_v55 = vld [vmem:[#allocation5 + $0x1320] sm:$0xff]  ;;  %v4505_v56 = vpack.c.bf16 %v1372_v48, %v1362_v47  ;;  %v803_v40 = vld [vmem:[#allocation5 + $0x1550] sm:$0xff]  ;;  %v834_v47 = vld [vmem:[#allocation5 + $0x1648] sm:$0xff] }
  0xf2   :  { %4486 = vmatprep.subr.bf16.mxu0 %v4485_v60  ;;  %v1382_v60 = vld [vmem:[#allocation5 + $0x2768] sm:$0xff]  ;;  %v4635_v2 = vpack.c.bf16 %v733_v55, %v723_v54  ;;  %v175_v46 = vld [vmem:[#allocation5 + $0x1b0] sm:$0xff]  ;;  %v4651_v52 = vpack.c.bf16 %v813_v41, %v803_v40  ;;  %v104_v55 = vld [vmem:[#allocation2 + $0xf8] sm:$0xff]  ;;  %v4653_v59 = vpack.c.bf16 %v834_v47, %v824_v50 }
  0xf3   :  { %v186_v48 = vld [vmem:[#allocation5 + $0x208] sm:$0xff]  ;;  %v4779_v54 = vpack.c.bf16 %v175_v46, %v165_v45  ;;  %v833_v58 = vld [vmem:[#allocation5 + $0x1640] sm:$0xff]  ;;  %v112_v7 = vld [vmem:[#allocation2 + $0x138] sm:$0xff] }
  0xf4   :  { %4616 = vmatpush1.bf16.msra.mxu1 %v4615_v3  ;;  %v743_v3 = vld [vmem:[#allocation5 + $0x1370] sm:$0xff]  ;;  %v904_v41 = vld [vmem:[#allocation5 + $0x1878] sm:$0xff] }
  0xf5   :  { %4488 = vmatpush1.bf16.msra.mxu0 %v4487_v4  ;;  %4618 = vmatprep.subr.bf16.mxu1 %v4617_v5  ;;  %v753_v4 = vld [vmem:[#allocation5 + $0x13c0] sm:$0xff]  ;;  %v4509_v5 = vpack.c.bf16 %v1392_v62, %v1382_v60  ;;  %v195_v62 = vld [vmem:[#allocation5 + $0x250] sm:$0xff]  ;;  %v276_v45 = vld [vmem:[#allocation5 + $0x4d8] sm:$0xff] }
  0xf6   :  { %4490 = vmatprep.subr.bf16.mxu0 %v4489_v10  ;;  %v126_v10 = vld [vmem:[#allocation5 + $0x28] sm:$0xff]  ;;  %v4639_v11 = vpack.c.bf16 %v753_v4, %v743_v3  ;;  %v185_v60 = vld [vmem:[#allocation5 + $0x200] sm:$0xff]  ;;  %v5871_v3 = vld [vmem:[#allocation2 + $0x50] sm:$0xff] }
  0xf7   :  { %v103_v4 = vld [vmem:[#allocation2 + $0xf0] sm:$0xff]  ;;  %v4783_v6 = vpack.c.bf16 %v195_v62, %v185_v60  ;;  %v5874_v46 = vld [vmem:[#allocation2 + $0xd8] sm:$0xff]  ;;  %v5877_v62 = vld [vmem:[#allocation2 + $0x8] sm:$0xff] }
  0xf8   :  { %4620 = vmatpush1.bf16.msra.mxu1 %v4619_v14  ;;  %v773_v14 = vld [vmem:[#allocation5 + $0x1460] sm:$0xff]  ;;  %v843_v8 = vld [vmem:[#allocation5 + $0x1690] sm:$0xff]  ;;  %v5876_v60 = vld [vmem:[#allocation2 + $0x118] sm:$0xff] }
  0xf9   :  { %4492 = vmatpush1.bf16.msra.mxu0 %v4491_v15  ;;  %4622 = vmatprep.subr.bf16.mxu1 %v4621_v18  ;;  %v4769_v15 = vpack.c.bf16 %v136_v9, %v126_v10  ;;  %v125_v18 = vld [vmem:[#allocation5 + $0x20] sm:$0xff]  ;;  %v4643_v27 = vpack.c.bf16 %v773_v14, %v763_v13  ;;  %v864_v13 = vld [vmem:[#allocation5 + $0x1738] sm:$0xff]  ;;  %v874_v14 = vld [vmem:[#allocation5 + $0x1788] sm:$0xff] }
  0xfa   :  { %4494 = vmatprep.subr.bf16.mxu0 %v4493_v23  ;;  %v146_v23 = vld [vmem:[#allocation5 + $0xc8] sm:$0xff]  ;;  %v4771_v26 = vpack.c.bf16 %v135_v19, %v125_v18  ;;  %v853_v10 = vld [vmem:[#allocation5 + $0x16e0] sm:$0xff]  ;;  %v236_v18 = vld [vmem:[#allocation5 + $0x398] sm:$0xff] }
  0xfb   :  { %v4773_v16 = vpack.c.bf16 %v156_v24, %v146_v23  ;;  %v5872_v19 = vld [vmem:[#allocation2 + $0x98] sm:$0xff]  ;;  %v255_v40 = vld [vmem:[#allocation5 + $0x430] sm:$0xff] }
  0xfc   :  { %4624 = vmatpush1.bf16.msra.mxu1 %v4623_v36  ;;  %v783_v36 = vld [vmem:[#allocation5 + $0x14b0] sm:$0xff]  ;;  %v120_v23 = vld [vmem:[#allocation2 + $0x178] sm:$0xff] }
  0xfd   :  { %4496 = vmatpush1.bf16.msra.mxu0 %v4495_v29  ;;  %4626 = vmatprep.subr.bf16.mxu1 %v4625_v30  ;;  %v793_v29 = vld [vmem:[#allocation5 + $0x1500] sm:$0xff]  ;;  %v4645_v30 = vpack.c.bf16 %v794_v22, %v784_v21  ;;  %v111_v21 = vld [vmem:[#allocation2 + $0x130] sm:$0xff]  ;;  %v4659_v22 = vpack.c.bf16 %v853_v10, %v843_v8  ;;  %v954_v8 = vld [vmem:[#allocation5 + $0x1a08] sm:$0xff] }
  0xfe   :  { %4498 = vmatprep.subr.bf16.mxu0 %v4497_v32  ;;  %v804_v32 = vld [vmem:[#allocation5 + $0x1558] sm:$0xff]  ;;  %v5878_v10 = vld [vmem:[#allocation2 + $0x110] sm:$0xff] }
  0xff   :  { %v4649_v42 = vpack.c.bf16 %v814_v34, %v804_v32  ;;  %v5873_v32 = vld [vmem:[#allocation2 + $0x90] sm:$0xff] }
 0x100   :  { %4628 = vmatpush1.bf16.msra.mxu1 %v4627_v38  ;;  %v4647_v38 = vpack.c.bf16 %v793_v29, %v783_v36  ;;  %v235_v29 = vld [vmem:[#allocation5 + $0x390] sm:$0xff] }
 0x101   :  { %4500 = vmatpush1.bf16.msra.mxu0 %v4499_v39  ;;  %4630 = vmatprep.subr.bf16.mxu1 %v4629_v53  ;;  %v4775_v39 = vpack.c.bf16 %v155_v17, %v145_v31  ;;  %v96_v53 = vld [vmem:[#allocation2 + $0xb8] sm:$0xff]  ;;  %v246_v31 = vld [vmem:[#allocation5 + $0x3e8] sm:$0xff] }
 0x102   :  { %4502 = vmatprep.subr.bf16.mxu0 %v4501_v44  ;;  %v4777_v44 = vpack.c.bf16 %v176_v37, %v166_v35  ;;  %v256_v17 = vld [vmem:[#allocation5 + $0x438] sm:$0xff] }
 0x104   :  { %4632 = vmatpush1.bf16.msra.mxu1 %v4631_v49  ;;  %v196_v49 = vld [vmem:[#allocation5 + $0x258] sm:$0xff] }
 0x105   :  { %4504 = vmatpush1.bf16.msra.mxu0 %v4503_v51  ;;  %4634 = vmatprep.subr.bf16.mxu1 %v4633_v61  ;;  %v5870_v51 = vld [vmem:[#allocation2 + $0x58] sm:$0xff]  ;;  %v95_v61 = vld [vmem:[#allocation2 + $0xb0] sm:$0xff]  ;;  %v4781_v57 = vpack.c.bf16 %v196_v49, %v186_v48 }
 0x106   :  { %4506 = vmatprep.subr.bf16.mxu0 %v4505_v56  ;;  %v823_v56 = vld [vmem:[#allocation5 + $0x15f0] sm:$0xff] }
 0x107   :  { %v903_v49 = vld [vmem:[#allocation5 + $0x1870] sm:$0xff] }
 0x108   :  { %4636 = vmatpush1.bf16.msra.mxu1 %v4635_v2  ;;  %v844_v2 = vld [vmem:[#allocation5 + $0x1698] sm:$0xff] }
 0x109   :  { %4508 = vmatpush1.bf16.msra.mxu0 %v4507_v63  ;;  %4638 = vmatprep.subr.bf16.mxu1 %v4637_v0  ;;  %v854_v63 = vld [vmem:[#allocation5 + $0x16e8] sm:$0xff] }
 0x10a   :  { %4510 = vmatprep.subr.bf16.mxu0 %v4509_v5  ;;  %v206_v0 = vld [vmem:[#allocation5 + $0x2a8] sm:$0xff]  ;;  %v4655_v5 = vpack.c.bf16 %v833_v58, %v823_v56  ;;  %v4657_v9 = vpack.c.bf16 %v854_v63, %v844_v2  ;;  %v5875_v58 = vld [vmem:[#allocation2 + $0xd0] sm:$0xff] }
 0x10b   :  { %v934_v56 = vld [vmem:[#allocation5 + $0x1968] sm:$0xff] }
 0x10c   :  { %4640 = vmatpush1.bf16.msra.mxu1 %v4639_v11  ;;  %v4785_v11 = vpack.c.bf16 %v216_v1, %v206_v0  ;;  %v923_v1 = vld [vmem:[#allocation5 + $0x1910] sm:$0xff] }
 0x10d   :  { %4512 = vmatpush1.bf16.msra.mxu0 %v4511_v12  ;;  %4642 = vmatprep.subr.bf16.mxu1 %v4641_v20  ;;  %v205_v12 = vld [vmem:[#allocation5 + $0x2a0] sm:$0xff]  ;;  %v215_v20 = vld [vmem:[#allocation5 + $0x2f0] sm:$0xff] }
 0x10e   :  { %4770 = vmatprep.subr.bf16.mxu0 %v4769_v15  ;;  %v226_v15 = vld [vmem:[#allocation5 + $0x348] sm:$0xff]  ;;  %v4787_v24 = vpack.c.bf16 %v215_v20, %v205_v12  ;;  %v5879_v12 = vld [vmem:[#allocation2 + $0x158] sm:$0xff] }
 0x10f   :  { %1971 = vmatmul.mubr.f32.vlgmr.msra.gmra.mrb[12].mxu1 %v5869_v33  ;;  %v4789_v36 = vpack.c.bf16 %v236_v18, %v226_v15  ;;  %v119_v33 = vld [vmem:[#allocation2 + $0x170] sm:$0xff]  ;;  %v953_v18 = vld [vmem:[#allocation5 + $0x1a00] sm:$0xff] }
 0x110   :  { %1769 = vmatmul.mubr.f32.vlgmr.msra.gmra.mrb[0].mxu0 %v79_v25  ;;  %4644 = vmatpush1.bf16.msra.mxu1 %v4643_v27  ;;  %v863_v25 = vld [vmem:[#allocation5 + $0x1730] sm:$0xff]  ;;  %v873_v27 = vld [vmem:[#allocation5 + $0x1780] sm:$0xff] }
 0x111   :  { %4772 = vmatpush1.bf16.msra.mxu0 %v4771_v26  ;;  %1774 = vmatprep.mubr.f32.mxu0 %v88_v28  ;;  %v225_v26 = vld [vmem:[#allocation5 + $0x340] sm:$0xff]  ;;  %v4661_v28 = vpack.c.bf16 %v874_v14, %v864_v13  ;;  %v4663_v34 = vpack.c.bf16 %v873_v27, %v863_v25  ;;  %v943_v15 = vld [vmem:[#allocation5 + $0x19b0] sm:$0xff]  ;;  %v326_v27 = vld [vmem:[#allocation5 + $0x668] sm:$0xff] }
 0x112   :  { %4646 = vmatprep.subr.bf16.mxu1 %v4645_v30  ;;  %4774 = vmatprep.subr.bf16.mxu0 %v4773_v16  ;;  %v884_v30 = vld [vmem:[#allocation5 + $0x17d8] sm:$0xff]  ;;  %v894_v16 = vld [vmem:[#allocation5 + $0x1828] sm:$0xff]  ;;  %v4791_v35 = vpack.c.bf16 %v235_v29, %v225_v26  ;;  %v5880_v25 = vld [vmem:[#allocation2 + $0x150] sm:$0xff] }
 0x113   :  { %1976 = vmatprep.mubr.f32.mxu1 %v5870_v51  ;;  %v4665_v37 = vpack.c.bf16 %v894_v16, %v884_v30  ;;  %v913_v51 = vld [vmem:[#allocation5 + $0x18c0] sm:$0xff]  ;;  %v336_v26 = vld [vmem:[#allocation5 + $0x6b8] sm:$0xff]  ;;  %v963_v16 = vld [vmem:[#allocation5 + $0x1a50] sm:$0xff] }
 0x114   :  { %1775 = vmatmul.mubr.f32.gmra.mrb[2].mxu0 %v87_v43  ;;  %4648 = vmatpush1.bf16.msra.mxu1 %v4647_v38  ;;  %v883_v43 = vld [vmem:[#allocation5 + $0x17d0] sm:$0xff]  ;;  %v893_v38 = vld [vmem:[#allocation5 + $0x1820] sm:$0xff]  ;;  %v4671_v2 = vpack.c.bf16 %v913_v51, %v903_v49 }
 0x115   :  { %4776 = vmatpush1.bf16.msra.mxu0 %v4775_v39  ;;  %1780 = vmatprep.mubr.f32.mxu0 %v96_v53  ;;  %v245_v39 = vld [vmem:[#allocation5 + $0x3e0] sm:$0xff]  ;;  %v4793_v53 = vpack.c.bf16 %v256_v17, %v246_v31  ;;  %v4667_v50 = vpack.c.bf16 %v893_v38, %v883_v43  ;;  %v356_v43 = vld [vmem:[#allocation5 + $0x758] sm:$0xff] }
 0x116   :  { %4650 = vmatprep.subr.bf16.mxu1 %v4649_v42  ;;  %4778 = vmatprep.subr.bf16.mxu0 %v4777_v44  ;;  %v914_v42 = vld [vmem:[#allocation5 + $0x18c8] sm:$0xff]  ;;  %v4795_v47 = vpack.c.bf16 %v255_v40, %v245_v39  ;;  %v973_v31 = vld [vmem:[#allocation5 + $0x1aa0] sm:$0xff]  ;;  %v983_v40 = vld [vmem:[#allocation5 + $0x1af0] sm:$0xff] }
 0x117   :  { %1977 = vmatmul.mubr.f32.gmra.mrb[14].mxu1 %v5871_v3  ;;  %v266_v44 = vld [vmem:[#allocation5 + $0x488] sm:$0xff]  ;;  %v4669_v48 = vpack.c.bf16 %v914_v42, %v904_v41  ;;  %v933_v3 = vld [vmem:[#allocation5 + $0x1960] sm:$0xff]  ;;  %v4683_v38 = vpack.c.bf16 %v973_v31, %v963_v16  ;;  %v435_v16 = vld [vmem:[#allocation5 + $0x9d0] sm:$0xff] }
 0x118   :  { %1781 = vmatmul.mubr.f32.gmra.mrb[4].mxu0 %v95_v61  ;;  %4652 = vmatpush1.bf16.msra.mxu1 %v4651_v52  ;;  %v265_v61 = vld [vmem:[#allocation5 + $0x480] sm:$0xff]  ;;  %v4797_v52 = vpack.c.bf16 %v276_v45, %v266_v44  ;;  %v4675_v20 = vpack.c.bf16 %v933_v3, %v923_v1  ;;  %v355_v45 = vld [vmem:[#allocation5 + $0x750] sm:$0xff]  ;;  %v1084_v31 = vld [vmem:[#allocation5 + $0x1e18] sm:$0xff] }
 0x119   :  { %4780 = vmatpush1.bf16.msra.mxu0 %v4779_v54  ;;  %1786 = vmatprep.mubr.f32.mxu0 %v104_v55  ;;  %v275_v54 = vld [vmem:[#allocation5 + $0x4d0] sm:$0xff]  ;;  %v924_v55 = vld [vmem:[#allocation5 + $0x1918] sm:$0xff]  ;;  %v325_v17 = vld [vmem:[#allocation5 + $0x660] sm:$0xff] }
 0x11a   :  { %4654 = vmatprep.subr.bf16.mxu1 %v4653_v59  ;;  %4782 = vmatprep.subr.bf16.mxu0 %v4781_v57  ;;  %v286_v59 = vld [vmem:[#allocation5 + $0x528] sm:$0xff]  ;;  %v296_v57 = vld [vmem:[#allocation5 + $0x578] sm:$0xff]  ;;  %v4799_v63 = vpack.c.bf16 %v275_v54, %v265_v61  ;;  %v4673_v0 = vpack.c.bf16 %v934_v56, %v924_v55  ;;  %v993_v41 = vld [vmem:[#allocation5 + $0x1b40] sm:$0xff] }
 0x11b   :  { %1982 = vmatprep.mubr.f32.mxu1 %v5872_v19  ;;  %v305_v19 = vld [vmem:[#allocation5 + $0x5c0] sm:$0xff]  ;;  %v4687_v49 = vpack.c.bf16 %v993_v41, %v983_v40  ;;  %v1023_v1 = vld [vmem:[#allocation5 + $0x1c30] sm:$0xff]  ;;  %v1104_v41 = vld [vmem:[#allocation5 + $0x1eb8] sm:$0xff] }
 0x11c   :  { %1787 = vmatmul.mubr.f32.gmra.mrb[6].mxu0 %v103_v4  ;;  %4656 = vmatpush1.bf16.msra.mxu1 %v4655_v5  ;;  %v285_v4 = vld [vmem:[#allocation5 + $0x520] sm:$0xff]  ;;  %v4801_v5 = vpack.c.bf16 %v296_v57, %v286_v59  ;;  %v1024_v59 = vld [vmem:[#allocation5 + $0x1c38] sm:$0xff]  ;;  %v1034_v57 = vld [vmem:[#allocation5 + $0x1c88] sm:$0xff] }
 0x11d   :  { %4784 = vmatpush1.bf16.msra.mxu0 %v4783_v6  ;;  %1792 = vmatprep.mubr.f32.mxu0 %v112_v7  ;;  %v295_v6 = vld [vmem:[#allocation5 + $0x570] sm:$0xff]  ;;  %v944_v7 = vld [vmem:[#allocation5 + $0x19b8] sm:$0xff]  ;;  %v345_v42 = vld [vmem:[#allocation5 + $0x700] sm:$0xff] }
 0x11e   :  { %4658 = vmatprep.subr.bf16.mxu1 %v4657_v9  ;;  %4786 = vmatprep.subr.bf16.mxu0 %v4785_v11  ;;  %v306_v9 = vld [vmem:[#allocation5 + $0x5c8] sm:$0xff]  ;;  %v316_v11 = vld [vmem:[#allocation5 + $0x618] sm:$0xff]  ;;  %v4803_v13 = vpack.c.bf16 %v295_v6, %v285_v4  ;;  %v4677_v14 = vpack.c.bf16 %v954_v8, %v944_v7  ;;  %v4815_v51 = vpack.c.bf16 %v355_v45, %v345_v42  ;;  %v1013_v54 = vld [vmem:[#allocation5 + $0x1be0] sm:$0xff] }
 0x11f   :  { %1983 = vmatmul.mubr.f32.gmra.mrb[16].mxu1 %v5873_v32  ;;  %v4809_v32 = vpack.c.bf16 %v336_v26, %v326_v27  ;;  %v365_v55 = vld [vmem:[#allocation5 + $0x7a0] sm:$0xff]  ;;  %v395_v6 = vld [vmem:[#allocation5 + $0x890] sm:$0xff]  ;;  %v1044_v7 = vld [vmem:[#allocation5 + $0x1cd8] sm:$0xff] }
 0x120   :  { %1793 = vmatmul.mubr.f32.gmra.mrb[8].mxu0 %v111_v21  ;;  %4660 = vmatpush1.bf16.msra.mxu1 %v4659_v22  ;;  %v4805_v21 = vpack.c.bf16 %v316_v11, %v306_v9  ;;  %v315_v22 = vld [vmem:[#allocation5 + $0x610] sm:$0xff]  ;;  %v1033_v3 = vld [vmem:[#allocation5 + $0x1c80] sm:$0xff]  ;;  %v1054_v8 = vld [vmem:[#allocation5 + $0x1d28] sm:$0xff] }
 0x121   :  { %4788 = vmatpush1.bf16.msra.mxu0 %v4787_v24  ;;  %1798 = vmatprep.mubr.f32.mxu0 %v120_v23  ;;  %v964_v23 = vld [vmem:[#allocation5 + $0x1a58] sm:$0xff]  ;;  %v974_v24 = vld [vmem:[#allocation5 + $0x1aa8] sm:$0xff]  ;;  %v4807_v29 = vpack.c.bf16 %v315_v22, %v305_v19  ;;  %v385_v4 = vld [vmem:[#allocation5 + $0x840] sm:$0xff]  ;;  %v4695_v11 = vpack.c.bf16 %v1033_v3, %v1023_v1 }
 0x122   :  { %4662 = vmatprep.subr.bf16.mxu1 %v4661_v28  ;;  %4790 = vmatprep.subr.bf16.mxu0 %v4789_v36  ;;  %v5881_v28 = vld [vmem:[#allocation2 + $0x28] sm:$0xff]  ;;  %v4679_v36 = vpack.c.bf16 %v953_v18, %v943_v15  ;;  %v4681_v30 = vpack.c.bf16 %v974_v24, %v964_v23  ;;  %v416_v9 = vld [vmem:[#allocation5 + $0x938] sm:$0xff]  ;;  %v405_v15 = vld [vmem:[#allocation5 + $0x8e0] sm:$0xff] }
 0x123   :  { %1988 = vmatprep.mubr.f32.mxu1 %v5874_v46  ;;  %v1004_v46 = vld [vmem:[#allocation5 + $0x1b98] sm:$0xff]  ;;  %v415_v19 = vld [vmem:[#allocation5 + $0x930] sm:$0xff]  ;;  %v1074_v22 = vld [vmem:[#allocation5 + $0x1dc8] sm:$0xff] }
 0x124   :  { %1799 = vmatmul.mubr.f32.gmra.mrb[10].mxu0 %v119_v33  ;;  %4664 = vmatpush1.bf16.msra.mxu1 %v4663_v34  ;;  %v335_v33 = vld [vmem:[#allocation5 + $0x6b0] sm:$0xff]  ;;  %v984_v34 = vld [vmem:[#allocation5 + $0x1af8] sm:$0xff]  ;;  %v426_v23 = vld [vmem:[#allocation5 + $0x988] sm:$0xff]  ;;  %v4827_v27 = vpack.c.bf16 %v415_v19, %v405_v15 }
 0x125   :  { %4792 = vmatpush1.bf16.msra.mxu0 %v4791_v35  ;;  %4666 = vmatprep.subr.bf16.mxu1 %v4665_v37  ;;  %v994_v35 = vld [vmem:[#allocation5 + $0x1b48] sm:$0xff]  ;;  %v4811_v39 = vpack.c.bf16 %v335_v33, %v325_v17  ;;  %v436_v24 = vld [vmem:[#allocation5 + $0x9d8] sm:$0xff]  ;;  %v455_v40 = vld [vmem:[#allocation5 + $0xa70] sm:$0xff] }
 0x126   :  { %4794 = vmatprep.subr.bf16.mxu0 %v4793_v53  ;;  %1989 = vmatmul.mubr.f32.gmra.mrb[18].mxu1 %v5875_v58  ;;  %v346_v37 = vld [vmem:[#allocation5 + $0x708] sm:$0xff]  ;;  %v4685_v53 = vpack.c.bf16 %v994_v35, %v984_v34  ;;  %v375_v58 = vld [vmem:[#allocation5 + $0x7f0] sm:$0xff]  ;;  %v456_v33 = vld [vmem:[#allocation5 + $0xa78] sm:$0xff] }
 0x127   :  { %1994 = vmatprep.mubr.f32.mxu1 %v5876_v60  ;;  %2273 = vmatprep.mubr.f32.mxu0 %v5877_v62  ;;  %v4813_v44 = vpack.c.bf16 %v356_v43, %v346_v37  ;;  %v386_v60 = vld [vmem:[#allocation5 + $0x848] sm:$0xff]  ;;  %v396_v62 = vld [vmem:[#allocation5 + $0x898] sm:$0xff]  ;;  %v1083_v43 = vld [vmem:[#allocation5 + $0x1e10] sm:$0xff] }
 0x128   :  { %4668 = vmatpush1.bf16.msra.mxu1 %v4667_v50  ;;  %v1014_v50 = vld [vmem:[#allocation5 + $0x1be8] sm:$0xff]  ;;  %v476_v45 = vld [vmem:[#allocation5 + $0xb18] sm:$0xff]  ;;  %v485_v1 = vld [vmem:[#allocation5 + $0xb60] sm:$0xff] }
 0x129   :  { %4796 = vmatpush1.bf16.msra.mxu0 %v4795_v47  ;;  %4670 = vmatprep.subr.bf16.mxu1 %v4669_v48  ;;  %v366_v47 = vld [vmem:[#allocation5 + $0x7a8] sm:$0xff]  ;;  %v376_v48 = vld [vmem:[#allocation5 + $0x7f8] sm:$0xff]  ;;  %v4689_v61 = vpack.c.bf16 %v1014_v50, %v1004_v46  ;;  %v1143_v15 = vld [vmem:[#allocation5 + $0x1ff0] sm:$0xff] }
 0x12a   :  { %4798 = vmatprep.subr.bf16.mxu0 %v4797_v52  ;;  %1995 = vmatmul.mubr.f32.gmra.mrb[20].mxu1 %v5878_v10  ;;  %v1003_v52 = vld [vmem:[#allocation5 + $0x1b90] sm:$0xff]  ;;  %v4817_v56 = vpack.c.bf16 %v376_v48, %v366_v47  ;;  %v406_v10 = vld [vmem:[#allocation5 + $0x8e8] sm:$0xff]  ;;  %v505_v19 = vld [vmem:[#allocation5 + $0xc00] sm:$0xff] }
 0x12b   :  { %2000 = vmatprep.mubr.f32.mxu1 %v5879_v12  ;;  %v4823_v12 = vpack.c.bf16 %v395_v6, %v385_v4  ;;  %v4825_v18 = vpack.c.bf16 %v416_v9, %v406_v10  ;;  %v1094_v17 = vld [vmem:[#allocation5 + $0x1e68] sm:$0xff]  ;;  %v1103_v48 = vld [vmem:[#allocation5 + $0x1eb0] sm:$0xff]  ;;  %v516_v10 = vld [vmem:[#allocation5 + $0xc58] sm:$0xff] }
 0x12c   :  { %4672 = vmatpush1.bf16.msra.mxu1 %v4671_v2  ;;  %v4691_v2 = vpack.c.bf16 %v1013_v54, %v1003_v52  ;;  %v4705_v37 = vpack.c.bf16 %v1094_v17, %v1084_v31  ;;  %v1114_v42 = vld [vmem:[#allocation5 + $0x1f08] sm:$0xff]  ;;  %v475_v52 = vld [vmem:[#allocation5 + $0xb10] sm:$0xff]  ;;  %v1124_v54 = vld [vmem:[#allocation5 + $0x1f58] sm:$0xff] }
 0x12d   :  { %4800 = vmatpush1.bf16.msra.mxu0 %v4799_v63  ;;  %4674 = vmatprep.subr.bf16.mxu1 %v4673_v0  ;;  %v4819_v63 = vpack.c.bf16 %v375_v58, %v365_v55  ;;  %v4693_v0 = vpack.c.bf16 %v1034_v57, %v1024_v59  ;;  %v4709_v47 = vpack.c.bf16 %v1114_v42, %v1104_v41  ;;  %v1134_v55 = vld [vmem:[#allocation5 + $0x1fa8] sm:$0xff]  ;;  %v496_v59 = vld [vmem:[#allocation5 + $0xbb8] sm:$0xff]  ;;  %v5883_v57 = vld [vmem:[#allocation2] sm:$0xff] }
 0x12e   :  { %4802 = vmatprep.subr.bf16.mxu0 %v4801_v5  ;;  %2001 = vmatmul.mubr.f32.gmra.mrb[22].mxu1 %v5880_v25  ;;  %v4821_v5 = vpack.c.bf16 %v396_v62, %v386_v60  ;;  %v486_v58 = vld [vmem:[#allocation5 + $0xb68] sm:$0xff]  ;;  %v495_v4 = vld [vmem:[#allocation5 + $0xbb0] sm:$0xff]  ;;  %v5885_v9 = vld [vmem:[#allocation2 + $0x60] sm:$0xff] }
 0x12f   :  { %2071 = vmatprep.mubr.f32.mxu1 %v5881_v28  ;;  %v1063_v28 = vld [vmem:[#allocation5 + $0x1d70] sm:$0xff]  ;;  %v4841_v3 = vpack.c.bf16 %v496_v59, %v486_v58  ;;  %v1154_v6 = vld [vmem:[#allocation5 + $0x2048] sm:$0xff]  ;;  %v5897_v58 = vld [vmem:[#allocation2 + $0x120] sm:$0xff] }
 0x130   :  { %4676 = vmatpush1.bf16.msra.mxu1 %v4675_v20  ;;  %v4697_v20 = vpack.c.bf16 %v1054_v8, %v1044_v7  ;;  %v5884_v7 = vld [vmem:[#allocation2 + $0x68] sm:$0xff]  ;;  %v1163_v17 = vld [vmem:[#allocation5 + $0x2090] sm:$0xff] }
 0x131   :  { %4804 = vmatpush1.bf16.msra.mxu0 %v4803_v13  ;;  %4678 = vmatprep.subr.bf16.mxu1 %v4677_v14  ;;  %v1043_v13 = vld [vmem:[#allocation5 + $0x1cd0] sm:$0xff]  ;;  %v1053_v14 = vld [vmem:[#allocation5 + $0x1d20] sm:$0xff]  ;;  %v506_v8 = vld [vmem:[#allocation5 + $0xc08] sm:$0xff] }
 0x132   :  { %4806 = vmatprep.subr.bf16.mxu0 %v4805_v21  ;;  %v1064_v21 = vld [vmem:[#allocation5 + $0x1d78] sm:$0xff]  ;;  %v4699_v25 = vpack.c.bf16 %v1053_v14, %v1043_v13  ;;  %v4843_v13 = vpack.c.bf16 %v495_v4, %v485_v1  ;;  %v5894_v41 = vld [vmem:[#allocation2 + $0xc8] sm:$0xff]  ;;  %v565_v1 = vld [vmem:[#allocation5 + $0xde0] sm:$0xff] }
 0x133   :  { %v4701_v26 = vpack.c.bf16 %v1074_v22, %v1064_v21  ;;  %v4845_v21 = vpack.c.bf16 %v516_v10, %v506_v8  ;;  %v515_v22 = vld [vmem:[#allocation5 + $0xc50] sm:$0xff]  ;;  %v5898_v59 = vld [vmem:[#allocation2 + $0x108] sm:$0xff] }
 0x134   :  { %4680 = vmatpush1.bf16.msra.mxu1 %v4679_v36  ;;  %v1073_v36 = vld [vmem:[#allocation5 + $0x1dc0] sm:$0xff]  ;;  %v575_v4 = vld [vmem:[#allocation5 + $0xe30] sm:$0xff]  ;;  %v586_v10 = vld [vmem:[#allocation5 + $0xe88] sm:$0xff] }
 0x135   :  { %4808 = vmatpush1.bf16.msra.mxu0 %v4807_v29  ;;  %4682 = vmatprep.subr.bf16.mxu1 %v4681_v30  ;;  %v425_v29 = vld [vmem:[#allocation5 + $0x980] sm:$0xff]  ;;  %v4829_v30 = vpack.c.bf16 %v436_v24, %v426_v23  ;;  %v4703_v34 = vpack.c.bf16 %v1073_v36, %v1063_v28  ;;  %v1164_v23 = vld [vmem:[#allocation5 + $0x2098] sm:$0xff]  ;;  %v1174_v24 = vld [vmem:[#allocation5 + $0x20e8] sm:$0xff] }
 0x136   :  { %4810 = vmatprep.subr.bf16.mxu0 %v4809_v32  ;;  %v446_v32 = vld [vmem:[#allocation5 + $0xa28] sm:$0xff]  ;;  %v4831_v35 = vpack.c.bf16 %v435_v16, %v425_v29  ;;  %v5889_v28 = vld [vmem:[#allocation2 + $0xa0] sm:$0xff]  ;;  %v4847_v16 = vpack.c.bf16 %v515_v22, %v505_v19  ;;  %v4721_v31 = vpack.c.bf16 %v1174_v24, %v1164_v23  ;;  %v1223_v19 = vld [vmem:[#allocation5 + $0x2270] sm:$0xff] }
 0x137   :  { %v5890_v36 = vld [vmem:[#allocation2 + $0x88] sm:$0xff]  ;;  %v585_v22 = vld [vmem:[#allocation5 + $0xe80] sm:$0xff]  ;;  %v595_v24 = vld [vmem:[#allocation5 + $0xed0] sm:$0xff] }
 0x138   :  { %4684 = vmatpush1.bf16.msra.mxu1 %v4683_v38  ;;  %v1093_v38 = vld [vmem:[#allocation5 + $0x1e60] sm:$0xff] }
 0x139   :  { %4812 = vmatpush1.bf16.msra.mxu0 %v4811_v39  ;;  %4686 = vmatprep.subr.bf16.mxu1 %v4685_v53  ;;  %v445_v39 = vld [vmem:[#allocation5 + $0xa20] sm:$0xff]  ;;  %v4833_v53 = vpack.c.bf16 %v456_v33, %v446_v32  ;;  %v4707_v46 = vpack.c.bf16 %v1093_v38, %v1083_v43  ;;  %v1194_v43 = vld [vmem:[#allocation5 + $0x2188] sm:$0xff] }
 0x13a   :  { %4814 = vmatprep.subr.bf16.mxu0 %v4813_v44  ;;  %v466_v44 = vld [vmem:[#allocation5 + $0xac8] sm:$0xff]  ;;  %v4835_v50 = vpack.c.bf16 %v455_v40, %v445_v39  ;;  %v1173_v32 = vld [vmem:[#allocation5 + $0x20e0] sm:$0xff] }
 0x13b   :  { %v525_v33 = vld [vmem:[#allocation5 + $0xca0] sm:$0xff]  ;;  %v5892_v38 = vld [vmem:[#allocation2 + $0xe8] sm:$0xff]  ;;  %v4723_v42 = vpack.c.bf16 %v1173_v32, %v1163_v17  ;;  %v1243_v17 = vld [vmem:[#allocation5 + $0x2310] sm:$0xff] }
 0x13c   :  { %4688 = vmatpush1.bf16.msra.mxu1 %v4687_v49  ;;  %v1113_v49 = vld [vmem:[#allocation5 + $0x1f00] sm:$0xff]  ;;  %v546_v39 = vld [vmem:[#allocation5 + $0xd48] sm:$0xff] }
 0x13d   :  { %4816 = vmatpush1.bf16.msra.mxu0 %v4815_v51  ;;  %4690 = vmatprep.subr.bf16.mxu1 %v4689_v61  ;;  %v465_v51 = vld [vmem:[#allocation5 + $0xac0] sm:$0xff]  ;;  %v4837_v61 = vpack.c.bf16 %v476_v45, %v466_v44  ;;  %v4711_v60 = vpack.c.bf16 %v1113_v49, %v1103_v48 }
 0x13e   :  { %4818 = vmatprep.subr.bf16.mxu0 %v4817_v56  ;;  %v5882_v56 = vld [vmem:[#allocation2 + $0x20] sm:$0xff]  ;;  %v4839_v62 = vpack.c.bf16 %v475_v52, %v465_v51  ;;  %v555_v51 = vld [vmem:[#allocation5 + $0xd90] sm:$0xff]  ;;  %v1214_v52 = vld [vmem:[#allocation5 + $0x2228] sm:$0xff] }
 0x13f   :  { %v5893_v40 = vld [vmem:[#allocation2 + $0xe0] sm:$0xff] }
 0x140   :  { %4692 = vmatpush1.bf16.msra.mxu1 %v4691_v2  ;;  %v4713_v2 = vpack.c.bf16 %v1134_v55, %v1124_v54  ;;  %v5895_v44 = vld [vmem:[#allocation2 + $0xc0] sm:$0xff]  ;;  %v5896_v54 = vld [vmem:[#allocation2 + $0x128] sm:$0xff] }
 0x141   :  { %4820 = vmatpush1.bf16.msra.mxu0 %v4819_v63  ;;  %4694 = vmatprep.subr.bf16.mxu1 %v4693_v0  ;;  %v1123_v63 = vld [vmem:[#allocation5 + $0x1f50] sm:$0xff]  ;;  %v1133_v0 = vld [vmem:[#allocation5 + $0x1fa0] sm:$0xff]  ;;  %v566_v55 = vld [vmem:[#allocation5 + $0xde8] sm:$0xff] }
 0x142   :  { %4822 = vmatprep.subr.bf16.mxu0 %v4821_v5  ;;  %v1144_v5 = vld [vmem:[#allocation5 + $0x1ff8] sm:$0xff]  ;;  %v545_v48 = vld [vmem:[#allocation5 + $0xd40] sm:$0xff] }
 0x143   :  { %v4717_v14 = vpack.c.bf16 %v1154_v6, %v1144_v5  ;;  %v1224_v5 = vld [vmem:[#allocation5 + $0x2278] sm:$0xff]  ;;  %v1234_v6 = vld [vmem:[#allocation5 + $0x22c8] sm:$0xff]  ;;  %v1253_v32 = vld [vmem:[#allocation5 + $0x2360] sm:$0xff] }
 0x144   :  { %4696 = vmatpush1.bf16.msra.mxu1 %v4695_v11  ;;  %v5886_v11 = vld [vmem:[#allocation2 + $0x48] sm:$0xff] }
 0x145   :  { %4824 = vmatpush1.bf16.msra.mxu0 %v4823_v12  ;;  %4698 = vmatprep.subr.bf16.mxu1 %v4697_v20  ;;  %v4715_v12 = vpack.c.bf16 %v1133_v0, %v1123_v63  ;;  %v5887_v20 = vld [vmem:[#allocation2 + $0x40] sm:$0xff]  ;;  %v1203_v63 = vld [vmem:[#allocation5 + $0x21d0] sm:$0xff] }
 0x146   :  { %4826 = vmatprep.subr.bf16.mxu0 %v4825_v18  ;;  %v1153_v18 = vld [vmem:[#allocation5 + $0x2040] sm:$0xff] }
 0x147   :  { %v4719_v29 = vpack.c.bf16 %v1153_v18, %v1143_v15  ;;  %v1213_v0 = vld [vmem:[#allocation5 + $0x2220] sm:$0xff]  ;;  %v4859_v15 = vpack.c.bf16 %v575_v4, %v565_v1  ;;  %v4733_v18 = vpack.c.bf16 %v1234_v6, %v1224_v5  ;;  %v676_v4 = vld [vmem:[#allocation5 + $0x1158] sm:$0xff] }
 0x148   :  { %4700 = vmatpush1.bf16.msra.mxu1 %v4699_v25  ;;  %v5888_v25 = vld [vmem:[#allocation2 + $0xa8] sm:$0xff] }
 0x149   :  { %4828 = vmatpush1.bf16.msra.mxu0 %v4827_v27  ;;  %4702 = vmatprep.subr.bf16.mxu1 %v4701_v26  ;;  %v526_v27 = vld [vmem:[#allocation5 + $0xca8] sm:$0xff]  ;;  %v536_v26 = vld [vmem:[#allocation5 + $0xcf8] sm:$0xff] }
 0x14a   :  { %4830 = vmatprep.subr.bf16.mxu0 %v4829_v30  ;;  %v5891_v30 = vld [vmem:[#allocation2 + $0x80] sm:$0xff] }
 0x14c   :  { %4704 = vmatpush1.bf16.msra.mxu1 %v4703_v34  ;;  %v4849_v34 = vpack.c.bf16 %v536_v26, %v526_v27  ;;  %v1254_v27 = vld [vmem:[#allocation5 + $0x2368] sm:$0xff]  ;;  %v5904_v26 = vld [vmem:[#allocation2 + $0x38] sm:$0xff] }
 0x14d   :  { %4832 = vmatpush1.bf16.msra.mxu0 %v4831_v35  ;;  %4706 = vmatprep.subr.bf16.mxu1 %v4705_v37  ;;  %v535_v35 = vld [vmem:[#allocation5 + $0xcf0] sm:$0xff]  ;;  %v1184_v37 = vld [vmem:[#allocation5 + $0x2138] sm:$0xff] }
 0x14e   :  { %4834 = vmatprep.subr.bf16.mxu0 %v4833_v53  ;;  %v556_v53 = vld [vmem:[#allocation5 + $0xd98] sm:$0xff]  ;;  %v4851_v45 = vpack.c.bf16 %v535_v35, %v525_v33  ;;  %v605_v33 = vld [vmem:[#allocation5 + $0xf20] sm:$0xff]  ;;  %v615_v35 = vld [vmem:[#allocation5 + $0xf70] sm:$0xff] }
 0x14f   :  { %2072 = vmatmul.mubr.f32.vlgmr.msra.gmra.mrb[12].mxu1 %v5882_v56  ;;  %v4853_v49 = vpack.c.bf16 %v556_v53, %v546_v39  ;;  %v576_v56 = vld [vmem:[#allocation5 + $0xe38] sm:$0xff]  ;;  %v4739_v53 = vpack.c.bf16 %v1253_v32, %v1243_v17  ;;  %v706_v32 = vld [vmem:[#allocation5 + $0x1248] sm:$0xff] }
 0x150   :  { %4708 = vmatpush1.bf16.msra.mxu1 %v4707_v46  ;;  %2274 = vmatmul.mubr.f32.vlgmr.msra.gmra.mrb[12].mxu0 %v5883_v57  ;;  %v4725_v46 = vpack.c.bf16 %v1194_v43, %v1184_v37  ;;  %v1264_v37 = vld [vmem:[#allocation5 + $0x23b8] sm:$0xff]  ;;  %v1274_v43 = vld [vmem:[#allocation5 + $0x2408] sm:$0xff] }
 0x151   :  { %4836 = vmatpush1.bf16.msra.mxu0 %v4835_v50  ;;  %4710 = vmatprep.subr.bf16.mxu1 %v4709_v47  ;;  %v1183_v50 = vld [vmem:[#allocation5 + $0x2130] sm:$0xff]  ;;  %v1193_v47 = vld [vmem:[#allocation5 + $0x2180] sm:$0xff]  ;;  %v636_v39 = vld [vmem:[#allocation5 + $0x1018] sm:$0xff] }
 0x152   :  { %4838 = vmatprep.subr.bf16.mxu0 %v4837_v61  ;;  %2077 = vmatprep.mubr.f32.mxu1 %v5884_v7  ;;  %v1204_v61 = vld [vmem:[#allocation5 + $0x21d8] sm:$0xff]  ;;  %v4727_v57 = vpack.c.bf16 %v1193_v47, %v1183_v50  ;;  %v5900_v7 = vld [vmem:[#allocation2 + $0x168] sm:$0xff]  ;;  %v635_v47 = vld [vmem:[#allocation5 + $0x1010] sm:$0xff] }
 0x153   :  { %2078 = vmatmul.mubr.f32.gmra.mrb[14].mxu1 %v5885_v9  ;;  %2279 = vmatprep.mubr.f32.mxu0 %v5886_v11  ;;  %v596_v9 = vld [vmem:[#allocation5 + $0xed8] sm:$0xff]  ;;  %v5901_v11 = vld [vmem:[#allocation2 + $0x160] sm:$0xff] }
 0x154   :  { %4712 = vmatpush1.bf16.msra.mxu1 %v4711_v60  ;;  %2280 = vmatmul.mubr.f32.gmra.mrb[14].mxu0 %v5887_v20  ;;  %v5899_v60 = vld [vmem:[#allocation2 + $0x100] sm:$0xff]  ;;  %v4861_v23 = vpack.c.bf16 %v596_v9, %v586_v10  ;;  %v1303_v10 = vld [vmem:[#allocation5 + $0x24f0] sm:$0xff] }
 0x155   :  { %4840 = vmatpush1.bf16.msra.mxu0 %v4839_v62  ;;  %4714 = vmatprep.subr.bf16.mxu1 %v4713_v2  ;;  %v4855_v62 = vpack.c.bf16 %v555_v51, %v545_v48  ;;  %v4729_v2 = vpack.c.bf16 %v1214_v52, %v1204_v61  ;;  %v1284_v48 = vld [vmem:[#allocation5 + $0x2458] sm:$0xff]  ;;  %v646_v61 = vld [vmem:[#allocation5 + $0x1068] sm:$0xff]  ;;  %v1313_v9 = vld [vmem:[#allocation5 + $0x2540] sm:$0xff] }
 0x156   :  { %4842 = vmatprep.subr.bf16.mxu0 %v4841_v3  ;;  %2083 = vmatprep.mubr.f32.mxu1 %v5888_v25  ;;  %v4857_v3 = vpack.c.bf16 %v576_v56, %v566_v55  ;;  %v1244_v25 = vld [vmem:[#allocation5 + $0x2318] sm:$0xff] }
 0x157   :  { %2084 = vmatmul.mubr.f32.gmra.mrb[16].mxu1 %v5889_v28  ;;  %2285 = vmatprep.mubr.f32.mxu0 %v5890_v36  ;;  %v606_v28 = vld [vmem:[#allocation5 + $0xf28] sm:$0xff]  ;;  %v616_v36 = vld [vmem:[#allocation5 + $0xf78] sm:$0xff] }
 0x158   :  { %4716 = vmatpush1.bf16.msra.mxu1 %v4715_v12  ;;  %2286 = vmatmul.mubr.f32.gmra.mrb[16].mxu0 %v5891_v30  ;;  %v5902_v12 = vld [vmem:[#allocation2 + $0x148] sm:$0xff]  ;;  %v656_v52 = vld [vmem:[#allocation5 + $0x10b8] sm:$0xff] }
 0x159   :  { %4844 = vmatpush1.bf16.msra.mxu0 %v4843_v13  ;;  %4718 = vmatprep.subr.bf16.mxu1 %v4717_v14  ;;  %v4731_v13 = vpack.c.bf16 %v1213_v0, %v1203_v63  ;;  %v5903_v14 = vld [vmem:[#allocation2 + $0x140] sm:$0xff]  ;;  %v1304_v63 = vld [vmem:[#allocation5 + $0x24f8] sm:$0xff]  ;;  %v1314_v0 = vld [vmem:[#allocation5 + $0x2548] sm:$0xff] }
 0x15a   :  { %4846 = vmatprep.subr.bf16.mxu0 %v4845_v21  ;;  %2089 = vmatprep.mubr.f32.mxu1 %v5892_v38  ;;  %v1233_v21 = vld [vmem:[#allocation5 + $0x22c0] sm:$0xff]  ;;  %v626_v38 = vld [vmem:[#allocation5 + $0xfc8] sm:$0xff] }
 0x15b   :  { %2090 = vmatmul.mubr.f32.gmra.mrb[18].mxu1 %v5893_v40  ;;  %2291 = vmatprep.mubr.f32.mxu0 %v5894_v41  ;;  %v4735_v30 = vpack.c.bf16 %v1233_v21, %v1223_v19  ;;  %v4867_v40 = vpack.c.bf16 %v615_v35, %v605_v33  ;;  %v4741_v41 = vpack.c.bf16 %v1274_v43, %v1264_v37  ;;  %v686_v21 = vld [vmem:[#allocation5 + $0x11a8] sm:$0xff]  ;;  %v716_v33 = vld [vmem:[#allocation5 + $0x1298] sm:$0xff]  ;;  %v1343_v43 = vld [vmem:[#allocation5 + $0x2630] sm:$0xff] }
 0x15c   :  { %4720 = vmatpush1.bf16.msra.mxu1 %v4719_v29  ;;  %2292 = vmatmul.mubr.f32.gmra.mrb[18].mxu0 %v5895_v44  ;;  %v5905_v29 = vld [vmem:[#allocation2 + $0x18] sm:$0xff]  ;;  %v1273_v44 = vld [vmem:[#allocation5 + $0x2400] sm:$0xff]  ;;  %v4869_v50 = vpack.c.bf16 %v636_v39, %v626_v38 }
 0x15d   :  { %4848 = vmatpush1.bf16.msra.mxu0 %v4847_v16  ;;  %4722 = vmatprep.subr.bf16.mxu1 %v4721_v31  ;;  %v4863_v16 = vpack.c.bf16 %v595_v24, %v585_v22  ;;  %v4737_v31 = vpack.c.bf16 %v1254_v27, %v1244_v25  ;;  %v696_v22 = vld [vmem:[#allocation5 + $0x11f8] sm:$0xff]  ;;  %v1323_v27 = vld [vmem:[#allocation5 + $0x2590] sm:$0xff]  ;;  %v1353_v38 = vld [vmem:[#allocation5 + $0x2680] sm:$0xff] }
 0x15e   :  { %4850 = vmatprep.subr.bf16.mxu0 %v4849_v34  ;;  %2095 = vmatprep.mubr.f32.mxu1 %v5896_v54  ;;  %v4865_v34 = vpack.c.bf16 %v616_v36, %v606_v28  ;;  %v685_v28 = vld [vmem:[#allocation5 + $0x11a0] sm:$0xff] }
 0x15f   :  { %2096 = vmatmul.mubr.f32.gmra.mrb[20].mxu1 %v5897_v58  ;;  %2297 = vmatprep.mubr.f32.mxu0 %v5898_v59  ;;  %v1283_v58 = vld [vmem:[#allocation5 + $0x2450] sm:$0xff]  ;;  %v1293_v59 = vld [vmem:[#allocation5 + $0x24a0] sm:$0xff] }
 0x160   :  { %4724 = vmatpush1.bf16.msra.mxu1 %v4723_v42  ;;  %2298 = vmatmul.mubr.f32.gmra.mrb[20].mxu0 %v5899_v60  ;;  %v1263_v42 = vld [vmem:[#allocation5 + $0x23b0] sm:$0xff]  ;;  %v4747_v5 = vpack.c.bf16 %v1293_v59, %v1283_v58  ;;  %v705_v39 = vld [vmem:[#allocation5 + $0x1240] sm:$0xff]  ;;  %v1384_v59 = vld [vmem:[#allocation5 + $0x2778] sm:$0xff] }
 0x161   :  { %4852 = vmatpush1.bf16.msra.mxu0 %v4851_v45  ;;  %4726 = vmatprep.subr.bf16.mxu1 %v4725_v46  ;;  %v625_v45 = vld [vmem:[#allocation5 + $0xfc0] sm:$0xff]  ;;  %v4743_v54 = vpack.c.bf16 %v1273_v44, %v1263_v42  ;;  %v1364_v42 = vld [vmem:[#allocation5 + $0x26d8] sm:$0xff]  ;;  %v1374_v44 = vld [vmem:[#allocation5 + $0x2728] sm:$0xff] }
 0x162   :  { %4854 = vmatprep.subr.bf16.mxu0 %v4853_v49  ;;  %2101 = vmatprep.mubr.f32.mxu1 %v5900_v7  ;;  %v6267_v8 = vpop.f32.mrb[0].mxu1  ;;  %v1294_v49 = vld [vmem:[#allocation5 + $0x24a8] sm:$0xff]  ;;  %v4871_v55 = vpack.c.bf16 %v635_v47, %v625_v45  ;;  %v4749_v7 = vpack.c.bf16 %v1314_v0, %v1304_v63  ;;  %v736_v47 = vld [vmem:[#allocation5 + $0x1338] sm:$0xff]  ;;  %v735_v58 = vld [vmem:[#allocation5 + $0x1330] sm:$0xff] }
 0x163   :  { %2102 = vmatmul.mubr.f32.gmra.mrb[22].mxu1 %v5901_v11  ;;  %2303 = vmatprep.mubr.f32.mxu0 %v5902_v12  ;;  %v6269_v20 = vpop.f32.mrb[1].mxu1  ;;  %v4745_v56 = vpack.c.bf16 %v1294_v49, %v1284_v48  ;;  %v665_v11 = vld [vmem:[#allocation5 + $0x1100] sm:$0xff]  ;;  %v4759_v48 = vpack.c.bf16 %v1353_v38, %v1343_v43  ;;  %v795_v43 = vld [vmem:[#allocation5 + $0x1510] sm:$0xff]  ;;  %v168_v38 = vld [vmem:[#allocation5 + $0x178] sm:$0xff] }
 0x164   :  { %4728 = vmatpush1.bf16.msra.mxu1 %v4727_v57  ;;  %2304 = vmatmul.mubr.f32.gmra.mrb[22].mxu0 %v5903_v14  ;;  %v645_v57 = vld [vmem:[#allocation5 + $0x1060] sm:$0xff]  ;;  %v675_v14 = vld [vmem:[#allocation5 + $0x1150] sm:$0xff] }
 0x165   :  { %4856 = vmatpush1.bf16.msra.mxu0 %v4855_v62  ;;  %4730 = vmatprep.subr.bf16.mxu1 %v4729_v2  ;;  %v4873_v62 = vpack.c.bf16 %v656_v52, %v646_v61  ;;  %v655_v2 = vld [vmem:[#allocation5 + $0x10b0] sm:$0xff]  ;;  %v4879_v24 = vpack.c.bf16 %v675_v14, %v665_v11  ;;  %v4761_v61 = vpack.c.bf16 %v1374_v44, %v1364_v42  ;;  %v138_v11 = vld [vmem:[#allocation5 + $0x88] sm:$0xff]  ;;  %v776_v14 = vld [vmem:[#allocation5 + $0x1478] sm:$0xff] }
 0x166   :  { %4858 = vmatprep.subr.bf16.mxu0 %v4857_v3  ;;  %2172 = vmatprep.mubr.f32.mxu1 %v5904_v26  ;;  %v6271_v46 = vpop.f32.mrb[2].mxu1  ;;  %v666_v3 = vld [vmem:[#allocation5 + $0x1108] sm:$0xff]  ;;  %v4875_v6 = vpack.c.bf16 %v655_v2, %v645_v57  ;;  %v1333_v26 = vld [vmem:[#allocation5 + $0x25e0] sm:$0xff]  ;;  %v1363_v52 = vld [vmem:[#allocation5 + $0x26d0] sm:$0xff] }
 0x167   :  { %2374 = vmatprep.mubr.f32.mxu0 %v5905_v29  ;;  %v6273_v51 = vpop.f32.mrb[3].mxu1  ;;  %v4881_v29 = vpack.c.bf16 %v696_v22, %v686_v21  ;;  %v1394_v57 = vld [vmem:[#allocation5 + $0x27c8] sm:$0xff]  ;;  %v756_v2 = vld [vmem:[#allocation5 + $0x13d8] sm:$0xff]  ;;  %v127_v22 = vld [vmem:[#allocation5 + $0x30] sm:$0xff] }
 0x168   :  { %4732 = vmatpush1.bf16.msra.mxu1 %v4731_v13  ;;  %v4877_v13 = vpack.c.bf16 %v676_v4, %v666_v3  ;;  %v4765_v3 = vpack.c.bf16 %v1394_v57, %v1384_v59  ;;  %v1383_v4 = vld [vmem:[#allocation5 + $0x2770] sm:$0xff]  ;;  %v816_v42 = vld [vmem:[#allocation5 + $0x15b8] sm:$0xff]  ;;  %v198_v59 = vld [vmem:[#allocation5 + $0x268] sm:$0xff] }
 0x169   :  { %4860 = vmatpush1.bf16.msra.mxu0 %v4859_v15  ;;  %4734 = vmatprep.subr.bf16.mxu1 %v4733_v18  ;;  %v1324_v15 = vld [vmem:[#allocation5 + $0x2598] sm:$0xff]  ;;  %v1334_v18 = vld [vmem:[#allocation5 + $0x25e8] sm:$0xff]  ;;  %v5907_v44 = vld [vmem:[#allocation2 + $0x10] sm:$0xff] }
 0x16a   :  { %4862 = vmatprep.subr.bf16.mxu0 %v4861_v23  ;;  %v6275_v60 = vpop.f32.mrb[4].mxu1  ;;  %v4751_v23 = vpack.c.bf16 %v1313_v9, %v1303_v10  ;;  %v4753_v25 = vpack.c.bf16 %v1334_v18, %v1324_v15  ;;  %v755_v10 = vld [vmem:[#allocation5 + $0x13d0] sm:$0xff]  ;;  %v128_v9 = vld [vmem:[#allocation5 + $0x38] sm:$0xff] }
 0x16b   :  { %v6277_v1 = vpop.f32.mrb[5].mxu1  ;;  %v5025_v21 = vpack.c.bf16 %v138_v11, %v128_v9  ;;  %v5909_v57 = vld [vmem:[#allocation2 + $0x70] sm:$0xff] }
 0x16c   :  { %4736 = vmatpush1.bf16.msra.mxu1 %v4735_v30  ;;  %v695_v30 = vld [vmem:[#allocation5 + $0x11f0] sm:$0xff] }
 0x16d   :  { %4864 = vmatpush1.bf16.msra.mxu0 %v4863_v16  ;;  %4738 = vmatprep.subr.bf16.mxu1 %v4737_v31  ;;  %v1344_v16 = vld [vmem:[#allocation5 + $0x2638] sm:$0xff]  ;;  %v1354_v31 = vld [vmem:[#allocation5 + $0x2688] sm:$0xff]  ;;  %v4883_v35 = vpack.c.bf16 %v695_v30, %v685_v28  ;;  %v835_v11 = vld [vmem:[#allocation5 + $0x1650] sm:$0xff] }
 0x16e   :  { %4866 = vmatprep.subr.bf16.mxu0 %v4865_v34  ;;  %v6279_v12 = vpop.f32.mrb[6].mxu1  ;;  %v4755_v34 = vpack.c.bf16 %v1333_v26, %v1323_v27  ;;  %v4757_v37 = vpack.c.bf16 %v1354_v31, %v1344_v16  ;;  %v775_v27 = vld [vmem:[#allocation5 + $0x1470] sm:$0xff]  ;;  %v786_v26 = vld [vmem:[#allocation5 + $0x14c8] sm:$0xff]  ;;  %v796_v28 = vld [vmem:[#allocation5 + $0x1518] sm:$0xff] }
 0x16f   :  { %v6281_v19 = vpop.f32.mrb[7].mxu1  ;;  %v158_v30 = vld [vmem:[#allocation5 + $0x128] sm:$0xff] }
 0x170   :  { %4740 = vmatpush1.bf16.msra.mxu1 %v4739_v53 }
 0x171   :  { %4868 = vmatpush1.bf16.msra.mxu0 %v4867_v40  ;;  %4742 = vmatprep.subr.bf16.mxu1 %v4741_v41  ;;  %v4885_v40 = vpack.c.bf16 %v716_v33, %v706_v32  ;;  %v715_v41 = vld [vmem:[#allocation5 + $0x1290] sm:$0xff]  ;;  %v785_v32 = vld [vmem:[#allocation5 + $0x14c0] sm:$0xff] }
 0x172   :  { %4870 = vmatprep.subr.bf16.mxu0 %v4869_v50  ;;  %v6283_v36 = vpop.f32.mrb[8].mxu1  ;;  %v726_v50 = vld [vmem:[#allocation5 + $0x12e8] sm:$0xff]  ;;  %v4887_v49 = vpack.c.bf16 %v715_v41, %v705_v39  ;;  %v147_v33 = vld [vmem:[#allocation5 + $0xd0] sm:$0xff] }
 0x173   :  { %v6285_v17 = vpop.f32.mrb[9].mxu1  ;;  %v178_v39 = vld [vmem:[#allocation5 + $0x1c8] sm:$0xff] }
 0x174   :  { %4744 = vmatpush1.bf16.msra.mxu1 %v4743_v54  ;;  %v1373_v54 = vld [vmem:[#allocation5 + $0x2720] sm:$0xff]  ;;  %v806_v41 = vld [vmem:[#allocation5 + $0x1568] sm:$0xff] }
 0x175   :  { %4872 = vmatpush1.bf16.msra.mxu0 %v4871_v55  ;;  %4746 = vmatprep.subr.bf16.mxu1 %v4745_v56  ;;  %v725_v55 = vld [vmem:[#allocation5 + $0x12e0] sm:$0xff]  ;;  %v4889_v56 = vpack.c.bf16 %v736_v47, %v726_v50  ;;  %v4763_v63 = vpack.c.bf16 %v1373_v54, %v1363_v52  ;;  %v5908_v47 = vld [vmem:[#allocation2 + $0x78] sm:$0xff]  ;;  %v167_v52 = vld [vmem:[#allocation5 + $0x170] sm:$0xff] }
 0x176   :  { %4874 = vmatprep.subr.bf16.mxu0 %v4873_v62  ;;  %v6287_v53 = vpop.f32.mrb[10].mxu1  ;;  %v746_v62 = vld [vmem:[#allocation5 + $0x1388] sm:$0xff]  ;;  %v4891_v0 = vpack.c.bf16 %v735_v58, %v725_v55  ;;  %v177_v54 = vld [vmem:[#allocation5 + $0x1c0] sm:$0xff]  ;;  %v4905_v55 = vpack.c.bf16 %v816_v42, %v806_v41  ;;  %v188_v58 = vld [vmem:[#allocation5 + $0x218] sm:$0xff] }
 0x177   :  { %v6289_v45 = vpop.f32.mrb[11].mxu1 }
 0x178   :  { %4748 = vmatpush1.bf16.msra.mxu1 %v4747_v5  ;;  %v1393_v5 = vld [vmem:[#allocation5 + $0x27c0] sm:$0xff] }
 0x179   :  { %4876 = vmatpush1.bf16.msra.mxu0 %v4875_v6  ;;  %4750 = vmatprep.subr.bf16.mxu1 %v4749_v7  ;;  %v745_v6 = vld [vmem:[#allocation5 + $0x1380] sm:$0xff]  ;;  %v4893_v7 = vpack.c.bf16 %v756_v2, %v746_v62  ;;  %v4767_v15 = vpack.c.bf16 %v1393_v5, %v1383_v4  ;;  %v826_v62 = vld [vmem:[#allocation5 + $0x1608] sm:$0xff]  ;;  %v836_v2 = vld [vmem:[#allocation5 + $0x1658] sm:$0xff]  ;;  %v5037_v5 = vpack.c.bf16 %v198_v59, %v188_v58 }
 0x17a   :  { %4878 = vmatprep.subr.bf16.mxu0 %v4877_v13  ;;  %v766_v13 = vld [vmem:[#allocation5 + $0x1428] sm:$0xff]  ;;  %v4895_v18 = vpack.c.bf16 %v755_v10, %v745_v6  ;;  %v825_v6 = vld [vmem:[#allocation5 + $0x1600] sm:$0xff]  ;;  %v4909_v9 = vpack.c.bf16 %v836_v2, %v826_v62  ;;  %v896_v58 = vld [vmem:[#allocation5 + $0x1838] sm:$0xff] }
 0x17b   :  { %v197_v10 = vld [vmem:[#allocation5 + $0x260] sm:$0xff]  ;;  %v5922_v59 = vld [vmem:[#allocation2 + $0x118] sm:$0xff] }
 0x17c   :  { %4752 = vmatpush1.bf16.msra.mxu1 %v4751_v23  ;;  %v137_v23 = vld [vmem:[#allocation5 + $0x80] sm:$0xff] }
 0x17d   :  { %4880 = vmatpush1.bf16.msra.mxu0 %v4879_v24  ;;  %4754 = vmatprep.subr.bf16.mxu1 %v4753_v25  ;;  %v4897_v24 = vpack.c.bf16 %v776_v14, %v766_v13  ;;  %v765_v25 = vld [vmem:[#allocation5 + $0x1420] sm:$0xff]  ;;  %v5027_v16 = vpack.c.bf16 %v137_v23, %v127_v22  ;;  %v208_v13 = vld [vmem:[#allocation5 + $0x2b8] sm:$0xff]  ;;  %v218_v14 = vld [vmem:[#allocation5 + $0x308] sm:$0xff] }
 0x17e   :  { %4882 = vmatprep.subr.bf16.mxu0 %v4881_v29  ;;  %v148_v29 = vld [vmem:[#allocation5 + $0xd8] sm:$0xff]  ;;  %v4899_v31 = vpack.c.bf16 %v775_v27, %v765_v25  ;;  %v4911_v27 = vpack.c.bf16 %v835_v11, %v825_v6  ;;  %v895_v6 = vld [vmem:[#allocation5 + $0x1830] sm:$0xff] }
 0x17f   :  { %v856_v22 = vld [vmem:[#allocation5 + $0x16f8] sm:$0xff]  ;;  %v5925_v11 = vld [vmem:[#allocation2 + $0x170] sm:$0xff] }
 0x180   :  { %4756 = vmatpush1.bf16.msra.mxu1 %v4755_v34  ;;  %v157_v34 = vld [vmem:[#allocation5 + $0x120] sm:$0xff]  ;;  %v5914_v23 = vld [vmem:[#allocation2 + $0x98] sm:$0xff] }
 0x181   :  { %4884 = vmatpush1.bf16.msra.mxu0 %v4883_v35  ;;  %4758 = vmatprep.subr.bf16.mxu1 %v4757_v37  ;;  %v4901_v35 = vpack.c.bf16 %v796_v28, %v786_v26  ;;  %v5029_v37 = vpack.c.bf16 %v158_v30, %v148_v29  ;;  %v5031_v50 = vpack.c.bf16 %v157_v34, %v147_v33  ;;  %v845_v28 = vld [vmem:[#allocation5 + $0x16a0] sm:$0xff]  ;;  %v207_v29 = vld [vmem:[#allocation5 + $0x2b0] sm:$0xff]  ;;  %v238_v33 = vld [vmem:[#allocation5 + $0x3a8] sm:$0xff] }
 0x182   :  { %4886 = vmatprep.subr.bf16.mxu0 %v4885_v40  ;;  %v5906_v40 = vld [vmem:[#allocation2 + $0x30] sm:$0xff]  ;;  %v5041_v26 = vpack.c.bf16 %v218_v14, %v208_v13  ;;  %v217_v30 = vld [vmem:[#allocation5 + $0x300] sm:$0xff]  ;;  %v906_v13 = vld [vmem:[#allocation5 + $0x1888] sm:$0xff] }
 0x183   :  { %v5916_v34 = vld [vmem:[#allocation2 + $0x90] sm:$0xff]  ;;  %v916_v14 = vld [vmem:[#allocation5 + $0x18d8] sm:$0xff] }
 0x184   :  { %4760 = vmatpush1.bf16.msra.mxu1 %v4759_v48  ;;  %v4903_v48 = vpack.c.bf16 %v795_v43, %v785_v32  ;;  %v228_v32 = vld [vmem:[#allocation5 + $0x358] sm:$0xff] }
 0x185   :  { %4888 = vmatpush1.bf16.msra.mxu0 %v4887_v49  ;;  %4762 = vmatprep.subr.bf16.mxu1 %v4761_v61  ;;  %v5033_v49 = vpack.c.bf16 %v178_v39, %v168_v38  ;;  %v805_v61 = vld [vmem:[#allocation5 + $0x1560] sm:$0xff]  ;;  %v876_v43 = vld [vmem:[#allocation5 + $0x1798] sm:$0xff]  ;;  %v5045_v42 = vpack.c.bf16 %v238_v33, %v228_v32  ;;  %v5929_v33 = vld [vmem:[#allocation2 + $0x28] sm:$0xff] }
 0x186   :  { %4890 = vmatprep.subr.bf16.mxu0 %v4889_v56  ;;  %v815_v56 = vld [vmem:[#allocation5 + $0x15b0] sm:$0xff]  ;;  %v5918_v38 = vld [vmem:[#allocation2 + $0xd8] sm:$0xff] }
 0x187   :  { %v4907_v4 = vpack.c.bf16 %v815_v56, %v805_v61  ;;  %v5919_v39 = vld [vmem:[#allocation2 + $0x138] sm:$0xff]  ;;  %v886_v56 = vld [vmem:[#allocation5 + $0x17e8] sm:$0xff] }
 0x188   :  { %4764 = vmatpush1.bf16.msra.mxu1 %v4763_v63  ;;  %v5910_v63 = vld [vmem:[#allocation2 + $0x58] sm:$0xff] }
 0x189   :  { %4892 = vmatpush1.bf16.msra.mxu0 %v4891_v0  ;;  %4766 = vmatprep.subr.bf16.mxu1 %v4765_v3  ;;  %v5911_v0 = vld [vmem:[#allocation2 + $0xb8] sm:$0xff]  ;;  %v5035_v3 = vpack.c.bf16 %v177_v54, %v167_v52  ;;  %v258_v52 = vld [vmem:[#allocation5 + $0x448] sm:$0xff]  ;;  %v5920_v54 = vld [vmem:[#allocation2 + $0xd0] sm:$0xff] }
 0x18a   :  { %4894 = vmatprep.subr.bf16.mxu0 %v4893_v7  ;;  %v187_v7 = vld [vmem:[#allocation5 + $0x210] sm:$0xff]  ;;  %v248_v61 = vld [vmem:[#allocation5 + $0x3f8] sm:$0xff] }
 0x18b   :  { %v5039_v25 = vpack.c.bf16 %v197_v10, %v187_v7  ;;  %v268_v7 = vld [vmem:[#allocation5 + $0x498] sm:$0xff]  ;;  %v278_v10 = vld [vmem:[#allocation5 + $0x4e8] sm:$0xff] }
 0x18c   :  { %4768 = vmatpush1.bf16.msra.mxu1 %v4767_v15  ;;  %v5912_v15 = vld [vmem:[#allocation2 + $0x50] sm:$0xff]  ;;  %v936_v32 = vld [vmem:[#allocation5 + $0x1978] sm:$0xff] }
 0x18d   :  { %4896 = vmatpush1.bf16.msra.mxu0 %v4895_v18  ;;  %5026 = vmatprep.subr.bf16.mxu1 %v5025_v21  ;;  %v5913_v18 = vld [vmem:[#allocation2 + $0xb0] sm:$0xff]  ;;  %v846_v21 = vld [vmem:[#allocation5 + $0x16a8] sm:$0xff] }
 0x18e   :  { %4898 = vmatprep.subr.bf16.mxu0 %v4897_v24  ;;  %v5915_v24 = vld [vmem:[#allocation2 + $0xf8] sm:$0xff] }
 0x18f   :  { %2173 = vmatmul.mubr.f32.vlgmr.msra.gmra.mrb[12].mxu1 %v5906_v40  ;;  %v5043_v40 = vpack.c.bf16 %v217_v30, %v207_v29  ;;  %v288_v29 = vld [vmem:[#allocation5 + $0x538] sm:$0xff]  ;;  %v298_v30 = vld [vmem:[#allocation5 + $0x588] sm:$0xff] }
 0x190   :  { %2375 = vmatmul.mubr.f32.vlgmr.msra.gmra.mrb[12].mxu0 %v5907_v44  ;;  %5028 = vmatpush1.bf16.msra.mxu1 %v5027_v16  ;;  %v4913_v16 = vpack.c.bf16 %v856_v22, %v846_v21  ;;  %v865_v44 = vld [vmem:[#allocation5 + $0x1740] sm:$0xff]  ;;  %v5927_v21 = vld [vmem:[#allocation2 + $0x8] sm:$0xff] }
 0x191   :  { %4900 = vmatpush1.bf16.msra.mxu0 %v4899_v31  ;;  %2178 = vmatprep.mubr.f32.mxu1 %v5908_v47  ;;  %v855_v31 = vld [vmem:[#allocation5 + $0x16f0] sm:$0xff]  ;;  %v237_v47 = vld [vmem:[#allocation5 + $0x3a0] sm:$0xff] }
 0x192   :  { %4902 = vmatprep.subr.bf16.mxu0 %v4901_v35  ;;  %5030 = vmatprep.subr.bf16.mxu1 %v5029_v37  ;;  %v5917_v35 = vld [vmem:[#allocation2 + $0xf0] sm:$0xff]  ;;  %v866_v37 = vld [vmem:[#allocation5 + $0x1748] sm:$0xff]  ;;  %v4915_v41 = vpack.c.bf16 %v855_v31, %v845_v28 }
 0x193   :  { %2179 = vmatmul.mubr.f32.gmra.mrb[14].mxu1 %v5909_v57  ;;  %2380 = vmatprep.mubr.f32.mxu0 %v5910_v63  ;;  %v5923_v57 = vld [vmem:[#allocation2 + $0x178] sm:$0xff]  ;;  %v5049_v63 = vpack.c.bf16 %v258_v52, %v248_v61  ;;  %v915_v28 = vld [vmem:[#allocation5 + $0x18d0] sm:$0xff]  ;;  %v926_v31 = vld [vmem:[#allocation5 + $0x1928] sm:$0xff] }
 0x194   :  { %5032 = vmatpush1.bf16.msra.mxu1 %v5031_v50  ;;  %2184 = vmatprep.mubr.f32.mxu1 %v5911_v0  ;;  %v227_v50 = vld [vmem:[#allocation5 + $0x350] sm:$0xff]  ;;  %v885_v0 = vld [vmem:[#allocation5 + $0x17e0] sm:$0xff] }
 0x195   :  { %4904 = vmatpush1.bf16.msra.mxu0 %v4903_v48  ;;  %5034 = vmatprep.subr.bf16.mxu1 %v5033_v49  ;;  %v4917_v48 = vpack.c.bf16 %v876_v43, %v866_v37  ;;  %v875_v49 = vld [vmem:[#allocation5 + $0x1790] sm:$0xff]  ;;  %v5047_v62 = vpack.c.bf16 %v237_v47, %v227_v50  ;;  %v4923_v22 = vpack.c.bf16 %v895_v6, %v885_v0  ;;  %v925_v43 = vld [vmem:[#allocation5 + $0x1920] sm:$0xff]  ;;  %v946_v50 = vld [vmem:[#allocation5 + $0x19c8] sm:$0xff] }
 0x196   :  { %4906 = vmatprep.subr.bf16.mxu0 %v4905_v55  ;;  %2381 = vmatmul.mubr.f32.gmra.mrb[14].mxu0 %v5912_v15  ;;  %v5921_v55 = vld [vmem:[#allocation2 + $0x130] sm:$0xff]  ;;  %v4919_v2 = vpack.c.bf16 %v875_v49, %v865_v44  ;;  %v5926_v15 = vld [vmem:[#allocation2 + $0x158] sm:$0xff]  ;;  %v5057_v37 = vpack.c.bf16 %v298_v30, %v288_v29  ;;  %v318_v44 = vld [vmem:[#allocation5 + $0x628] sm:$0xff] }
 0x197   :  { %2185 = vmatmul.mubr.f32.gmra.mrb[16].mxu1 %v5913_v18  ;;  %2386 = vmatprep.mubr.f32.mxu0 %v5914_v23  ;;  %v5053_v23 = vpack.c.bf16 %v278_v10, %v268_v7  ;;  %v956_v47 = vld [vmem:[#allocation5 + $0x1a18] sm:$0xff]  ;;  %v945_v52 = vld [vmem:[#allocation5 + $0x19c0] sm:$0xff]  ;;  %v975_v10 = vld [vmem:[#allocation5 + $0x1ab0] sm:$0xff] }
 0x198   :  { %5036 = vmatpush1.bf16.msra.mxu1 %v5035_v3  ;;  %2190 = vmatprep.mubr.f32.mxu1 %v5915_v24  ;;  %v247_v3 = vld [vmem:[#allocation5 + $0x3f0] sm:$0xff]  ;;  %v905_v24 = vld [vmem:[#allocation5 + $0x1880] sm:$0xff]  ;;  %v1006_v29 = vld [vmem:[#allocation5 + $0x1ba8] sm:$0xff] }
 0x199   :  { %4908 = vmatpush1.bf16.msra.mxu0 %v4907_v4  ;;  %5038 = vmatprep.subr.bf16.mxu1 %v5037_v5  ;;  %v257_v4 = vld [vmem:[#allocation5 + $0x440] sm:$0xff]  ;;  %v4921_v5 = vpack.c.bf16 %v896_v58, %v886_v56  ;;  %v4933_v56 = vpack.c.bf16 %v956_v47, %v946_v50  ;;  %v955_v58 = vld [vmem:[#allocation5 + $0x1a10] sm:$0xff]  ;;  %v1016_v30 = vld [vmem:[#allocation5 + $0x1bf8] sm:$0xff] }
 0x19a   :  { %4910 = vmatprep.subr.bf16.mxu0 %v4909_v9  ;;  %2387 = vmatmul.mubr.f32.gmra.mrb[16].mxu0 %v5916_v34  ;;  %v5924_v9 = vld [vmem:[#allocation2 + $0x110] sm:$0xff]  ;;  %v5051_v18 = vpack.c.bf16 %v257_v4, %v247_v3  ;;  %v4935_v0 = vpack.c.bf16 %v955_v58, %v945_v52  ;;  %v965_v4 = vld [vmem:[#allocation5 + $0x1a60] sm:$0xff]  ;;  %v1056_v58 = vld [vmem:[#allocation5 + $0x1d38] sm:$0xff] }
 0x19b   :  { %2191 = vmatmul.mubr.f32.gmra.mrb[18].mxu1 %v5917_v35  ;;  %2392 = vmatprep.mubr.f32.mxu0 %v5918_v38  ;;  %v4927_v35 = vpack.c.bf16 %v915_v28, %v905_v24  ;;  %v287_v38 = vld [vmem:[#allocation5 + $0x530] sm:$0xff]  ;;  %v337_v6 = vld [vmem:[#allocation5 + $0x6c0] sm:$0xff]  ;;  %v378_v28 = vld [vmem:[#allocation5 + $0x808] sm:$0xff] }
 0x19c   :  { %5040 = vmatpush1.bf16.msra.mxu1 %v5039_v25  ;;  %2196 = vmatprep.mubr.f32.mxu1 %v5919_v39  ;;  %v267_v25 = vld [vmem:[#allocation5 + $0x490] sm:$0xff]  ;;  %v297_v39 = vld [vmem:[#allocation5 + $0x580] sm:$0xff] }
 0x19d   :  { %4912 = vmatpush1.bf16.msra.mxu0 %v4911_v27  ;;  %5042 = vmatprep.subr.bf16.mxu1 %v5041_v26  ;;  %v277_v27 = vld [vmem:[#allocation5 + $0x4e0] sm:$0xff]  ;;  %v4925_v26 = vpack.c.bf16 %v916_v14, %v906_v13  ;;  %v986_v13 = vld [vmem:[#allocation5 + $0x1b08] sm:$0xff]  ;;  %v996_v14 = vld [vmem:[#allocation5 + $0x1b58] sm:$0xff] }
 0x19e   :  { %4914 = vmatprep.subr.bf16.mxu0 %v4913_v16  ;;  %2393 = vmatmul.mubr.f32.gmra.mrb[18].mxu0 %v5920_v54  ;;  %v5928_v16 = vld [vmem:[#allocation2 + $0x150] sm:$0xff]  ;;  %v5055_v34 = vpack.c.bf16 %v277_v27, %v267_v25  ;;  %v357_v24 = vld [vmem:[#allocation5 + $0x760] sm:$0xff]  ;;  %v4941_v25 = vpack.c.bf16 %v996_v14, %v986_v13 }
 0x19f   :  { %2197 = vmatmul.mubr.f32.gmra.mrb[20].mxu1 %v5921_v55  ;;  %2398 = vmatprep.mubr.f32.mxu0 %v5922_v59  ;;  %v307_v54 = vld [vmem:[#allocation5 + $0x5d0] sm:$0xff]  ;;  %v317_v55 = vld [vmem:[#allocation5 + $0x620] sm:$0xff]  ;;  %v328_v59 = vld [vmem:[#allocation5 + $0x678] sm:$0xff] }
 0x1a0   :  { %5044 = vmatpush1.bf16.msra.mxu1 %v5043_v40  ;;  %2202 = vmatprep.mubr.f32.mxu1 %v5923_v57  ;;  %v4929_v40 = vpack.c.bf16 %v936_v32, %v926_v31  ;;  %v338_v57 = vld [vmem:[#allocation5 + $0x6c8] sm:$0xff]  ;;  %v995_v27 = vld [vmem:[#allocation5 + $0x1b50] sm:$0xff]  ;;  %v1025_v47 = vld [vmem:[#allocation5 + $0x1c40] sm:$0xff] }
 0x1a1   :  { %4916 = vmatpush1.bf16.msra.mxu0 %v4915_v41  ;;  %5046 = vmatprep.subr.bf16.mxu1 %v5045_v42  ;;  %v935_v41 = vld [vmem:[#allocation5 + $0x1970] sm:$0xff]  ;;  %v308_v42 = vld [vmem:[#allocation5 + $0x5d8] sm:$0xff]  ;;  %v5065_v3 = vpack.c.bf16 %v338_v57, %v328_v59  ;;  %v1065_v14 = vld [vmem:[#allocation5 + $0x1d80] sm:$0xff] }
 0x1a2   :  { %4918 = vmatprep.subr.bf16.mxu0 %v4917_v48  ;;  %2399 = vmatmul.mubr.f32.gmra.mrb[20].mxu0 %v5924_v9  ;;  %v5059_v48 = vpack.c.bf16 %v297_v39, %v287_v38  ;;  %v4931_v49 = vpack.c.bf16 %v935_v41, %v925_v43  ;;  %v5061_v61 = vpack.c.bf16 %v318_v44, %v308_v42  ;;  %v348_v9 = vld [vmem:[#allocation5 + $0x718] sm:$0xff]  ;;  %v1015_v43 = vld [vmem:[#allocation5 + $0x1bf0] sm:$0xff]  ;;  %v398_v39 = vld [vmem:[#allocation5 + $0x8a8] sm:$0xff] }
 0x1a3   :  { %2203 = vmatmul.mubr.f32.gmra.mrb[22].mxu1 %v5925_v11  ;;  %2404 = vmatprep.mubr.f32.mxu0 %v5926_v15  ;;  %v358_v11 = vld [vmem:[#allocation5 + $0x768] sm:$0xff]  ;;  %v388_v38 = vld [vmem:[#allocation5 + $0x858] sm:$0xff]  ;;  %v1035_v52 = vld [vmem:[#allocation5 + $0x1c90] sm:$0xff] }
 0x1a4   :  { %5048 = vmatpush1.bf16.msra.mxu1 %v5047_v62  ;;  %2677 = vmatprep.mubr.f32.mxu1 %v5927_v21  ;;  %v966_v62 = vld [vmem:[#allocation5 + $0x1a68] sm:$0xff]  ;;  %v5069_v21 = vpack.c.bf16 %v358_v11, %v348_v9  ;;  %v1036_v41 = vld [vmem:[#allocation5 + $0x1c98] sm:$0xff]  ;;  %v5077_v50 = vpack.c.bf16 %v398_v39, %v388_v38  ;;  %v4951_v57 = vpack.c.bf16 %v1035_v52, %v1025_v47  ;;  %v1115_v47 = vld [vmem:[#allocation5 + $0x1f10] sm:$0xff] }
 0x1a5   :  { %4920 = vmatpush1.bf16.msra.mxu0 %v4919_v2  ;;  %5050 = vmatprep.subr.bf16.mxu1 %v5049_v63  ;;  %v976_v2 = vld [vmem:[#allocation5 + $0x1ab8] sm:$0xff]  ;;  %v5063_v63 = vpack.c.bf16 %v317_v55, %v307_v54  ;;  %v418_v55 = vld [vmem:[#allocation5 + $0x948] sm:$0xff] }
 0x1a6   :  { %4922 = vmatprep.subr.bf16.mxu0 %v4921_v5  ;;  %2405 = vmatmul.mubr.f32.gmra.mrb[22].mxu0 %v5928_v16  ;;  %v327_v5 = vld [vmem:[#allocation5 + $0x670] sm:$0xff]  ;;  %v4937_v7 = vpack.c.bf16 %v976_v2, %v966_v62  ;;  %v408_v54 = vld [vmem:[#allocation5 + $0x8f8] sm:$0xff]  ;;  %v1045_v2 = vld [vmem:[#allocation5 + $0x1ce0] sm:$0xff] }
 0x1a7   :  { %2475 = vmatprep.mubr.f32.mxu0 %v5929_v33  ;;  %v5067_v15 = vpack.c.bf16 %v337_v6, %v327_v5  ;;  %v1005_v33 = vld [vmem:[#allocation5 + $0x1ba0] sm:$0xff]  ;;  %v5081_v62 = vpack.c.bf16 %v418_v55, %v408_v54  ;;  %v428_v5 = vld [vmem:[#allocation5 + $0x998] sm:$0xff]  ;;  %v438_v6 = vld [vmem:[#allocation5 + $0x9e8] sm:$0xff] }
 0x1a8   :  { %5052 = vmatpush1.bf16.msra.mxu1 %v5051_v18  ;;  %v4939_v18 = vpack.c.bf16 %v975_v10, %v965_v4  ;;  %v4947_v44 = vpack.c.bf16 %v1015_v43, %v1005_v33  ;;  %v1055_v4 = vld [vmem:[#allocation5 + $0x1d30] sm:$0xff]  ;;  %v1076_v10 = vld [vmem:[#allocation5 + $0x1dd8] sm:$0xff]  ;;  %v5085_v13 = vpack.c.bf16 %v438_v6, %v428_v5  ;;  %v1126_v52 = vld [vmem:[#allocation5 + $0x1f68] sm:$0xff] }
 0x1a9   :  { %4924 = vmatpush1.bf16.msra.mxu0 %v4923_v22  ;;  %5054 = vmatprep.subr.bf16.mxu1 %v5053_v23  ;;  %v985_v22 = vld [vmem:[#allocation5 + $0x1b00] sm:$0xff]  ;;  %v347_v23 = vld [vmem:[#allocation5 + $0x710] sm:$0xff]  ;;  %v4955_v11 = vpack.c.bf16 %v1055_v4, %v1045_v2  ;;  %v1116_v43 = vld [vmem:[#allocation5 + $0x1f18] sm:$0xff] }
 0x1aa   :  { %4926 = vmatprep.subr.bf16.mxu0 %v4925_v26  ;;  %v368_v26 = vld [vmem:[#allocation5 + $0x7b8] sm:$0xff]  ;;  %v5071_v16 = vpack.c.bf16 %v357_v24, %v347_v23  ;;  %v4943_v31 = vpack.c.bf16 %v995_v27, %v985_v22  ;;  %v1075_v22 = vld [vmem:[#allocation5 + $0x1dd0] sm:$0xff]  ;;  %v458_v24 = vld [vmem:[#allocation5 + $0xa88] sm:$0xff] }
 0x1ab   :  { %v5073_v32 = vpack.c.bf16 %v378_v28, %v368_v26  ;;  %v448_v23 = vld [vmem:[#allocation5 + $0xa38] sm:$0xff]  ;;  %v4959_v28 = vpack.c.bf16 %v1075_v22, %v1065_v14  ;;  %v1095_v33 = vld [vmem:[#allocation5 + $0x1e70] sm:$0xff]  ;;  %v5931_v55 = vld [vmem:[#allocation2 + $0x20] sm:$0xff] }
 0x1ac   :  { %5056 = vmatpush1.bf16.msra.mxu1 %v5055_v34  ;;  %v367_v34 = vld [vmem:[#allocation5 + $0x7b0] sm:$0xff]  ;;  %v1096_v27 = vld [vmem:[#allocation5 + $0x1e78] sm:$0xff]  ;;  %v497_v2 = vld [vmem:[#allocation5 + $0xbc0] sm:$0xff] }
 0x1ad   :  { %4928 = vmatpush1.bf16.msra.mxu0 %v4927_v35  ;;  %5058 = vmatprep.subr.bf16.mxu1 %v5057_v37  ;;  %v377_v35 = vld [vmem:[#allocation5 + $0x800] sm:$0xff]  ;;  %v4945_v37 = vpack.c.bf16 %v1016_v30, %v1006_v29  ;;  %v5089_v29 = vpack.c.bf16 %v458_v24, %v448_v23  ;;  %v1136_v54 = vld [vmem:[#allocation5 + $0x1fb8] sm:$0xff]  ;;  %v518_v4 = vld [vmem:[#allocation5 + $0xc68] sm:$0xff] }
 0x1ae   :  { %4930 = vmatprep.subr.bf16.mxu0 %v4929_v40  ;;  %v1026_v40 = vld [vmem:[#allocation5 + $0x1c48] sm:$0xff]  ;;  %v5075_v42 = vpack.c.bf16 %v377_v35, %v367_v34  ;;  %v1085_v30 = vld [vmem:[#allocation5 + $0x1e20] sm:$0xff]  ;;  %v468_v34 = vld [vmem:[#allocation5 + $0xad8] sm:$0xff] }
 0x1af   :  { %v478_v35 = vld [vmem:[#allocation5 + $0xb28] sm:$0xff]  ;;  %v4963_v39 = vpack.c.bf16 %v1095_v33, %v1085_v30  ;;  %v1155_v23 = vld [vmem:[#allocation5 + $0x2050] sm:$0xff]  ;;  %v528_v24 = vld [vmem:[#allocation5 + $0xcb8] sm:$0xff] }
 0x1b0   :  { %5060 = vmatpush1.bf16.msra.mxu1 %v5059_v48  ;;  %v387_v48 = vld [vmem:[#allocation5 + $0x850] sm:$0xff]  ;;  %v5932_v5 = vld [vmem:[#allocation2 + $0x68] sm:$0xff] }
 0x1b1   :  { %4932 = vmatpush1.bf16.msra.mxu0 %v4931_v49  ;;  %5062 = vmatprep.subr.bf16.mxu1 %v5061_v61  ;;  %v397_v49 = vld [vmem:[#allocation5 + $0x8a0] sm:$0xff]  ;;  %v4949_v61 = vpack.c.bf16 %v1036_v41, %v1026_v40  ;;  %v5093_v40 = vpack.c.bf16 %v478_v35, %v468_v34  ;;  %v1146_v6 = vld [vmem:[#allocation5 + $0x2008] sm:$0xff]  ;;  %v527_v35 = vld [vmem:[#allocation5 + $0xcb0] sm:$0xff] }
 0x1b2   :  { %4934 = vmatprep.subr.bf16.mxu0 %v4933_v56  ;;  %v1046_v56 = vld [vmem:[#allocation5 + $0x1ce8] sm:$0xff]  ;;  %v5079_v59 = vpack.c.bf16 %v397_v49, %v387_v48  ;;  %v1105_v41 = vld [vmem:[#allocation5 + $0x1ec0] sm:$0xff]  ;;  %v488_v48 = vld [vmem:[#allocation5 + $0xb78] sm:$0xff] }
 0x1b3   :  { %v498_v49 = vld [vmem:[#allocation5 + $0xbc8] sm:$0xff]  ;;  %v1165_v34 = vld [vmem:[#allocation5 + $0x20a0] sm:$0xff] }
 0x1b4   :  { %5064 = vmatpush1.bf16.msra.mxu1 %v5063_v63  ;;  %v407_v63 = vld [vmem:[#allocation5 + $0x8f0] sm:$0xff]  ;;  %v5937_v30 = vld [vmem:[#allocation2 + $0x88] sm:$0xff] }
 0x1b5   :  { %4936 = vmatpush1.bf16.msra.mxu0 %v4935_v0  ;;  %5066 = vmatprep.subr.bf16.mxu1 %v5065_v3  ;;  %v417_v0 = vld [vmem:[#allocation5 + $0x940] sm:$0xff]  ;;  %v4953_v3 = vpack.c.bf16 %v1056_v58, %v1046_v56  ;;  %v4967_v58 = vpack.c.bf16 %v1115_v47, %v1105_v41  ;;  %v5941_v47 = vld [vmem:[#allocation2 + $0xc8] sm:$0xff] }
 0x1b6   :  { %4938 = vmatprep.subr.bf16.mxu0 %v4937_v7  ;;  %v1066_v7 = vld [vmem:[#allocation5 + $0x1d88] sm:$0xff]  ;;  %v5083_v9 = vpack.c.bf16 %v417_v0, %v407_v63  ;;  %v4969_v63 = vpack.c.bf16 %v1136_v54, %v1126_v52  ;;  %v1135_v0 = vld [vmem:[#allocation5 + $0x1fb0] sm:$0xff]  ;;  %v5939_v41 = vld [vmem:[#allocation2 + $0x80] sm:$0xff] }
 0x1b7   :  { %v1185_v54 = vld [vmem:[#allocation5 + $0x2140] sm:$0xff] }
 0x1b8   :  { %5068 = vmatpush1.bf16.msra.mxu1 %v5067_v15  ;;  %v427_v15 = vld [vmem:[#allocation5 + $0x990] sm:$0xff] }
 0x1b9   :  { %4940 = vmatpush1.bf16.msra.mxu0 %v4939_v18  ;;  %5070 = vmatprep.subr.bf16.mxu1 %v5069_v21  ;;  %v437_v18 = vld [vmem:[#allocation5 + $0x9e0] sm:$0xff]  ;;  %v4957_v21 = vpack.c.bf16 %v1076_v10, %v1066_v7  ;;  %v1156_v7 = vld [vmem:[#allocation5 + $0x2058] sm:$0xff]  ;;  %v5933_v10 = vld [vmem:[#allocation2 + $0x48] sm:$0xff] }
 0x1ba   :  { %4942 = vmatprep.subr.bf16.mxu0 %v4941_v25  ;;  %v1086_v25 = vld [vmem:[#allocation5 + $0x1e28] sm:$0xff]  ;;  %v5087_v26 = vpack.c.bf16 %v437_v18, %v427_v15  ;;  %v1145_v15 = vld [vmem:[#allocation5 + $0x2000] sm:$0xff]  ;;  %v507_v18 = vld [vmem:[#allocation5 + $0xc10] sm:$0xff]  ;;  %v4973_v22 = vpack.c.bf16 %v1156_v7, %v1146_v6 }
 0x1bb   :  { %v5946_v6 = vld [vmem:[#allocation2 + $0x120] sm:$0xff] }
 0x1bc   :  { %5072 = vmatpush1.bf16.msra.mxu1 %v5071_v16  ;;  %v447_v16 = vld [vmem:[#allocation5 + $0xa30] sm:$0xff] }
 0x1bd   :  { %4944 = vmatpush1.bf16.msra.mxu0 %v4943_v31  ;;  %5074 = vmatprep.subr.bf16.mxu1 %v5073_v32  ;;  %v457_v31 = vld [vmem:[#allocation5 + $0xa80] sm:$0xff]  ;;  %v4961_v32 = vpack.c.bf16 %v1096_v27, %v1086_v25  ;;  %v538_v25 = vld [vmem:[#allocation5 + $0xd08] sm:$0xff] }
 0x1be   :  { %4946 = vmatprep.subr.bf16.mxu0 %v4945_v37  ;;  %v1106_v37 = vld [vmem:[#allocation5 + $0x1ec8] sm:$0xff]  ;;  %v5091_v38 = vpack.c.bf16 %v457_v31, %v447_v16  ;;  %v5935_v27 = vld [vmem:[#allocation2 + $0x40] sm:$0xff]  ;;  %v5105_v33 = vpack.c.bf16 %v538_v25, %v528_v24  ;;  %v1236_v25 = vld [vmem:[#allocation5 + $0x22d8] sm:$0xff] }
 0x1bf   :  { %v5938_v31 = vld [vmem:[#allocation2 + $0xa0] sm:$0xff]  ;;  %v1226_v24 = vld [vmem:[#allocation5 + $0x2288] sm:$0xff] }
 0x1c0   :  { %5076 = vmatpush1.bf16.msra.mxu1 %v5075_v42  ;;  %v467_v42 = vld [vmem:[#allocation5 + $0xad0] sm:$0xff] }
 0x1c1   :  { %4948 = vmatpush1.bf16.msra.mxu0 %v4947_v44  ;;  %5078 = vmatprep.subr.bf16.mxu1 %v5077_v50  ;;  %v477_v44 = vld [vmem:[#allocation5 + $0xb20] sm:$0xff]  ;;  %v4965_v50 = vpack.c.bf16 %v1116_v43, %v1106_v37 }
 0x1c2   :  { %4950 = vmatprep.subr.bf16.mxu0 %v4949_v61  ;;  %v5930_v61 = vld [vmem:[#allocation2] sm:$0xff]  ;;  %v5095_v56 = vpack.c.bf16 %v477_v44, %v467_v42  ;;  %v1186_v42 = vld [vmem:[#allocation5 + $0x2148] sm:$0xff]  ;;  %v1196_v44 = vld [vmem:[#allocation5 + $0x2198] sm:$0xff] }
 0x1c3   :  { %v537_v37 = vld [vmem:[#allocation5 + $0xd00] sm:$0xff] }
 0x1c4   :  { %5080 = vmatpush1.bf16.msra.mxu1 %v5079_v59  ;;  %v5097_v59 = vpack.c.bf16 %v498_v49, %v488_v48  ;;  %v5107_v48 = vpack.c.bf16 %v537_v37, %v527_v35  ;;  %v5942_v49 = vld [vmem:[#allocation2 + $0xe0] sm:$0xff]  ;;  %v587_v35 = vld [vmem:[#allocation5 + $0xe90] sm:$0xff] }
 0x1c5   :  { %4952 = vmatpush1.bf16.msra.mxu0 %v4951_v57  ;;  %5082 = vmatprep.subr.bf16.mxu1 %v5081_v62  ;;  %v1125_v57 = vld [vmem:[#allocation5 + $0x1f60] sm:$0xff]  ;;  %v487_v62 = vld [vmem:[#allocation5 + $0xb70] sm:$0xff] }
 0x1c6   :  { %4954 = vmatprep.subr.bf16.mxu0 %v4953_v3  ;;  %v508_v3 = vld [vmem:[#allocation5 + $0xc18] sm:$0xff]  ;;  %v597_v37 = vld [vmem:[#allocation5 + $0xee0] sm:$0xff] }
 0x1c7   :  { %v5101_v14 = vpack.c.bf16 %v518_v4, %v508_v3  ;;  %v5944_v3 = vld [vmem:[#allocation2 + $0x128] sm:$0xff] }
 0x1c8   :  { %5084 = vmatpush1.bf16.msra.mxu1 %v5083_v9  ;;  %v5099_v9 = vpack.c.bf16 %v497_v2, %v487_v62  ;;  %v578_v62 = vld [vmem:[#allocation5 + $0xe48] sm:$0xff]  ;;  %v5943_v2 = vld [vmem:[#allocation2 + $0xc0] sm:$0xff] }
 0x1c9   :  { %4956 = vmatpush1.bf16.msra.mxu0 %v4955_v11  ;;  %5086 = vmatprep.subr.bf16.mxu1 %v5085_v13  ;;  %v5934_v11 = vld [vmem:[#allocation2 + $0x60] sm:$0xff]  ;;  %v4971_v13 = vpack.c.bf16 %v1135_v0, %v1125_v57  ;;  %v568_v57 = vld [vmem:[#allocation5 + $0xdf8] sm:$0xff]  ;;  %v5945_v4 = vld [vmem:[#allocation2 + $0x108] sm:$0xff] }
 0x1ca   :  { %4958 = vmatprep.subr.bf16.mxu0 %v4957_v21  ;;  %v517_v21 = vld [vmem:[#allocation5 + $0xc60] sm:$0xff]  ;;  %v1216_v0 = vld [vmem:[#allocation5 + $0x2238] sm:$0xff] }
 0x1cb   :  { %v5103_v16 = vpack.c.bf16 %v517_v21, %v507_v18  ;;  %v588_v18 = vld [vmem:[#allocation5 + $0xe98] sm:$0xff]  ;;  %v598_v21 = vld [vmem:[#allocation5 + $0xee8] sm:$0xff] }
 0x1cc   :  { %5088 = vmatpush1.bf16.msra.mxu1 %v5087_v26  ;;  %v1166_v26 = vld [vmem:[#allocation5 + $0x20a8] sm:$0xff] }
 0x1cd   :  { %4960 = vmatpush1.bf16.msra.mxu0 %v4959_v28  ;;  %5090 = vmatprep.subr.bf16.mxu1 %v5089_v29  ;;  %v1176_v28 = vld [vmem:[#allocation5 + $0x20f8] sm:$0xff]  ;;  %v5936_v29 = vld [vmem:[#allocation2 + $0xa8] sm:$0xff] }
 0x1ce   :  { %4962 = vmatprep.subr.bf16.mxu0 %v4961_v32  ;;  %v4975_v32 = vpack.c.bf16 %v1155_v23, %v1145_v15  ;;  %v4977_v43 = vpack.c.bf16 %v1176_v28, %v1166_v26  ;;  %v1215_v15 = vld [vmem:[#allocation5 + $0x2230] sm:$0xff]  ;;  %v5949_v26 = vld [vmem:[#allocation2 + $0x148] sm:$0xff] }
 0x1cf   :  { %2678 = vmatmul.mubr.f32.vlgmr.msra.gmra.mrb[24].mxu1 %v5930_v61 }
 0x1d0   :  { %2476 = vmatmul.mubr.f32.vlgmr.msra.gmra.mrb[12].mxu0 %v5931_v55  ;;  %5092 = vmatpush1.bf16.msra.mxu1 %v5091_v38  ;;  %v1175_v38 = vld [vmem:[#allocation5 + $0x20f0] sm:$0xff] }
 0x1d1   :  { %4964 = vmatpush1.bf16.msra.mxu0 %v4963_v39  ;;  %5094 = vmatprep.subr.bf16.mxu1 %v5093_v40  ;;  %v548_v39 = vld [vmem:[#allocation5 + $0xd58] sm:$0xff]  ;;  %v558_v40 = vld [vmem:[#allocation5 + $0xda8] sm:$0xff]  ;;  %v4979_v61 = vpack.c.bf16 %v1175_v38, %v1165_v34  ;;  %v547_v55 = vld [vmem:[#allocation5 + $0xd50] sm:$0xff] }
 0x1d2   :  { %4966 = vmatprep.subr.bf16.mxu0 %v4965_v50  ;;  %2481 = vmatprep.mubr.f32.mxu0 %v5932_v5  ;;  %v5940_v50 = vld [vmem:[#allocation2 + $0xe8] sm:$0xff]  ;;  %v5109_v52 = vpack.c.bf16 %v558_v40, %v548_v39  ;;  %v1225_v34 = vld [vmem:[#allocation5 + $0x2280] sm:$0xff]  ;;  %v1235_v38 = vld [vmem:[#allocation5 + $0x22d0] sm:$0xff] }
 0x1d3   :  { %2683 = vmatprep.mubr.f32.mxu1 %v5933_v10  ;;  %v5113_v10 = vpack.c.bf16 %v578_v62, %v568_v57  ;;  %v618_v39 = vld [vmem:[#allocation5 + $0xf88] sm:$0xff]  ;;  %v5951_v40 = vld [vmem:[#allocation2 + $0x140] sm:$0xff]  ;;  %v1255_v57 = vld [vmem:[#allocation5 + $0x2370] sm:$0xff] }
 0x1d4   :  { %5096 = vmatpush1.bf16.msra.mxu1 %v5095_v56  ;;  %2482 = vmatmul.mubr.f32.gmra.mrb[14].mxu0 %v5934_v11  ;;  %v557_v56 = vld [vmem:[#allocation5 + $0xda0] sm:$0xff]  ;;  %v567_v11 = vld [vmem:[#allocation5 + $0xdf0] sm:$0xff]  ;;  %v628_v62 = vld [vmem:[#allocation5 + $0xfd8] sm:$0xff] }
 0x1d5   :  { %4968 = vmatpush1.bf16.msra.mxu0 %v4967_v58  ;;  %5098 = vmatprep.subr.bf16.mxu1 %v5097_v59  ;;  %v4981_v58 = vpack.c.bf16 %v1196_v44, %v1186_v42  ;;  %v1195_v59 = vld [vmem:[#allocation5 + $0x2190] sm:$0xff]  ;;  %v5111_v5 = vpack.c.bf16 %v557_v56, %v547_v55  ;;  %v1246_v42 = vld [vmem:[#allocation5 + $0x2328] sm:$0xff]  ;;  %v1256_v44 = vld [vmem:[#allocation5 + $0x2378] sm:$0xff] }
 0x1d6   :  { %4970 = vmatprep.subr.bf16.mxu0 %v4969_v63  ;;  %2684 = vmatmul.mubr.f32.gmra.mrb[26].mxu1 %v5935_v27  ;;  %v1206_v63 = vld [vmem:[#allocation5 + $0x21e8] sm:$0xff]  ;;  %v4983_v7 = vpack.c.bf16 %v1195_v59, %v1185_v54  ;;  %v1245_v55 = vld [vmem:[#allocation5 + $0x2320] sm:$0xff]  ;;  %v607_v56 = vld [vmem:[#allocation5 + $0xf30] sm:$0xff]  ;;  %v4993_v59 = vpack.c.bf16 %v1256_v44, %v1246_v42 }
 0x1d7   :  { %2487 = vmatprep.mubr.f32.mxu0 %v5936_v29  ;;  %2689 = vmatprep.mubr.f32.mxu1 %v5937_v30  ;;  %v5948_v27 = vld [vmem:[#allocation2 + $0x168] sm:$0xff]  ;;  %v1305_v42 = vld [vmem:[#allocation5 + $0x2500] sm:$0xff]  ;;  %v667_v44 = vld [vmem:[#allocation5 + $0x1110] sm:$0xff] }
 0x1d8   :  { %5100 = vmatpush1.bf16.msra.mxu1 %v5099_v9  ;;  %2488 = vmatmul.mubr.f32.gmra.mrb[16].mxu0 %v5938_v31  ;;  %v1205_v9 = vld [vmem:[#allocation5 + $0x21e0] sm:$0xff] }
 0x1d9   :  { %4972 = vmatpush1.bf16.msra.mxu0 %v4971_v13  ;;  %5102 = vmatprep.subr.bf16.mxu1 %v5101_v14  ;;  %v577_v13 = vld [vmem:[#allocation5 + $0xe40] sm:$0xff]  ;;  %v4985_v14 = vpack.c.bf16 %v1216_v0, %v1206_v63  ;;  %v1266_v63 = vld [vmem:[#allocation5 + $0x23c8] sm:$0xff]  ;;  %v1276_v0 = vld [vmem:[#allocation5 + $0x2418] sm:$0xff] }
 0x1da   :  { %4974 = vmatprep.subr.bf16.mxu0 %v4973_v22  ;;  %2690 = vmatmul.mubr.f32.gmra.mrb[28].mxu1 %v5939_v41  ;;  %v5947_v22 = vld [vmem:[#allocation2 + $0x100] sm:$0xff]  ;;  %v5115_v30 = vpack.c.bf16 %v577_v13, %v567_v11  ;;  %v4997_v13 = vpack.c.bf16 %v1276_v0, %v1266_v63 }
 0x1db   :  { %2493 = vmatprep.mubr.f32.mxu0 %v5940_v50  ;;  %2695 = vmatprep.mubr.f32.mxu1 %v5941_v47  ;;  %v5952_v50 = vld [vmem:[#allocation2 + $0x38] sm:$0xff]  ;;  %v637_v11 = vld [vmem:[#allocation5 + $0x1020] sm:$0xff] }
 0x1dc   :  { %5104 = vmatpush1.bf16.msra.mxu1 %v5103_v16  ;;  %2494 = vmatmul.mubr.f32.gmra.mrb[18].mxu0 %v5942_v49  ;;  %v5950_v16 = vld [vmem:[#allocation2 + $0x160] sm:$0xff]  ;;  %v5119_v49 = vpack.c.bf16 %v597_v37, %v587_v35  ;;  %v678_v35 = vld [vmem:[#allocation5 + $0x1168] sm:$0xff] }
 0x1dd   :  { %4976 = vmatpush1.bf16.msra.mxu0 %v4975_v32  ;;  %5106 = vmatprep.subr.bf16.mxu1 %v5105_v33  ;;  %v4987_v32 = vpack.c.bf16 %v1215_v15, %v1205_v9  ;;  %v5117_v33 = vpack.c.bf16 %v598_v21, %v588_v18  ;;  %v627_v9 = vld [vmem:[#allocation5 + $0xfd0] sm:$0xff]  ;;  %v648_v15 = vld [vmem:[#allocation5 + $0x1078] sm:$0xff]  ;;  %v658_v18 = vld [vmem:[#allocation5 + $0x10c8] sm:$0xff] }
 0x1de   :  { %4978 = vmatprep.subr.bf16.mxu0 %v4977_v43  ;;  %2696 = vmatmul.mubr.f32.gmra.mrb[30].mxu1 %v5943_v2  ;;  %v4989_v43 = vpack.c.bf16 %v1236_v25, %v1226_v24  ;;  %v638_v2 = vld [vmem:[#allocation5 + $0x1028] sm:$0xff]  ;;  %v5127_v24 = vpack.c.bf16 %v637_v11, %v627_v9  ;;  %v697_v63 = vld [vmem:[#allocation5 + $0x1200] sm:$0xff] }
 0x1df   :  { %2499 = vmatprep.mubr.f32.mxu0 %v5944_v3  ;;  %2701 = vmatprep.mubr.f32.mxu1 %v5945_v4  ;;  %v1286_v21 = vld [vmem:[#allocation5 + $0x2468] sm:$0xff]  ;;  %v1345_v11 = vld [vmem:[#allocation5 + $0x2640] sm:$0xff] }
 0x1e0   :  { %5108 = vmatpush1.bf16.msra.mxu1 %v5107_v48  ;;  %2500 = vmatmul.mubr.f32.gmra.mrb[20].mxu0 %v5946_v6  ;;  %v4995_v6 = vpack.c.bf16 %v1255_v57, %v1245_v55  ;;  %v1306_v37 = vld [vmem:[#allocation5 + $0x2508] sm:$0xff]  ;;  %v1336_v55 = vld [vmem:[#allocation5 + $0x25f8] sm:$0xff] }
 0x1e1   :  { %4980 = vmatpush1.bf16.msra.mxu0 %v4979_v61  ;;  %5110 = vmatprep.subr.bf16.mxu1 %v5109_v52  ;;  %v4991_v52 = vpack.c.bf16 %v1235_v38, %v1225_v34  ;;  %v668_v34 = vld [vmem:[#allocation5 + $0x1118] sm:$0xff] }
 0x1e2   :  { %4982 = vmatprep.subr.bf16.mxu0 %v4981_v58  ;;  %2702 = vmatmul.mubr.f32.gmra.mrb[32].mxu1 %v5947_v22  ;;  %v617_v58 = vld [vmem:[#allocation5 + $0xf80] sm:$0xff]  ;;  %v1296_v22 = vld [vmem:[#allocation5 + $0x24b8] sm:$0xff] }
 0x1e3   :  { %v1770_v23 = vpop.f32.mrb[0].mxu0  ;;  %2505 = vmatprep.mubr.f32.mxu0 %v5948_v27  ;;  %2707 = vmatprep.mubr.f32.mxu1 %v5949_v26  ;;  %v5123_v4 = vpack.c.bf16 %v617_v58, %v607_v56  ;;  %v5129_v26 = vpack.c.bf16 %v658_v18, %v648_v15  ;;  %v1355_v18 = vld [vmem:[#allocation5 + $0x2690] sm:$0xff] }
 0x1e4   :  { %v6292_v28 = vadd.f32 %v1770_v23, %v6267_v8  ;;  %v1772_v29 = vpop.f32.mrb[1].mxu0  ;;  %5112 = vmatpush1.bf16.msra.mxu1 %v5111_v5  ;;  %2506 = vmatmul.mubr.f32.gmra.mrb[22].mxu0 %v5950_v16  ;;  %v608_v8 = vld [vmem:[#allocation5 + $0xf38] sm:$0xff]  ;;  %v657_v16 = vld [vmem:[#allocation5 + $0x10c0] sm:$0xff] }
 0x1e5   :  { %v6295_v31 = vadd.f32 %v1772_v29, %v6269_v20  ;;  %4984 = vmatpush1.bf16.msra.mxu0 %v4983_v7  ;;  %5114 = vmatprep.subr.bf16.mxu1 %v5113_v10  ;;  %v5953_v20 = vld [vmem:[#allocation2 + $0x18] sm:$0xff]  ;;  %v5121_v54 = vpack.c.bf16 %v618_v39, %v608_v8  ;;  %v5125_v7 = vpack.c.bf16 %v638_v2, %v628_v62  ;;  %v1265_v10 = vld [vmem:[#allocation5 + $0x23c0] sm:$0xff] }
 0x1e6   :  { %4986 = vmatprep.subr.bf16.mxu0 %v4985_v14  ;;  %2708 = vmatmul.mubr.f32.gmra.mrb[34].mxu1 %v5951_v40  ;;  %v1275_v14 = vld [vmem:[#allocation5 + $0x2410] sm:$0xff]  ;;  %v1285_v29 = vld [vmem:[#allocation5 + $0x2460] sm:$0xff] }
 0x1e7   :  { %v1776_v41 = vpop.f32.mrb[2].mxu0  ;;  %2576 = vmatprep.mubr.f32.mxu0 %v5952_v50  ;;  %2778 = vmatprep.mubr.f32.mxu1 %v5953_v20  ;;  %v4999_v27 = vpack.c.bf16 %v1275_v14, %v1265_v10  ;;  %v677_v50 = vld [vmem:[#allocation5 + $0x1160] sm:$0xff] }
 0x1e8   :  { %v6298_v47 = vadd.f32 %v1776_v41, %v6271_v46  ;;  %v1778_v48 = vpop.f32.mrb[3].mxu0  ;;  %5116 = vmatpush1.bf16.msra.mxu1 %v5115_v30  ;;  %v647_v30 = vld [vmem:[#allocation5 + $0x1070] sm:$0xff]  ;;  %v5133_v41 = vpack.c.bf16 %v678_v35, %v668_v34  ;;  %v5135_v58 = vpack.c.bf16 %v677_v50, %v667_v44  ;;  %v1325_v2 = vld [vmem:[#allocation5 + $0x25a0] sm:$0xff]  ;;  %v748_v34 = vld [vmem:[#allocation5 + $0x1398] sm:$0xff] }
 0x1e9   :  { %v6301_v61 = vadd.f32 %v1778_v48, %v6273_v51  ;;  %4988 = vmatpush1.bf16.msra.mxu0 %v4987_v32  ;;  %5118 = vmatprep.subr.bf16.mxu1 %v5117_v33  ;;  %v5001_v32 = vpack.c.bf16 %v1296_v22, %v1286_v21  ;;  %v1295_v33 = vld [vmem:[#allocation5 + $0x24b0] sm:$0xff]  ;;  %v5131_v8 = vpack.c.bf16 %v657_v16, %v647_v30  ;;  %v717_v14 = vld [vmem:[#allocation5 + $0x12a0] sm:$0xff]  ;;  %v738_v21 = vld [vmem:[#allocation5 + $0x1348] sm:$0xff] }
 0x1ea   :  { %4990 = vmatprep.subr.bf16.mxu0 %v4989_v43  ;;  %v1316_v43 = vld [vmem:[#allocation5 + $0x2558] sm:$0xff]  ;;  %v5003_v40 = vpack.c.bf16 %v1295_v33, %v1285_v29  ;;  %v1315_v48 = vld [vmem:[#allocation5 + $0x2550] sm:$0xff]  ;;  %v1366_v22 = vld [vmem:[#allocation5 + $0x26e8] sm:$0xff] }
 0x1eb   :  { %v1782_v46 = vpop.f32.mrb[4].mxu0  ;;  %v5005_v20 = vpack.c.bf16 %v1316_v43, %v1306_v37  ;;  %v5007_v57 = vpack.c.bf16 %v1315_v48, %v1305_v42  ;;  %v1365_v29 = vld [vmem:[#allocation5 + $0x26e0] sm:$0xff]  ;;  %v727_v30 = vld [vmem:[#allocation5 + $0x12f0] sm:$0xff]  ;;  %v758_v35 = vld [vmem:[#allocation5 + $0x13e8] sm:$0xff] }
 0x1ec   :  { %v6304_v3 = vadd.f32 %v1782_v46, %v6275_v60  ;;  %v1784_v51 = vpop.f32.mrb[5].mxu0  ;;  %5120 = vmatpush1.bf16.msra.mxu1 %v5119_v49  ;;  %v688_v49 = vld [vmem:[#allocation5 + $0x11b8] sm:$0xff]  ;;  %v687_v46 = vld [vmem:[#allocation5 + $0x11b0] sm:$0xff]  ;;  %v737_v16 = vld [vmem:[#allocation5 + $0x1340] sm:$0xff] }
 0x1ed   :  { %v6307_v5 = vadd.f32 %v1784_v51, %v6277_v1  ;;  %4992 = vmatpush1.bf16.msra.mxu0 %v4991_v52  ;;  %5122 = vmatprep.subr.bf16.mxu1 %v5121_v54  ;;  %v698_v52 = vld [vmem:[#allocation5 + $0x1208] sm:$0xff]  ;;  %v1335_v51 = vld [vmem:[#allocation5 + $0x25f0] sm:$0xff]  ;;  %v5139_v10 = vpack.c.bf16 %v697_v63, %v687_v46  ;;  %v1396_v37 = vld [vmem:[#allocation5 + $0x27d8] sm:$0xff]  ;;  %v5147_v43 = vpack.c.bf16 %v737_v16, %v727_v30 }
 0x1ee   :  { %4994 = vmatprep.subr.bf16.mxu0 %v4993_v59  ;;  %v1326_v54 = vld [vmem:[#allocation5 + $0x25a8] sm:$0xff]  ;;  %v5137_v62 = vpack.c.bf16 %v698_v52, %v688_v49  ;;  %v1375_v33 = vld [vmem:[#allocation5 + $0x2730] sm:$0xff]  ;;  %v757_v42 = vld [vmem:[#allocation5 + $0x13e0] sm:$0xff] }
 0x1ef   :  { %v1788_v60 = vpop.f32.mrb[6].mxu0  ;;  %v5009_v0 = vpack.c.bf16 %v1336_v55, %v1326_v54  ;;  %v1395_v50 = vld [vmem:[#allocation5 + $0x27d0] sm:$0xff]  ;;  %v778_v48 = vld [vmem:[#allocation5 + $0x1488] sm:$0xff]  ;;  %v140_v52 = vld [vmem:[#allocation5 + $0x98] sm:$0xff] }
 0x1f0   :  { %v6310_v23 = vadd.f32 %v1788_v60, %v6279_v12  ;;  %v1790_v1 = vpop.f32.mrb[7].mxu0  ;;  %5124 = vmatpush1.bf16.msra.mxu1 %v5123_v4  ;;  %v708_v4 = vld [vmem:[#allocation5 + $0x1258] sm:$0xff]  ;;  %v130_v49 = vld [vmem:[#allocation5 + $0x48] sm:$0xff]  ;;  %v169_v16 = vld [vmem:[#allocation5 + $0x180] sm:$0xff] }
 0x1f1   :  { %v6313_v25 = vadd.f32 %v1790_v1, %v6281_v19  ;;  %4996 = vmatpush1.bf16.msra.mxu0 %v4995_v6  ;;  %5126 = vmatprep.subr.bf16.mxu1 %v5125_v7  ;;  %v718_v6 = vld [vmem:[#allocation5 + $0x12a8] sm:$0xff]  ;;  %v1356_v7 = vld [vmem:[#allocation5 + $0x2698] sm:$0xff] }
 0x1f2   :  { %4998 = vmatprep.subr.bf16.mxu0 %v4997_v13  ;;  %v5141_v9 = vpack.c.bf16 %v718_v6, %v708_v4  ;;  %v707_v13 = vld [vmem:[#allocation5 + $0x1250] sm:$0xff]  ;;  %v728_v60 = vld [vmem:[#allocation5 + $0x12f8] sm:$0xff]  ;;  %v798_v63 = vld [vmem:[#allocation5 + $0x1528] sm:$0xff] }
 0x1f3   :  { %v1794_v12 = vpop.f32.mrb[8].mxu0  ;;  %v1376_v1 = vld [vmem:[#allocation5 + $0x2738] sm:$0xff] }
 0x1f4   :  { %v6316_v38 = vadd.f32 %v1794_v12, %v6283_v36  ;;  %v1796_v19 = vpop.f32.mrb[9].mxu0  ;;  %5128 = vmatpush1.bf16.msra.mxu1 %v5127_v24  ;;  %v5143_v24 = vpack.c.bf16 %v717_v14, %v707_v13  ;;  %v1386_v12 = vld [vmem:[#allocation5 + $0x2788] sm:$0xff]  ;;  %v788_v46 = vld [vmem:[#allocation5 + $0x14d8] sm:$0xff]  ;;  %v5954_v14 = vld [vmem:[#allocation2 + $0x10] sm:$0xff] }
 0x1f5   :  { %v6319_v39 = vadd.f32 %v1796_v19, %v6285_v17  ;;  %5000 = vmatpush1.bf16.msra.mxu0 %v4999_v27  ;;  %5130 = vmatprep.subr.bf16.mxu1 %v5129_v26  ;;  %v5015_v27 = vpack.c.bf16 %v1355_v18, %v1345_v11  ;;  %v5145_v26 = vpack.c.bf16 %v738_v21, %v728_v60  ;;  %v159_v11 = vld [vmem:[#allocation5 + $0x130] sm:$0xff]  ;;  %v808_v13 = vld [vmem:[#allocation5 + $0x1578] sm:$0xff]  ;;  %v170_v18 = vld [vmem:[#allocation5 + $0x188] sm:$0xff] }
 0x1f6   :  { %5002 = vmatprep.subr.bf16.mxu0 %v5001_v32  ;;  %v5017_v32 = vpack.c.bf16 %v1376_v1, %v1366_v22  ;;  %v5019_v19 = vpack.c.bf16 %v1375_v33, %v1365_v29  ;;  %v5021_v44 = vpack.c.bf16 %v1396_v37, %v1386_v12  ;;  %v180_v60 = vld [vmem:[#allocation5 + $0x1d8] sm:$0xff]  ;;  %v5955_v21 = vld [vmem:[#allocation2 + $0x30] sm:$0xff] }
 0x1f7   :  { %v1800_v36 = vpop.f32.mrb[10].mxu0  ;;  %v5956_v1 = vld [vmem:[#allocation2 + $0x78] sm:$0xff]  ;;  %v5289_v30 = vpack.c.bf16 %v180_v60, %v170_v18  ;;  %v877_v18 = vld [vmem:[#allocation5 + $0x17a0] sm:$0xff] }
 0x1f8   :  { %v6322_v56 = vadd.f32 %v1800_v36, %v6287_v53  ;;  %v1802_v17 = vpop.f32.mrb[11].mxu0  ;;  %5132 = vmatpush1.bf16.msra.mxu1 %v5131_v8  ;;  %v1346_v53 = vld [vmem:[#allocation5 + $0x2648] sm:$0xff]  ;;  %v5149_v8 = vpack.c.bf16 %v758_v35, %v748_v34  ;;  %v828_v33 = vld [vmem:[#allocation5 + $0x1618] sm:$0xff]  ;;  %v229_v60 = vld [vmem:[#allocation5 + $0x360] sm:$0xff] }
 0x1f9   :  { %v6325_v59 = vadd.f32 %v1802_v17, %v6289_v45  ;;  %5004 = vmatpush1.bf16.msra.mxu0 %v5003_v40  ;;  %5134 = vmatprep.subr.bf16.mxu1 %v5133_v41  ;;  %v5011_v45 = vpack.c.bf16 %v1335_v51, %v1325_v2  ;;  %v5013_v15 = vpack.c.bf16 %v1356_v7, %v1346_v53  ;;  %v1385_v40 = vld [vmem:[#allocation5 + $0x2780] sm:$0xff]  ;;  %v747_v41 = vld [vmem:[#allocation5 + $0x1390] sm:$0xff]  ;;  %v160_v51 = vld [vmem:[#allocation5 + $0x138] sm:$0xff] }
 0x1fa   :  { %5006 = vmatprep.subr.bf16.mxu0 %v5005_v20  ;;  %v768_v20 = vld [vmem:[#allocation5 + $0x1438] sm:$0xff]  ;;  %v5151_v36 = vpack.c.bf16 %v757_v42, %v747_v41  ;;  %v5023_v54 = vpack.c.bf16 %v1395_v50, %v1385_v40  ;;  %v767_v17 = vld [vmem:[#allocation5 + $0x1430] sm:$0xff]  ;;  %v797_v7 = vld [vmem:[#allocation5 + $0x1520] sm:$0xff] }
 0x1fb   :  { %6609 = vst [vmem:[#allocation15_spill] sm:$0xff] %v6325_v59  ;;  %v5153_v55 = vpack.c.bf16 %v778_v48, %v768_v20  ;;  %v139_v2 = vld [vmem:[#allocation5 + $0x90] sm:$0xff]  ;;  %v838_v34 = vld [vmem:[#allocation5 + $0x1668] sm:$0xff]  ;;  %v200_v12 = vld [vmem:[#allocation5 + $0x278] sm:$0xff] }
 0x1fc   :  { %5136 = vmatpush1.bf16.msra.mxu1 %v5135_v58  ;;  %v777_v58 = vld [vmem:[#allocation5 + $0x1480] sm:$0xff]  ;;  %v787_v53 = vld [vmem:[#allocation5 + $0x14d0] sm:$0xff]  ;;  %v190_v35 = vld [vmem:[#allocation5 + $0x228] sm:$0xff] }
 0x1fd   :  { %5008 = vmatpush1.bf16.msra.mxu0 %v5007_v57  ;;  %5138 = vmatprep.subr.bf16.mxu1 %v5137_v62  ;;  %v5281_v57 = vpack.c.bf16 %v140_v52, %v130_v49  ;;  %v129_v62 = vld [vmem:[#allocation5 + $0x40] sm:$0xff]  ;;  %v5155_v4 = vpack.c.bf16 %v777_v58, %v767_v17  ;;  %v5159_v22 = vpack.c.bf16 %v797_v7, %v787_v53  ;;  %v5957_v37 = vld [vmem:[#allocation2 + $0x58] sm:$0xff]  ;;  %v827_v41 = vld [vmem:[#allocation5 + $0x1610] sm:$0xff] }
 0x1fe   :  { %5010 = vmatprep.subr.bf16.mxu0 %v5009_v0  ;;  %v150_v0 = vld [vmem:[#allocation5 + $0xe8] sm:$0xff]  ;;  %v5283_v6 = vpack.c.bf16 %v139_v2, %v129_v62  ;;  %v837_v42 = vld [vmem:[#allocation5 + $0x1660] sm:$0xff]  ;;  %v5293_v50 = vpack.c.bf16 %v200_v12, %v190_v35  ;;  %v199_v48 = vld [vmem:[#allocation5 + $0x270] sm:$0xff] }
 0x1ff   :  { %v189_v20 = vld [vmem:[#allocation5 + $0x220] sm:$0xff]  ;;  %v848_v49 = vld [vmem:[#allocation5 + $0x16b8] sm:$0xff]  ;;  %v858_v52 = vld [vmem:[#allocation5 + $0x1708] sm:$0xff]  ;;  %v5167_v58 = vpack.c.bf16 %v837_v42, %v827_v41 }
 0x200   :  { %5140 = vmatpush1.bf16.msra.mxu1 %v5139_v10  ;;  %v5157_v10 = vpack.c.bf16 %v798_v63, %v788_v46  ;;  %v5961_v17 = vld [vmem:[#allocation2 + $0xb0] sm:$0xff]  ;;  %v5295_v62 = vpack.c.bf16 %v199_v48, %v189_v20  ;;  %v857_v46 = vld [vmem:[#allocation5 + $0x1700] sm:$0xff]  ;;  %v5169_v63 = vpack.c.bf16 %v858_v52, %v848_v49  ;;  %v878_v53 = vld [vmem:[#allocation5 + $0x17a8] sm:$0xff] }
 0x201   :  { %5012 = vmatpush1.bf16.msra.mxu0 %v5011_v45  ;;  %5142 = vmatprep.subr.bf16.mxu1 %v5141_v9  ;;  %v5285_v45 = vpack.c.bf16 %v160_v51, %v150_v0  ;;  %v149_v9 = vld [vmem:[#allocation5 + $0xe0] sm:$0xff]  ;;  %v847_v2 = vld [vmem:[#allocation5 + $0x16b0] sm:$0xff]  ;;  %v230_v7 = vld [vmem:[#allocation5 + $0x368] sm:$0xff] }
 0x202   :  { %5014 = vmatprep.subr.bf16.mxu0 %v5013_v15  ;;  %v818_v15 = vld [vmem:[#allocation5 + $0x15c8] sm:$0xff]  ;;  %v209_v51 = vld [vmem:[#allocation5 + $0x2c0] sm:$0xff]  ;;  %v887_v12 = vld [vmem:[#allocation5 + $0x17f0] sm:$0xff] }
 0x203   :  { %v5161_v29 = vpack.c.bf16 %v818_v15, %v808_v13  ;;  %v5965_v13 = vld [vmem:[#allocation2 + $0x138] sm:$0xff]  ;;  %v867_v15 = vld [vmem:[#allocation5 + $0x1750] sm:$0xff]  ;;  %v918_v41 = vld [vmem:[#allocation5 + $0x18e8] sm:$0xff] }
 0x204   :  { %5144 = vmatpush1.bf16.msra.mxu1 %v5143_v24  ;;  %v5287_v24 = vpack.c.bf16 %v159_v11, %v149_v9  ;;  %v5964_v9 = vld [vmem:[#allocation2 + $0xf0] sm:$0xff]  ;;  %v5171_v11 = vpack.c.bf16 %v857_v46, %v847_v2  ;;  %v270_v42 = vld [vmem:[#allocation5 + $0x4a8] sm:$0xff] }
 0x205   :  { %5016 = vmatpush1.bf16.msra.mxu0 %v5015_v27  ;;  %5146 = vmatprep.subr.bf16.mxu1 %v5145_v26  ;;  %v807_v27 = vld [vmem:[#allocation5 + $0x1570] sm:$0xff]  ;;  %v817_v26 = vld [vmem:[#allocation5 + $0x15c0] sm:$0xff]  ;;  %v290_v46 = vld [vmem:[#allocation5 + $0x548] sm:$0xff] }
 0x206   :  { %5018 = vmatprep.subr.bf16.mxu0 %v5017_v32  ;;  %v179_v32 = vld [vmem:[#allocation5 + $0x1d0] sm:$0xff]  ;;  %v930_v59 = vld [vmem:[#allocation5 + $0x1948] sm:$0xff] }
 0x207   :  { %v5291_v40 = vpack.c.bf16 %v179_v32, %v169_v16  ;;  %v5967_v16 = vld [vmem:[#allocation2 + $0x130] sm:$0xff]  ;;  %v5175_v32 = vpack.c.bf16 %v877_v18, %v867_v15  ;;  %v310_v18 = vld [vmem:[#allocation5 + $0x5e8] sm:$0xff] }
 0x208   :  { %5148 = vmatpush1.bf16.msra.mxu1 %v5147_v43  ;;  %v5958_v43 = vld [vmem:[#allocation2 + $0x70] sm:$0xff] }
 0x209   :  { %5020 = vmatpush1.bf16.msra.mxu0 %v5019_v19  ;;  %5150 = vmatprep.subr.bf16.mxu1 %v5149_v8  ;;  %v5163_v19 = vpack.c.bf16 %v817_v26, %v807_v27  ;;  %v5959_v8 = vld [vmem:[#allocation2 + $0xb8] sm:$0xff]  ;;  %v898_v27 = vld [vmem:[#allocation5 + $0x1848] sm:$0xff]  ;;  %v5970_v20 = vld [vmem:[#allocation2 + $0x170] sm:$0xff] }
 0x20a   :  { %5022 = vmatprep.subr.bf16.mxu0 %v5021_v44  ;;  %v5165_v44 = vpack.c.bf16 %v838_v34, %v828_v33  ;;  %v250_v26 = vld [vmem:[#allocation5 + $0x408] sm:$0xff]  ;;  %v5968_v33 = vld [vmem:[#allocation2 + $0x178] sm:$0xff]  ;;  %v6333_v2 = vld [vmem:[#allocation2 + $0xd0] sm:$0xff] }
 0x20b   :  { %v6339_v15 = vld [vmem:[#allocation2 + $0x110] sm:$0xff] }
 0x20c   :  { %5152 = vmatpush1.bf16.msra.mxu1 %v5151_v36  ;;  %v210_v36 = vld [vmem:[#allocation5 + $0x2c8] sm:$0xff] }
 0x20d   :  { %5024 = vmatpush1.bf16.msra.mxu0 %v5023_v54  ;;  %5154 = vmatprep.subr.bf16.mxu1 %v5153_v55  ;;  %v220_v54 = vld [vmem:[#allocation5 + $0x318] sm:$0xff]  ;;  %v5960_v55 = vld [vmem:[#allocation2 + $0x50] sm:$0xff] }
 0x20e   :  { %5282 = vmatprep.subr.bf16.mxu0 %v5281_v57  ;;  %v5962_v57 = vld [vmem:[#allocation2 + $0xf8] sm:$0xff]  ;;  %v5297_v0 = vpack.c.bf16 %v220_v54, %v210_v36  ;;  %v907_v36 = vld [vmem:[#allocation5 + $0x1890] sm:$0xff]  ;;  %v917_v54 = vld [vmem:[#allocation5 + $0x18e0] sm:$0xff] }
 0x20f   :  { %2779 = vmatmul.mubr.f32.vlgmr.msra.gmra.mrb[24].mxu1 %v5954_v14 }
 0x210   :  { %2577 = vmatmul.mubr.f32.vlgmr.msra.gmra.mrb[12].mxu0 %v5955_v21  ;;  %5156 = vmatpush1.bf16.msra.mxu1 %v5155_v4  ;;  %v219_v4 = vld [vmem:[#allocation5 + $0x310] sm:$0xff] }
 0x211   :  { %5284 = vmatpush1.bf16.msra.mxu0 %v5283_v6  ;;  %2582 = vmatprep.mubr.f32.mxu0 %v5956_v1  ;;  %v868_v6 = vld [vmem:[#allocation5 + $0x1758] sm:$0xff]  ;;  %v5299_v14 = vpack.c.bf16 %v219_v4, %v209_v51  ;;  %v239_v1 = vld [vmem:[#allocation5 + $0x3b0] sm:$0xff]  ;;  %v5973_v51 = vld [vmem:[#allocation2 + $0x8] sm:$0xff]  ;;  %v5183_v4 = vpack.c.bf16 %v917_v54, %v907_v36 }
 0x212   :  { %5158 = vmatprep.subr.bf16.mxu1 %v5157_v10  ;;  %5286 = vmatprep.subr.bf16.mxu0 %v5285_v45  ;;  %v240_v10 = vld [vmem:[#allocation5 + $0x3b8] sm:$0xff]  ;;  %v5173_v21 = vpack.c.bf16 %v878_v53, %v868_v6  ;;  %v5303_v34 = vpack.c.bf16 %v239_v1, %v229_v60  ;;  %v350_v36 = vld [vmem:[#allocation5 + $0x728] sm:$0xff] }
 0x213   :  { %2784 = vmatprep.mubr.f32.mxu1 %v5957_v37  ;;  %v5963_v45 = vld [vmem:[#allocation2 + $0x98] sm:$0xff]  ;;  %v897_v37 = vld [vmem:[#allocation5 + $0x1840] sm:$0xff] }
 0x214   :  { %2583 = vmatmul.mubr.f32.gmra.mrb[14].mxu0 %v5958_v43  ;;  %5160 = vmatpush1.bf16.msra.mxu1 %v5159_v22  ;;  %v5301_v22 = vpack.c.bf16 %v240_v10, %v230_v7  ;;  %v249_v43 = vld [vmem:[#allocation5 + $0x400] sm:$0xff]  ;;  %v5179_v48 = vpack.c.bf16 %v897_v37, %v887_v12  ;;  %v927_v7 = vld [vmem:[#allocation5 + $0x1930] sm:$0xff]  ;;  %v320_v60 = vld [vmem:[#allocation5 + $0x638] sm:$0xff] }
 0x215   :  { %5288 = vmatpush1.bf16.msra.mxu0 %v5287_v24  ;;  %2588 = vmatprep.mubr.f32.mxu0 %v5959_v8  ;;  %v888_v24 = vld [vmem:[#allocation5 + $0x17f8] sm:$0xff]  ;;  %v259_v8 = vld [vmem:[#allocation5 + $0x450] sm:$0xff]  ;;  %v937_v10 = vld [vmem:[#allocation5 + $0x1980] sm:$0xff] }
 0x216   :  { %5162 = vmatprep.subr.bf16.mxu1 %v5161_v29  ;;  %5290 = vmatprep.subr.bf16.mxu0 %v5289_v30  ;;  %v260_v29 = vld [vmem:[#allocation5 + $0x458] sm:$0xff]  ;;  %v6327_v30 = vld [vmem:[#allocation2 + $0x90] sm:$0xff]  ;;  %v5177_v35 = vpack.c.bf16 %v898_v27, %v888_v24  ;;  %v5307_v49 = vpack.c.bf16 %v259_v8, %v249_v43  ;;  %v330_v12 = vld [vmem:[#allocation5 + $0x688] sm:$0xff] }
 0x217   :  { %2785 = vmatmul.mubr.f32.gmra.mrb[26].mxu1 %v5960_v55  ;;  %v269_v55 = vld [vmem:[#allocation5 + $0x4a0] sm:$0xff]  ;;  %v947_v27 = vld [vmem:[#allocation5 + $0x19d0] sm:$0xff]  ;;  %v340_v37 = vld [vmem:[#allocation5 + $0x6d8] sm:$0xff] }
 0x218   :  { %2589 = vmatmul.mubr.f32.gmra.mrb[16].mxu0 %v5961_v17  ;;  %5164 = vmatpush1.bf16.msra.mxu1 %v5163_v19  ;;  %v5305_v19 = vpack.c.bf16 %v260_v29, %v250_v26  ;;  %v957_v26 = vld [vmem:[#allocation5 + $0x1a20] sm:$0xff]  ;;  %v6348_v43 = vld [vmem:[#allocation2 + $0x28] sm:$0xff]  ;;  %v360_v54 = vld [vmem:[#allocation5 + $0x778] sm:$0xff] }
 0x219   :  { %5292 = vmatpush1.bf16.msra.mxu0 %v5291_v40  ;;  %2594 = vmatprep.mubr.f32.mxu0 %v5962_v57  ;;  %v908_v40 = vld [vmem:[#allocation5 + $0x1898] sm:$0xff]  ;;  %v309_v29 = vld [vmem:[#allocation5 + $0x5e0] sm:$0xff] }
 0x21a   :  { %5166 = vmatprep.subr.bf16.mxu1 %v5165_v44  ;;  %5294 = vmatprep.subr.bf16.mxu0 %v5293_v50  ;;  %v280_v44 = vld [vmem:[#allocation5 + $0x4f8] sm:$0xff]  ;;  %v5181_v52 = vpack.c.bf16 %v918_v41, %v908_v40  ;;  %v967_v41 = vld [vmem:[#allocation5 + $0x1a70] sm:$0xff] }
 0x21b   :  { %2790 = vmatprep.mubr.f32.mxu1 %v5963_v45  ;;  %v6330_v50 = vld [vmem:[#allocation2 + $0xd8] sm:$0xff]  ;;  %v5309_v17 = vpack.c.bf16 %v280_v44, %v270_v42  ;;  %v289_v45 = vld [vmem:[#allocation5 + $0x540] sm:$0xff] }
 0x21c   :  { %2595 = vmatmul.mubr.f32.gmra.mrb[18].mxu0 %v5964_v9  ;;  %5168 = vmatpush1.bf16.msra.mxu1 %v5167_v58  ;;  %v279_v58 = vld [vmem:[#allocation5 + $0x4f0] sm:$0xff]  ;;  %v928_v57 = vld [vmem:[#allocation5 + $0x1938] sm:$0xff]  ;;  %v977_v42 = vld [vmem:[#allocation5 + $0x1ac0] sm:$0xff] }
 0x21d   :  { %5296 = vmatpush1.bf16.msra.mxu0 %v5295_v62  ;;  %2600 = vmatprep.mubr.f32.mxu0 %v5965_v13  ;;  %v938_v62 = vld [vmem:[#allocation5 + $0x1988] sm:$0xff]  ;;  %v5311_v6 = vpack.c.bf16 %v279_v58, %v269_v55  ;;  %v948_v13 = vld [vmem:[#allocation5 + $0x19d8] sm:$0xff]  ;;  %v329_v44 = vld [vmem:[#allocation5 + $0x680] sm:$0xff]  ;;  %v5195_v55 = vpack.c.bf16 %v977_v42, %v967_v41 }
 0x21e   :  { %5170 = vmatprep.subr.bf16.mxu1 %v5169_v63  ;;  %5298 = vmatprep.subr.bf16.mxu0 %v5297_v0  ;;  %v300_v63 = vld [vmem:[#allocation5 + $0x598] sm:$0xff]  ;;  %v5185_v53 = vpack.c.bf16 %v938_v62, %v928_v57  ;;  %v987_v57 = vld [vmem:[#allocation5 + $0x1b10] sm:$0xff]  ;;  %v997_v62 = vld [vmem:[#allocation5 + $0x1b60] sm:$0xff] }
 0x21f   :  { %2791 = vmatmul.mubr.f32.gmra.mrb[28].mxu1 %v6327_v30  ;;  %v6336_v0 = vld [vmem:[#allocation2 + $0x118] sm:$0xff]  ;;  %v5313_v9 = vpack.c.bf16 %v300_v63, %v290_v46  ;;  %v349_v46 = vld [vmem:[#allocation5 + $0x720] sm:$0xff]  ;;  %v5325_v63 = vpack.c.bf16 %v360_v54, %v350_v36  ;;  %v419_v54 = vld [vmem:[#allocation5 + $0x950] sm:$0xff] }
 0x220   :  { %2601 = vmatmul.mubr.f32.gmra.mrb[20].mxu0 %v5967_v16  ;;  %5172 = vmatpush1.bf16.msra.mxu1 %v5171_v11  ;;  %v299_v11 = vld [vmem:[#allocation5 + $0x590] sm:$0xff]  ;;  %v5317_v16 = vpack.c.bf16 %v320_v60, %v310_v18  ;;  %v420_v41 = vld [vmem:[#allocation5 + $0x958] sm:$0xff] }
 0x221   :  { %5300 = vmatpush1.bf16.msra.mxu0 %v5299_v14  ;;  %2606 = vmatprep.mubr.f32.mxu0 %v5968_v33  ;;  %v958_v14 = vld [vmem:[#allocation5 + $0x1a28] sm:$0xff]  ;;  %v5315_v1 = vpack.c.bf16 %v299_v11, %v289_v45  ;;  %v968_v33 = vld [vmem:[#allocation5 + $0x1a78] sm:$0xff]  ;;  %v1007_v11 = vld [vmem:[#allocation5 + $0x1bb0] sm:$0xff] }
 0x222   :  { %5174 = vmatprep.subr.bf16.mxu1 %v5173_v21  ;;  %5302 = vmatprep.subr.bf16.mxu0 %v5301_v22  ;;  %v6342_v21 = vld [vmem:[#allocation2 + $0x158] sm:$0xff]  ;;  %v5187_v22 = vpack.c.bf16 %v937_v10, %v927_v7  ;;  %v5189_v24 = vpack.c.bf16 %v958_v14, %v948_v13  ;;  %v5199_v10 = vpack.c.bf16 %v997_v62, %v987_v57  ;;  %v1017_v13 = vld [vmem:[#allocation5 + $0x1c00] sm:$0xff]  ;;  %v379_v60 = vld [vmem:[#allocation5 + $0x810] sm:$0xff] }
 0x223   :  { %2796 = vmatprep.mubr.f32.mxu1 %v6330_v50  ;;  %v380_v7 = vld [vmem:[#allocation5 + $0x818] sm:$0xff]  ;;  %v369_v14 = vld [vmem:[#allocation5 + $0x7c0] sm:$0xff] }
 0x224   :  { %2607 = vmatmul.mubr.f32.gmra.mrb[22].mxu0 %v5970_v20  ;;  %5176 = vmatpush1.bf16.msra.mxu1 %v5175_v32  ;;  %v319_v32 = vld [vmem:[#allocation5 + $0x630] sm:$0xff]  ;;  %v5321_v20 = vpack.c.bf16 %v340_v37, %v330_v12  ;;  %v440_v57 = vld [vmem:[#allocation5 + $0x9f8] sm:$0xff] }
 0x225   :  { %5304 = vmatpush1.bf16.msra.mxu0 %v5303_v34  ;;  %5178 = vmatprep.subr.bf16.mxu1 %v5177_v35  ;;  %v978_v34 = vld [vmem:[#allocation5 + $0x1ac8] sm:$0xff]  ;;  %v6345_v35 = vld [vmem:[#allocation2 + $0x150] sm:$0xff]  ;;  %v5319_v8 = vpack.c.bf16 %v319_v32, %v309_v29  ;;  %v5331_v29 = vpack.c.bf16 %v379_v60, %v369_v14 }
 0x226   :  { %5306 = vmatprep.subr.bf16.mxu0 %v5305_v19  ;;  %2797 = vmatmul.mubr.f32.gmra.mrb[30].mxu1 %v6333_v2  ;;  %v5191_v19 = vpack.c.bf16 %v957_v26, %v947_v27  ;;  %v5193_v40 = vpack.c.bf16 %v978_v34, %v968_v33  ;;  %v400_v27 = vld [vmem:[#allocation5 + $0x8b8] sm:$0xff]  ;;  %v5203_v26 = vpack.c.bf16 %v1017_v13, %v1007_v11  ;;  %v1027_v32 = vld [vmem:[#allocation5 + $0x1c50] sm:$0xff]  ;;  %v1037_v33 = vld [vmem:[#allocation5 + $0x1ca0] sm:$0xff] }
 0x227   :  { %2802 = vmatprep.mubr.f32.mxu1 %v6336_v0  ;;  %3081 = vmatprep.mubr.f32.mxu0 %v5973_v51  ;;  %v359_v51 = vld [vmem:[#allocation5 + $0x770] sm:$0xff]  ;;  %v389_v34 = vld [vmem:[#allocation5 + $0x860] sm:$0xff]  ;;  %v5207_v42 = vpack.c.bf16 %v1037_v33, %v1027_v32  ;;  %v460_v11 = vld [vmem:[#allocation5 + $0xa98] sm:$0xff] }
 0x228   :  { %5180 = vmatpush1.bf16.msra.mxu1 %v5179_v48  ;;  %v339_v48 = vld [vmem:[#allocation5 + $0x6d0] sm:$0xff]  ;;  %v5327_v45 = vpack.c.bf16 %v359_v51, %v349_v46  ;;  %v480_v32 = vld [vmem:[#allocation5 + $0xb38] sm:$0xff] }
 0x229   :  { %5308 = vmatpush1.bf16.msra.mxu0 %v5307_v49  ;;  %5182 = vmatprep.subr.bf16.mxu1 %v5181_v52  ;;  %v988_v49 = vld [vmem:[#allocation5 + $0x1b18] sm:$0xff]  ;;  %v998_v52 = vld [vmem:[#allocation5 + $0x1b68] sm:$0xff]  ;;  %v399_v37 = vld [vmem:[#allocation5 + $0x8b0] sm:$0xff] }
 0x22a   :  { %5310 = vmatprep.subr.bf16.mxu0 %v5309_v17  ;;  %2803 = vmatmul.mubr.f32.gmra.mrb[32].mxu1 %v6339_v15  ;;  %v5323_v17 = vpack.c.bf16 %v339_v48, %v329_v44  ;;  %v5197_v58 = vpack.c.bf16 %v998_v52, %v988_v49  ;;  %v5335_v44 = vpack.c.bf16 %v399_v37, %v389_v34  ;;  %v1047_v48 = vld [vmem:[#allocation5 + $0x1cf0] sm:$0xff]  ;;  %v1057_v49 = vld [vmem:[#allocation5 + $0x1d40] sm:$0xff] }
 0x22b   :  { %2808 = vmatprep.mubr.f32.mxu1 %v6342_v21  ;;  %v409_v52 = vld [vmem:[#allocation5 + $0x900] sm:$0xff]  ;;  %v5211_v62 = vpack.c.bf16 %v1057_v49, %v1047_v48  ;;  %v1067_v51 = vld [vmem:[#allocation5 + $0x1d90] sm:$0xff]  ;;  %v490_v48 = vld [vmem:[#allocation5 + $0xb88] sm:$0xff] }
 0x22c   :  { %5184 = vmatpush1.bf16.msra.mxu1 %v5183_v4  ;;  %v1008_v4 = vld [vmem:[#allocation5 + $0x1bb8] sm:$0xff]  ;;  %v5339_v46 = vpack.c.bf16 %v419_v54, %v409_v52  ;;  %v1087_v60 = vld [vmem:[#allocation5 + $0x1e30] sm:$0xff]  ;;  %v5979_v52 = vld [vmem:[#allocation2] sm:$0xff] }
 0x22d   :  { %5312 = vmatpush1.bf16.msra.mxu0 %v5311_v6  ;;  %5186 = vmatprep.subr.bf16.mxu1 %v5185_v53  ;;  %v1018_v6 = vld [vmem:[#allocation5 + $0x1c08] sm:$0xff]  ;;  %v1107_v37 = vld [vmem:[#allocation5 + $0x1ed0] sm:$0xff]  ;;  %v500_v49 = vld [vmem:[#allocation5 + $0xbd8] sm:$0xff] }
 0x22e   :  { %5314 = vmatprep.subr.bf16.mxu0 %v5313_v9  ;;  %2809 = vmatmul.mubr.f32.gmra.mrb[34].mxu1 %v6345_v35  ;;  %v370_v53 = vld [vmem:[#allocation5 + $0x7c8] sm:$0xff]  ;;  %v5201_v9 = vpack.c.bf16 %v1018_v6, %v1008_v4  ;;  %v1077_v4 = vld [vmem:[#allocation5 + $0x1de0] sm:$0xff] }
 0x22f   :  { %2879 = vmatprep.mubr.f32.mxu1 %v6348_v43  ;;  %v5329_v18 = vpack.c.bf16 %v380_v7, %v370_v53  ;;  %v429_v6 = vld [vmem:[#allocation5 + $0x9a0] sm:$0xff]  ;;  %v439_v7 = vld [vmem:[#allocation5 + $0x9f0] sm:$0xff]  ;;  %v5215_v13 = vpack.c.bf16 %v1077_v4, %v1067_v51  ;;  %v1158_v51 = vld [vmem:[#allocation5 + $0x2068] sm:$0xff] }
 0x230   :  { %5188 = vmatpush1.bf16.msra.mxu1 %v5187_v22  ;;  %v1028_v22 = vld [vmem:[#allocation5 + $0x1c58] sm:$0xff]  ;;  %v5343_v14 = vpack.c.bf16 %v439_v7, %v429_v6  ;;  %v6354_v4 = vld [vmem:[#allocation2 + $0x68] sm:$0xff]  ;;  %v6357_v7 = vld [vmem:[#allocation2 + $0x60] sm:$0xff] }
 0x231   :  { %5316 = vmatpush1.bf16.msra.mxu0 %v5315_v1  ;;  %5190 = vmatprep.subr.bf16.mxu1 %v5189_v24  ;;  %v1038_v1 = vld [vmem:[#allocation5 + $0x1ca8] sm:$0xff] }
 0x232   :  { %5318 = vmatprep.subr.bf16.mxu0 %v5317_v16  ;;  %v390_v24 = vld [vmem:[#allocation5 + $0x868] sm:$0xff]  ;;  %v5205_v16 = vpack.c.bf16 %v1038_v1, %v1028_v22  ;;  %v1097_v22 = vld [vmem:[#allocation5 + $0x1e80] sm:$0xff] }
 0x233   :  { %v5333_v12 = vpack.c.bf16 %v400_v27, %v390_v24  ;;  %v449_v1 = vld [vmem:[#allocation5 + $0xa40] sm:$0xff]  ;;  %v459_v27 = vld [vmem:[#allocation5 + $0xa90] sm:$0xff]  ;;  %v5219_v33 = vpack.c.bf16 %v1097_v22, %v1087_v60  ;;  %v510_v6 = vld [vmem:[#allocation5 + $0xc28] sm:$0xff] }
 0x234   :  { %5192 = vmatpush1.bf16.msra.mxu1 %v5191_v19  ;;  %v1048_v19 = vld [vmem:[#allocation5 + $0x1cf8] sm:$0xff]  ;;  %v5347_v34 = vpack.c.bf16 %v459_v27, %v449_v1  ;;  %v509_v60 = vld [vmem:[#allocation5 + $0xc20] sm:$0xff]  ;;  %v519_v1 = vld [vmem:[#allocation5 + $0xc70] sm:$0xff] }
 0x235   :  { %5320 = vmatpush1.bf16.msra.mxu0 %v5319_v8  ;;  %5194 = vmatprep.subr.bf16.mxu1 %v5193_v40  ;;  %v1058_v8 = vld [vmem:[#allocation5 + $0x1d48] sm:$0xff] }
 0x236   :  { %5322 = vmatprep.subr.bf16.mxu0 %v5321_v20  ;;  %v410_v40 = vld [vmem:[#allocation5 + $0x908] sm:$0xff]  ;;  %v5209_v20 = vpack.c.bf16 %v1058_v8, %v1048_v19  ;;  %v1117_v19 = vld [vmem:[#allocation5 + $0x1f20] sm:$0xff] }
 0x237   :  { %v5337_v36 = vpack.c.bf16 %v420_v41, %v410_v40  ;;  %v469_v8 = vld [vmem:[#allocation5 + $0xae0] sm:$0xff]  ;;  %v479_v41 = vld [vmem:[#allocation5 + $0xb30] sm:$0xff]  ;;  %v1178_v27 = vld [vmem:[#allocation5 + $0x2108] sm:$0xff] }
 0x238   :  { %5196 = vmatpush1.bf16.msra.mxu1 %v5195_v55  ;;  %v1068_v55 = vld [vmem:[#allocation5 + $0x1d98] sm:$0xff]  ;;  %v5351_v54 = vpack.c.bf16 %v479_v41, %v469_v8  ;;  %v1167_v8 = vld [vmem:[#allocation5 + $0x20b0] sm:$0xff]  ;;  %v529_v41 = vld [vmem:[#allocation5 + $0xcc0] sm:$0xff] }
 0x239   :  { %5324 = vmatpush1.bf16.msra.mxu0 %v5323_v17  ;;  %5198 = vmatprep.subr.bf16.mxu1 %v5197_v58  ;;  %v1078_v17 = vld [vmem:[#allocation5 + $0x1de8] sm:$0xff] }
 0x23a   :  { %5326 = vmatprep.subr.bf16.mxu0 %v5325_v63  ;;  %v430_v58 = vld [vmem:[#allocation5 + $0x9a8] sm:$0xff]  ;;  %v5213_v63 = vpack.c.bf16 %v1078_v17, %v1068_v55  ;;  %v1127_v17 = vld [vmem:[#allocation5 + $0x1f70] sm:$0xff] }
 0x23b   :  { %v5341_v53 = vpack.c.bf16 %v440_v57, %v430_v58  ;;  %v1137_v58 = vld [vmem:[#allocation5 + $0x1fc0] sm:$0xff] }
 0x23c   :  { %5200 = vmatpush1.bf16.msra.mxu1 %v5199_v10  ;;  %v1088_v10 = vld [vmem:[#allocation5 + $0x1e38] sm:$0xff]  ;;  %v489_v57 = vld [vmem:[#allocation5 + $0xb80] sm:$0xff] }
 0x23d   :  { %5328 = vmatpush1.bf16.msra.mxu0 %v5327_v45  ;;  %5202 = vmatprep.subr.bf16.mxu1 %v5201_v9  ;;  %v1098_v45 = vld [vmem:[#allocation5 + $0x1e88] sm:$0xff] }
 0x23e   :  { %5330 = vmatprep.subr.bf16.mxu0 %v5329_v18  ;;  %v450_v9 = vld [vmem:[#allocation5 + $0xa48] sm:$0xff]  ;;  %v5217_v18 = vpack.c.bf16 %v1098_v45, %v1088_v10  ;;  %v5227_v45 = vpack.c.bf16 %v1137_v58, %v1127_v17 }
 0x23f   :  { %v5345_v24 = vpack.c.bf16 %v460_v11, %v450_v9  ;;  %v5982_v10 = vld [vmem:[#allocation2 + $0x48] sm:$0xff]  ;;  %v5983_v9 = vld [vmem:[#allocation2 + $0x40] sm:$0xff] }
 0x240   :  { %5204 = vmatpush1.bf16.msra.mxu1 %v5203_v26  ;;  %v1108_v26 = vld [vmem:[#allocation5 + $0x1ed8] sm:$0xff]  ;;  %v5990_v17 = vld [vmem:[#allocation2 + $0xc8] sm:$0xff] }
 0x241   :  { %5332 = vmatpush1.bf16.msra.mxu0 %v5331_v29  ;;  %5206 = vmatprep.subr.bf16.mxu1 %v5205_v16  ;;  %v1118_v29 = vld [vmem:[#allocation5 + $0x1f28] sm:$0xff] }
 0x242   :  { %5334 = vmatprep.subr.bf16.mxu0 %v5333_v12  ;;  %v470_v16 = vld [vmem:[#allocation5 + $0xae8] sm:$0xff]  ;;  %v5221_v12 = vpack.c.bf16 %v1118_v29, %v1108_v26 }
 0x243   :  { %v5349_v40 = vpack.c.bf16 %v480_v32, %v470_v16  ;;  %v6360_v26 = vld [vmem:[#allocation2 + $0xa8] sm:$0xff]  ;;  %v540_v16 = vld [vmem:[#allocation5 + $0xd18] sm:$0xff]  ;;  %v6363_v32 = vld [vmem:[#allocation2 + $0xa0] sm:$0xff] }
 0x244   :  { %5208 = vmatpush1.bf16.msra.mxu1 %v5207_v42  ;;  %v1128_v42 = vld [vmem:[#allocation5 + $0x1f78] sm:$0xff]  ;;  %v530_v29 = vld [vmem:[#allocation5 + $0xcc8] sm:$0xff] }
 0x245   :  { %5336 = vmatpush1.bf16.msra.mxu0 %v5335_v44  ;;  %5210 = vmatprep.subr.bf16.mxu1 %v5209_v20  ;;  %v1138_v44 = vld [vmem:[#allocation5 + $0x1fc8] sm:$0xff]  ;;  %v6351_v20 = vld [vmem:[#allocation2 + $0x20] sm:$0xff] }
 0x246   :  { %5338 = vmatprep.subr.bf16.mxu0 %v5337_v36  ;;  %v5223_v36 = vpack.c.bf16 %v1117_v19, %v1107_v37  ;;  %v5225_v55 = vpack.c.bf16 %v1138_v44, %v1128_v42  ;;  %v5359_v37 = vpack.c.bf16 %v519_v1, %v509_v60  ;;  %v5361_v42 = vpack.c.bf16 %v540_v16, %v530_v29  ;;  %v539_v44 = vld [vmem:[#allocation5 + $0xd10] sm:$0xff]  ;;  %v5994_v60 = vld [vmem:[#allocation2 + $0x108] sm:$0xff]  ;;  %v5995_v1 = vld [vmem:[#allocation2 + $0x100] sm:$0xff] }
 0x247   :  { %v1207_v29 = vld [vmem:[#allocation5 + $0x21f0] sm:$0xff]  ;;  %v1217_v16 = vld [vmem:[#allocation5 + $0x2240] sm:$0xff] }
 0x248   :  { %5212 = vmatpush1.bf16.msra.mxu1 %v5211_v62  ;;  %v5353_v62 = vpack.c.bf16 %v500_v49, %v490_v48  ;;  %v1188_v48 = vld [vmem:[#allocation5 + $0x2158] sm:$0xff]  ;;  %v1198_v49 = vld [vmem:[#allocation5 + $0x21a8] sm:$0xff] }
 0x249   :  { %5340 = vmatpush1.bf16.msra.mxu0 %v5339_v46  ;;  %5214 = vmatprep.subr.bf16.mxu1 %v5213_v63  ;;  %v499_v46 = vld [vmem:[#allocation5 + $0xbd0] sm:$0xff]  ;;  %v1148_v63 = vld [vmem:[#allocation5 + $0x2018] sm:$0xff] }
 0x24a   :  { %5342 = vmatprep.subr.bf16.mxu0 %v5341_v53  ;;  %v520_v53 = vld [vmem:[#allocation5 + $0xc78] sm:$0xff]  ;;  %v5355_v11 = vpack.c.bf16 %v499_v46, %v489_v57  ;;  %v5991_v57 = vld [vmem:[#allocation2 + $0xc0] sm:$0xff]  ;;  %v5237_v46 = vpack.c.bf16 %v1198_v49, %v1188_v48  ;;  %v5998_v49 = vld [vmem:[#allocation2 + $0x148] sm:$0xff] }
 0x24b   :  { %v5357_v22 = vpack.c.bf16 %v520_v53, %v510_v6  ;;  %v549_v6 = vld [vmem:[#allocation5 + $0xd60] sm:$0xff] }
 0x24c   :  { %5216 = vmatpush1.bf16.msra.mxu1 %v5215_v13  ;;  %v5229_v13 = vpack.c.bf16 %v1158_v51, %v1148_v63  ;;  %v1187_v63 = vld [vmem:[#allocation5 + $0x2150] sm:$0xff]  ;;  %v1197_v51 = vld [vmem:[#allocation5 + $0x21a0] sm:$0xff] }
 0x24d   :  { %5344 = vmatpush1.bf16.msra.mxu0 %v5343_v14  ;;  %5218 = vmatprep.subr.bf16.mxu1 %v5217_v18  ;;  %v1147_v14 = vld [vmem:[#allocation5 + $0x2010] sm:$0xff]  ;;  %v1157_v18 = vld [vmem:[#allocation5 + $0x2060] sm:$0xff] }
 0x24e   :  { %5346 = vmatprep.subr.bf16.mxu0 %v5345_v24  ;;  %v1168_v24 = vld [vmem:[#allocation5 + $0x20b8] sm:$0xff]  ;;  %v6385_v48 = vld [vmem:[#allocation2 + $0x160] sm:$0xff] }
 0x24f   :  { %2880 = vmatmul.mubr.f32.vlgmr.msra.gmra.mrb[24].mxu1 %v6351_v20  ;;  %v5233_v19 = vpack.c.bf16 %v1178_v27, %v1168_v24 }
 0x250   :  { %5220 = vmatpush1.bf16.msra.mxu1 %v5219_v33  ;;  %3082 = vmatmul.mubr.f32.vlgmr.msra.gmra.mrb[24].mxu0 %v5979_v52  ;;  %v5986_v33 = vld [vmem:[#allocation2 + $0x88] sm:$0xff] }
 0x251   :  { %5348 = vmatpush1.bf16.msra.mxu0 %v5347_v34  ;;  %5222 = vmatprep.subr.bf16.mxu1 %v5221_v12  ;;  %v5231_v34 = vpack.c.bf16 %v1157_v18, %v1147_v14  ;;  %v5987_v12 = vld [vmem:[#allocation2 + $0x80] sm:$0xff]  ;;  %v6366_v52 = vld [vmem:[#allocation2 + $0xe8] sm:$0xff]  ;;  %v580_v14 = vld [vmem:[#allocation5 + $0xe58] sm:$0xff] }
 0x252   :  { %5350 = vmatprep.subr.bf16.mxu0 %v5349_v40  ;;  %2885 = vmatprep.mubr.f32.mxu1 %v6354_v4  ;;  %v1177_v40 = vld [vmem:[#allocation5 + $0x2100] sm:$0xff] }
 0x253   :  { %2886 = vmatmul.mubr.f32.gmra.mrb[26].mxu1 %v6357_v7  ;;  %3087 = vmatprep.mubr.f32.mxu0 %v5982_v10  ;;  %v5235_v58 = vpack.c.bf16 %v1177_v40, %v1167_v8  ;;  %v559_v10 = vld [vmem:[#allocation5 + $0xdb0] sm:$0xff]  ;;  %v6375_v18 = vld [vmem:[#allocation2 + $0x120] sm:$0xff]  ;;  %v1238_v8 = vld [vmem:[#allocation5 + $0x22e8] sm:$0xff] }
 0x254   :  { %5224 = vmatpush1.bf16.msra.mxu1 %v5223_v36  ;;  %3088 = vmatmul.mubr.f32.gmra.mrb[26].mxu0 %v5983_v9  ;;  %v550_v36 = vld [vmem:[#allocation5 + $0xd68] sm:$0xff]  ;;  %v5367_v24 = vpack.c.bf16 %v559_v10, %v549_v6  ;;  %v599_v6 = vld [vmem:[#allocation5 + $0xef0] sm:$0xff] }
 0x255   :  { %5352 = vmatpush1.bf16.msra.mxu0 %v5351_v54  ;;  %5226 = vmatprep.subr.bf16.mxu1 %v5225_v55  ;;  %v560_v54 = vld [vmem:[#allocation5 + $0xdb8] sm:$0xff]  ;;  %v6369_v55 = vld [vmem:[#allocation2 + $0xe0] sm:$0xff]  ;;  %v1218_v9 = vld [vmem:[#allocation5 + $0x2248] sm:$0xff] }
 0x256   :  { %5354 = vmatprep.subr.bf16.mxu0 %v5353_v62  ;;  %2891 = vmatprep.mubr.f32.mxu1 %v6360_v26  ;;  %v5363_v62 = vpack.c.bf16 %v539_v44, %v529_v41  ;;  %v5365_v53 = vpack.c.bf16 %v560_v54, %v550_v36  ;;  %v6380_v40 = vld [vmem:[#allocation2 + $0x168] sm:$0xff]  ;;  %v600_v44 = vld [vmem:[#allocation5 + $0xef8] sm:$0xff]  ;;  %v5243_v36 = vpack.c.bf16 %v1217_v16, %v1207_v29  ;;  %v5999_v54 = vld [vmem:[#allocation2 + $0x140] sm:$0xff] }
 0x257   :  { %2892 = vmatmul.mubr.f32.gmra.mrb[28].mxu1 %v6363_v32  ;;  %3093 = vmatprep.mubr.f32.mxu0 %v5986_v33  ;;  %v569_v33 = vld [vmem:[#allocation5 + $0xe00] sm:$0xff]  ;;  %v1258_v10 = vld [vmem:[#allocation5 + $0x2388] sm:$0xff] }
 0x258   :  { %5228 = vmatpush1.bf16.msra.mxu1 %v5227_v45  ;;  %3094 = vmatmul.mubr.f32.gmra.mrb[28].mxu0 %v5987_v12  ;;  %v1208_v45 = vld [vmem:[#allocation5 + $0x21f8] sm:$0xff]  ;;  %v1257_v29 = vld [vmem:[#allocation5 + $0x2380] sm:$0xff] }
 0x259   :  { %5356 = vmatpush1.bf16.msra.mxu0 %v5355_v11  ;;  %5230 = vmatprep.subr.bf16.mxu1 %v5229_v13  ;;  %v6372_v11 = vld [vmem:[#allocation2 + $0x128] sm:$0xff]  ;;  %v5241_v27 = vpack.c.bf16 %v1218_v9, %v1208_v45  ;;  %v6390_v45 = vld [vmem:[#allocation2 + $0x38] sm:$0xff]  ;;  %v609_v16 = vld [vmem:[#allocation5 + $0xf40] sm:$0xff] }
 0x25a   :  { %5358 = vmatprep.subr.bf16.mxu0 %v5357_v22  ;;  %2897 = vmatprep.mubr.f32.mxu1 %v6366_v52  ;;  %v570_v13 = vld [vmem:[#allocation5 + $0xe08] sm:$0xff]  ;;  %v5239_v22 = vpack.c.bf16 %v1197_v51, %v1187_v63 }
 0x25b   :  { %2898 = vmatmul.mubr.f32.gmra.mrb[30].mxu1 %v6369_v55  ;;  %3099 = vmatprep.mubr.f32.mxu0 %v5990_v17  ;;  %v5369_v12 = vpack.c.bf16 %v580_v14, %v570_v13  ;;  %v610_v13 = vld [vmem:[#allocation5 + $0xf48] sm:$0xff]  ;;  %v620_v14 = vld [vmem:[#allocation5 + $0xf98] sm:$0xff] }
 0x25c   :  { %5232 = vmatpush1.bf16.msra.mxu1 %v5231_v34  ;;  %3100 = vmatmul.mubr.f32.gmra.mrb[30].mxu0 %v5991_v57  ;;  %v1227_v57 = vld [vmem:[#allocation5 + $0x2290] sm:$0xff] }
 0x25d   :  { %5360 = vmatpush1.bf16.msra.mxu0 %v5359_v37  ;;  %5234 = vmatprep.subr.bf16.mxu1 %v5233_v19  ;;  %v579_v37 = vld [vmem:[#allocation5 + $0xe50] sm:$0xff]  ;;  %v1228_v19 = vld [vmem:[#allocation5 + $0x2298] sm:$0xff] }
 0x25e   :  { %5362 = vmatprep.subr.bf16.mxu0 %v5361_v42  ;;  %2903 = vmatprep.mubr.f32.mxu1 %v6372_v11  ;;  %v590_v42 = vld [vmem:[#allocation5 + $0xea8] sm:$0xff]  ;;  %v5371_v17 = vpack.c.bf16 %v579_v37, %v569_v33  ;;  %v619_v37 = vld [vmem:[#allocation5 + $0xf90] sm:$0xff] }
 0x25f   :  { %2904 = vmatmul.mubr.f32.gmra.mrb[32].mxu1 %v6375_v18  ;;  %3105 = vmatprep.mubr.f32.mxu0 %v5994_v60  ;;  %v5373_v51 = vpack.c.bf16 %v600_v44, %v590_v42  ;;  %v6001_v60 = vld [vmem:[#allocation2 + $0x18] sm:$0xff]  ;;  %v630_v44 = vld [vmem:[#allocation5 + $0xfe8] sm:$0xff] }
 0x260   :  { %5236 = vmatpush1.bf16.msra.mxu1 %v5235_v58  ;;  %3106 = vmatmul.mubr.f32.gmra.mrb[32].mxu0 %v5995_v1  ;;  %v5245_v58 = vpack.c.bf16 %v1238_v8, %v1228_v19  ;;  %v1268_v19 = vld [vmem:[#allocation5 + $0x23d8] sm:$0xff]  ;;  %v1278_v8 = vld [vmem:[#allocation5 + $0x2428] sm:$0xff] }
 0x261   :  { %5364 = vmatpush1.bf16.msra.mxu0 %v5363_v62  ;;  %5238 = vmatprep.subr.bf16.mxu1 %v5237_v46  ;;  %v1237_v62 = vld [vmem:[#allocation5 + $0x22e0] sm:$0xff] }
 0x262   :  { %v6378_v34 = vpop.f32.mrb[12].mxu1  ;;  %5366 = vmatprep.subr.bf16.mxu0 %v5365_v53  ;;  %2909 = vmatprep.mubr.f32.mxu1 %v6380_v40  ;;  %v589_v46 = vld [vmem:[#allocation5 + $0xea0] sm:$0xff]  ;;  %v1248_v53 = vld [vmem:[#allocation5 + $0x2338] sm:$0xff] }
 0x263   :  { %v6383_v41 = vpop.f32.mrb[13].mxu1  ;;  %2910 = vmatmul.mubr.f32.gmra.mrb[34].mxu1 %v6385_v48  ;;  %3111 = vmatprep.mubr.f32.mxu0 %v5998_v49  ;;  %v5375_v1 = vpack.c.bf16 %v599_v6, %v589_v46  ;;  %v640_v49 = vld [vmem:[#allocation5 + $0x1038] sm:$0xff]  ;;  %v639_v6 = vld [vmem:[#allocation5 + $0x1030] sm:$0xff] }
 0x264   :  { %6610 = vst [vmem:[#allocation16_spill] sm:$0xff] %v6383_v41  ;;  %5240 = vmatpush1.bf16.msra.mxu1 %v5239_v22  ;;  %3112 = vmatmul.mubr.f32.gmra.mrb[34].mxu0 %v5999_v54  ;;  %v5247_v22 = vpack.c.bf16 %v1237_v62, %v1227_v57  ;;  %v5379_v54 = vpack.c.bf16 %v619_v37, %v609_v16  ;;  %v1277_v57 = vld [vmem:[#allocation5 + $0x2420] sm:$0xff]  ;;  %v3514_v41 = vld [vmem:[#allocation7 + $0x18] sm:$0xff] }
 0x265   :  { %5368 = vmatpush1.bf16.msra.mxu0 %v5367_v24  ;;  %5242 = vmatprep.subr.bf16.mxu1 %v5241_v27  ;;  %v5249_v24 = vpack.c.bf16 %v1258_v10, %v1248_v53  ;;  %v1247_v27 = vld [vmem:[#allocation5 + $0x2330] sm:$0xff]  ;;  %v629_v62 = vld [vmem:[#allocation5 + $0xfe0] sm:$0xff]  ;;  %v1288_v53 = vld [vmem:[#allocation5 + $0x2478] sm:$0xff] }
 0x266   :  { %v6388_v63 = vpop.f32.mrb[14].mxu1  ;;  %5370 = vmatprep.subr.bf16.mxu0 %v5369_v12  ;;  %2980 = vmatprep.mubr.f32.mxu1 %v6390_v45  ;;  %v5377_v12 = vpack.c.bf16 %v620_v14, %v610_v13  ;;  %v1298_v10 = vld [vmem:[#allocation5 + $0x24c8] sm:$0xff]  ;;  %v649_v16 = vld [vmem:[#allocation5 + $0x1080] sm:$0xff] }
 0x267   :  { %v6393_v9 = vpop.f32.mrb[15].mxu1  ;;  %3182 = vmatprep.mubr.f32.mxu0 %v6001_v60  ;;  %v650_v14 = vld [vmem:[#allocation5 + $0x1088] sm:$0xff]  ;;  %v660_v60 = vld [vmem:[#allocation5 + $0x10d8] sm:$0xff] }
 0x268   :  { %6611 = vst [vmem:[#allocation17_spill] sm:$0xff] %v6393_v9  ;;  %5244 = vmatpush1.bf16.msra.mxu1 %v5243_v36  ;;  %v5251_v36 = vpack.c.bf16 %v1257_v29, %v1247_v27  ;;  %v1287_v27 = vld [vmem:[#allocation5 + $0x2470] sm:$0xff]  ;;  %v1297_v29 = vld [vmem:[#allocation5 + $0x24c0] sm:$0xff]  ;;  %v700_v9 = vld [vmem:[#allocation5 + $0x1218] sm:$0xff] }
 0x269   :  { %5372 = vmatpush1.bf16.msra.mxu0 %v5371_v17  ;;  %5246 = vmatprep.subr.bf16.mxu1 %v5245_v58  ;;  %v5253_v17 = vpack.c.bf16 %v1278_v8, %v1268_v19  ;;  %v1267_v58 = vld [vmem:[#allocation5 + $0x23d0] sm:$0xff]  ;;  %v1308_v8 = vld [vmem:[#allocation5 + $0x2518] sm:$0xff] }
 0x26a   :  { %v6395_v33 = vpop.f32.mrb[16].mxu1  ;;  %5374 = vmatprep.subr.bf16.mxu0 %v5373_v51  ;;  %v5381_v51 = vpack.c.bf16 %v640_v49, %v630_v44  ;;  %v659_v19 = vld [vmem:[#allocation5 + $0x10d0] sm:$0xff]  ;;  %v1318_v44 = vld [vmem:[#allocation5 + $0x2568] sm:$0xff] }
 0x26b   :  { %v6397_v42 = vpop.f32.mrb[17].mxu1 }
 0x26c   :  { %6612 = vst [vmem:[#allocation18_spill] sm:$0xff] %v6397_v42  ;;  %5248 = vmatpush1.bf16.msra.mxu1 %v5247_v22  ;;  %v5255_v22 = vpack.c.bf16 %v1277_v57, %v1267_v58  ;;  %v680_v42 = vld [vmem:[#allocation5 + $0x1178] sm:$0xff]  ;;  %v1307_v58 = vld [vmem:[#allocation5 + $0x2510] sm:$0xff]  ;;  %v1317_v57 = vld [vmem:[#allocation5 + $0x2560] sm:$0xff] }
 0x26d   :  { %5376 = vmatpush1.bf16.msra.mxu0 %v5375_v1  ;;  %5250 = vmatprep.subr.bf16.mxu1 %v5249_v24  ;;  %v5383_v1 = vpack.c.bf16 %v639_v6, %v629_v62  ;;  %v5257_v24 = vpack.c.bf16 %v1298_v10, %v1288_v53  ;;  %v669_v62 = vld [vmem:[#allocation5 + $0x1120] sm:$0xff]  ;;  %v679_v53 = vld [vmem:[#allocation5 + $0x1170] sm:$0xff]  ;;  %v1328_v10 = vld [vmem:[#allocation5 + $0x25b8] sm:$0xff] }
 0x26e   :  { %v6399_v46 = vpop.f32.mrb[18].mxu1  ;;  %5378 = vmatprep.subr.bf16.mxu0 %v5377_v12  ;;  %v5385_v12 = vpack.c.bf16 %v660_v60, %v650_v14  ;;  %v1338_v14 = vld [vmem:[#allocation5 + $0x2608] sm:$0xff] }
 0x26f   :  { %v6401_v13 = vpop.f32.mrb[19].mxu1 }
 0x270   :  { %6613 = vst [vmem:[#allocation19_spill] sm:$0xff] %v6401_v13  ;;  %5252 = vmatpush1.bf16.msra.mxu1 %v5251_v36  ;;  %v670_v13 = vld [vmem:[#allocation5 + $0x1128] sm:$0xff]  ;;  %v5259_v36 = vpack.c.bf16 %v1297_v29, %v1287_v27  ;;  %v1327_v27 = vld [vmem:[#allocation5 + $0x25b0] sm:$0xff]  ;;  %v1337_v29 = vld [vmem:[#allocation5 + $0x2600] sm:$0xff] }
 0x271   :  { %5380 = vmatpush1.bf16.msra.mxu0 %v5379_v54  ;;  %5254 = vmatprep.subr.bf16.mxu1 %v5253_v17  ;;  %v5387_v54 = vpack.c.bf16 %v659_v19, %v649_v16  ;;  %v5261_v17 = vpack.c.bf16 %v1318_v44, %v1308_v8  ;;  %v689_v16 = vld [vmem:[#allocation5 + $0x11c0] sm:$0xff]  ;;  %v710_v8 = vld [vmem:[#allocation5 + $0x1268] sm:$0xff]  ;;  %v720_v44 = vld [vmem:[#allocation5 + $0x12b8] sm:$0xff] }
 0x272   :  { %v6403_v37 = vpop.f32.mrb[20].mxu1  ;;  %5382 = vmatprep.subr.bf16.mxu0 %v5381_v51  ;;  %v5389_v51 = vpack.c.bf16 %v680_v42, %v670_v13  ;;  %v1348_v42 = vld [vmem:[#allocation5 + $0x2658] sm:$0xff]  ;;  %v1358_v13 = vld [vmem:[#allocation5 + $0x26a8] sm:$0xff] }
 0x273   :  { %6614 = vst [vmem:[#allocation20_spill] sm:$0xff] %v6403_v37  ;;  %v6405_v49 = vpop.f32.mrb[21].mxu1  ;;  %v3532_v37 = vld [vmem:[#allocation7 + $0xa8] sm:$0xff] }
 0x274   :  { %6615 = vst [vmem:[#allocation21_spill] sm:$0xff] %v6405_v49  ;;  %5256 = vmatpush1.bf16.msra.mxu1 %v5255_v22  ;;  %v690_v49 = vld [vmem:[#allocation5 + $0x11c8] sm:$0xff]  ;;  %v5263_v22 = vpack.c.bf16 %v1317_v57, %v1307_v58  ;;  %v5269_v58 = vpack.c.bf16 %v1358_v13, %v1348_v42  ;;  %v709_v57 = vld [vmem:[#allocation5 + $0x1260] sm:$0xff]  ;;  %v1388_v42 = vld [vmem:[#allocation5 + $0x2798] sm:$0xff] }
 0x275   :  { %5384 = vmatpush1.bf16.msra.mxu0 %v5383_v1  ;;  %5258 = vmatprep.subr.bf16.mxu1 %v5257_v24  ;;  %v5391_v1 = vpack.c.bf16 %v679_v53, %v669_v62  ;;  %v5265_v24 = vpack.c.bf16 %v1338_v14, %v1328_v10  ;;  %v5393_v19 = vpack.c.bf16 %v700_v9, %v690_v49  ;;  %v719_v53 = vld [vmem:[#allocation5 + $0x12b0] sm:$0xff]  ;;  %v1368_v10 = vld [vmem:[#allocation5 + $0x26f8] sm:$0xff]  ;;  %v730_v9 = vld [vmem:[#allocation5 + $0x1308] sm:$0xff] }
 0x276   :  { %v6407_v6 = vpop.f32.mrb[22].mxu1  ;;  %5386 = vmatprep.subr.bf16.mxu0 %v5385_v12  ;;  %v699_v12 = vld [vmem:[#allocation5 + $0x1210] sm:$0xff]  ;;  %v5397_v62 = vpack.c.bf16 %v720_v44, %v710_v8  ;;  %v740_v49 = vld [vmem:[#allocation5 + $0x1358] sm:$0xff]  ;;  %v750_v13 = vld [vmem:[#allocation5 + $0x13a8] sm:$0xff] }
 0x277   :  { %6616 = vst [vmem:[#allocation22_spill] sm:$0xff] %v6407_v6  ;;  %v6409_v60 = vpop.f32.mrb[23].mxu1  ;;  %v760_v8 = vld [vmem:[#allocation5 + $0x13f8] sm:$0xff]  ;;  %v3531_v6 = vld [vmem:[#allocation7 + $0xa0] sm:$0xff] }
 0x278   :  { %6617 = vst [vmem:[#allocation23_spill] sm:$0xff] %v6409_v60  ;;  %5260 = vmatpush1.bf16.msra.mxu1 %v5259_v36  ;;  %v5267_v60 = vpack.c.bf16 %v1337_v29, %v1327_v27  ;;  %v5395_v36 = vpack.c.bf16 %v699_v12, %v689_v16  ;;  %v729_v29 = vld [vmem:[#allocation5 + $0x1300] sm:$0xff]  ;;  %v5401_v16 = vpack.c.bf16 %v740_v49, %v730_v9  ;;  %v739_v12 = vld [vmem:[#allocation5 + $0x1350] sm:$0xff] }
 0x279   :  { %5388 = vmatpush1.bf16.msra.mxu0 %v5387_v54  ;;  %5262 = vmatprep.subr.bf16.mxu1 %v5261_v17  ;;  %v1347_v54 = vld [vmem:[#allocation5 + $0x2650] sm:$0xff]  ;;  %v1357_v17 = vld [vmem:[#allocation5 + $0x26a0] sm:$0xff] }
 0x27a   :  { %5390 = vmatprep.subr.bf16.mxu0 %v5389_v51  ;;  %v1378_v51 = vld [vmem:[#allocation5 + $0x2748] sm:$0xff]  ;;  %v5271_v14 = vpack.c.bf16 %v1357_v17, %v1347_v54  ;;  %v5405_v17 = vpack.c.bf16 %v760_v8, %v750_v13  ;;  %v820_v13 = vld [vmem:[#allocation5 + $0x15d8] sm:$0xff]  ;;  %v6003_v8 = vld [vmem:[#allocation2 + $0x10] sm:$0xff] }
 0x27b   :  { %v5273_v27 = vpack.c.bf16 %v1378_v51, %v1368_v10  ;;  %v770_v10 = vld [vmem:[#allocation5 + $0x1448] sm:$0xff] }
 0x27c   :  { %5264 = vmatpush1.bf16.msra.mxu1 %v5263_v22  ;;  %v5399_v22 = vpack.c.bf16 %v719_v53, %v709_v57  ;;  %v749_v57 = vld [vmem:[#allocation5 + $0x13a0] sm:$0xff]  ;;  %v759_v53 = vld [vmem:[#allocation5 + $0x13f0] sm:$0xff] }
 0x27d   :  { %5392 = vmatpush1.bf16.msra.mxu0 %v5391_v1  ;;  %5266 = vmatprep.subr.bf16.mxu1 %v5265_v24  ;;  %v1367_v1 = vld [vmem:[#allocation5 + $0x26f0] sm:$0xff]  ;;  %v1377_v24 = vld [vmem:[#allocation5 + $0x2740] sm:$0xff]  ;;  %v5407_v9 = vpack.c.bf16 %v759_v53, %v749_v57  ;;  %v830_v53 = vld [vmem:[#allocation5 + $0x1628] sm:$0xff] }
 0x27e   :  { %5394 = vmatprep.subr.bf16.mxu0 %v5393_v19  ;;  %v1398_v19 = vld [vmem:[#allocation5 + $0x27e8] sm:$0xff]  ;;  %v5275_v44 = vpack.c.bf16 %v1377_v24, %v1367_v1  ;;  %v800_v1 = vld [vmem:[#allocation5 + $0x1538] sm:$0xff]  ;;  %v6417_v57 = vld [vmem:[#allocation2 + $0x70] sm:$0xff] }
 0x27f   :  { %v5277_v54 = vpack.c.bf16 %v1398_v19, %v1388_v42  ;;  %v6411_v42 = vld [vmem:[#allocation2 + $0x30] sm:$0xff]  ;;  %v810_v19 = vld [vmem:[#allocation5 + $0x1588] sm:$0xff] }
 0x280   :  { %5268 = vmatpush1.bf16.msra.mxu1 %v5267_v60  ;;  %v5403_v60 = vpack.c.bf16 %v739_v12, %v729_v29  ;;  %v799_v12 = vld [vmem:[#allocation5 + $0x1530] sm:$0xff] }
 0x281   :  { %5396 = vmatpush1.bf16.msra.mxu0 %v5395_v36  ;;  %5270 = vmatprep.subr.bf16.mxu1 %v5269_v58  ;;  %v1387_v36 = vld [vmem:[#allocation5 + $0x2790] sm:$0xff]  ;;  %v1397_v58 = vld [vmem:[#allocation5 + $0x27e0] sm:$0xff] }
 0x282   :  { %5398 = vmatprep.subr.bf16.mxu0 %v5397_v62  ;;  %v780_v62 = vld [vmem:[#allocation5 + $0x1498] sm:$0xff]  ;;  %v5279_v51 = vpack.c.bf16 %v1397_v58, %v1387_v36  ;;  %v5417_v36 = vpack.c.bf16 %v820_v13, %v810_v19  ;;  %v809_v58 = vld [vmem:[#allocation5 + $0x1580] sm:$0xff] }
 0x283   :  { %v5409_v49 = vpack.c.bf16 %v780_v62, %v770_v10  ;;  %v840_v10 = vld [vmem:[#allocation5 + $0x1678] sm:$0xff]  ;;  %v849_v13 = vld [vmem:[#allocation5 + $0x16c0] sm:$0xff] }
 0x284   :  { %5272 = vmatpush1.bf16.msra.mxu1 %v5271_v14  ;;  %v769_v14 = vld [vmem:[#allocation5 + $0x1440] sm:$0xff]  ;;  %v6420_v62 = vld [vmem:[#allocation2 + $0xb8] sm:$0xff] }
 0x285   :  { %5400 = vmatpush1.bf16.msra.mxu0 %v5399_v22  ;;  %5274 = vmatprep.subr.bf16.mxu1 %v5273_v27  ;;  %v779_v22 = vld [vmem:[#allocation5 + $0x1490] sm:$0xff]  ;;  %v790_v27 = vld [vmem:[#allocation5 + $0x14e8] sm:$0xff] }
 0x286   :  { %5402 = vmatprep.subr.bf16.mxu0 %v5401_v16  ;;  %v5411_v24 = vpack.c.bf16 %v779_v22, %v769_v14  ;;  %v5413_v29 = vpack.c.bf16 %v800_v1, %v790_v27  ;;  %v789_v16 = vld [vmem:[#allocation5 + $0x14e0] sm:$0xff]  ;;  %v5421_v14 = vpack.c.bf16 %v840_v10, %v830_v53  ;;  %v839_v27 = vld [vmem:[#allocation5 + $0x1670] sm:$0xff] }
 0x287   :  { %v829_v22 = vld [vmem:[#allocation5 + $0x1620] sm:$0xff]  ;;  %v6423_v1 = vld [vmem:[#allocation2 + $0xb0] sm:$0xff] }
 0x288   :  { %5276 = vmatpush1.bf16.msra.mxu1 %v5275_v44  ;;  %v6414_v44 = vld [vmem:[#allocation2 + $0x78] sm:$0xff]  ;;  %v879_v53 = vld [vmem:[#allocation5 + $0x17b0] sm:$0xff] }
 0x289   :  { %5404 = vmatpush1.bf16.msra.mxu0 %v5403_v60  ;;  %5278 = vmatprep.subr.bf16.mxu1 %v5277_v54  ;;  %v5415_v60 = vpack.c.bf16 %v799_v12, %v789_v16  ;;  %v6005_v54 = vld [vmem:[#allocation2 + $0x58] sm:$0xff]  ;;  %v5423_v12 = vpack.c.bf16 %v839_v27, %v829_v22  ;;  %v6439_v10 = vld [vmem:[#allocation2 + $0x130] sm:$0xff] }
 0x28a   :  { %5406 = vmatprep.subr.bf16.mxu0 %v5405_v17  ;;  %v819_v17 = vld [vmem:[#allocation5 + $0x15d0] sm:$0xff]  ;;  %v6426_v16 = vld [vmem:[#allocation2 + $0xf8] sm:$0xff] }
 0x28b   :  { %v899_v22 = vld [vmem:[#allocation5 + $0x1850] sm:$0xff] }
 0x28c   :  { %5280 = vmatpush1.bf16.msra.mxu1 %v5279_v51  ;;  %v6008_v51 = vld [vmem:[#allocation2 + $0x50] sm:$0xff] }
 0x28d   :  { %5408 = vmatpush1.bf16.msra.mxu0 %v5407_v9  ;;  %v5419_v9 = vpack.c.bf16 %v819_v17, %v809_v58  ;;  %v6434_v58 = vld [vmem:[#allocation2 + $0x138] sm:$0xff]  ;;  %v869_v17 = vld [vmem:[#allocation5 + $0x1760] sm:$0xff]  ;;  %v6447_v27 = vld [vmem:[#allocation2 + $0x170] sm:$0xff] }
 0x28e   :  { %5410 = vmatprep.subr.bf16.mxu0 %v5409_v49  ;;  %v6009_v49 = vld [vmem:[#allocation2 + $0x98] sm:$0xff] }
 0x28f   :  { %2981 = vmatmul.mubr.f32.vlgmr.msra.gmra.mrb[24].mxu1 %v6411_v42 }
 0x290   :  { %3183 = vmatmul.mubr.f32.vlgmr.msra.gmra.mrb[24].mxu0 %v6003_v8  ;;  %2986 = vmatprep.mubr.f32.mxu1 %v6414_v44  ;;  %v859_v8 = vld [vmem:[#allocation5 + $0x1710] sm:$0xff] }
 0x291   :  { %5412 = vmatpush1.bf16.msra.mxu0 %v5411_v24  ;;  %3188 = vmatprep.mubr.f32.mxu0 %v6005_v54  ;;  %v850_v24 = vld [vmem:[#allocation5 + $0x16c8] sm:$0xff] }
 0x292   :  { %5414 = vmatprep.subr.bf16.mxu0 %v5413_v29  ;;  %v860_v29 = vld [vmem:[#allocation5 + $0x1718] sm:$0xff]  ;;  %v870_v54 = vld [vmem:[#allocation5 + $0x1768] sm:$0xff] }
 0x293   :  { %2987 = vmatmul.mubr.f32.gmra.mrb[26].mxu1 %v6417_v57  ;;  %v5425_v19 = vpack.c.bf16 %v860_v29, %v850_v24  ;;  %v910_v24 = vld [vmem:[#allocation5 + $0x18a8] sm:$0xff]  ;;  %v920_v29 = vld [vmem:[#allocation5 + $0x18f8] sm:$0xff] }
 0x294   :  { %2992 = vmatprep.mubr.f32.mxu1 %v6420_v62  ;;  %3189 = vmatmul.mubr.f32.gmra.mrb[26].mxu0 %v6008_v51  ;;  %v890_v51 = vld [vmem:[#allocation5 + $0x1808] sm:$0xff] }
 0x295   :  { %5416 = vmatpush1.bf16.msra.mxu0 %v5415_v60  ;;  %3194 = vmatprep.mubr.f32.mxu0 %v6009_v49  ;;  %v6431_v60 = vld [vmem:[#allocation2 + $0xf0] sm:$0xff]  ;;  %v6442_v49 = vld [vmem:[#allocation2 + $0x178] sm:$0xff] }
 0x296   :  { %5418 = vmatprep.subr.bf16.mxu0 %v5417_v36  ;;  %v880_v36 = vld [vmem:[#allocation5 + $0x17b8] sm:$0xff] }
 0x297   :  { %2993 = vmatmul.mubr.f32.gmra.mrb[28].mxu1 %v6423_v1 }
 0x298   :  { %2998 = vmatprep.mubr.f32.mxu1 %v6426_v16  ;;  %3195 = vmatmul.mubr.f32.gmra.mrb[28].mxu0 %v6327_v30  ;;  %v5427_v30 = vpack.c.bf16 %v859_v8, %v849_v13  ;;  %v3527_v13 = vld [vmem:[#allocation7 + $0x80] sm:$0xff] }
 0x299   :  { %5420 = vmatpush1.bf16.msra.mxu0 %v5419_v9  ;;  %3200 = vmatprep.mubr.f32.mxu0 %v6330_v50  ;;  %v5429_v50 = vpack.c.bf16 %v880_v36, %v870_v54  ;;  %v900_v9 = vld [vmem:[#allocation5 + $0x1858] sm:$0xff]  ;;  %v3511_v8 = vld [vmem:[#allocation7] sm:$0xff]  ;;  %v3512_v36 = vld [vmem:[#allocation7 + $0x8] sm:$0xff] }
 0x29a   :  { %5422 = vmatprep.subr.bf16.mxu0 %v5421_v14  ;;  %v889_v14 = vld [vmem:[#allocation5 + $0x1800] sm:$0xff] }
 0x29b   :  { %2999 = vmatmul.mubr.f32.gmra.mrb[30].mxu1 %v6431_v60  ;;  %v5435_v54 = vpack.c.bf16 %v899_v22, %v889_v14  ;;  %v5545_v22 = vpack.c.bf16 %v3532_v37, %v3531_v6  ;;  %v959_v6 = vld [vmem:[#allocation5 + $0x1a30] sm:$0xff] }
 0x29c   :  { %3004 = vmatprep.mubr.f32.mxu1 %v6434_v58  ;;  %3201 = vmatmul.mubr.f32.gmra.mrb[30].mxu0 %v6333_v2  ;;  %v5431_v2 = vpack.c.bf16 %v879_v53, %v869_v17  ;;  %v5437_v17 = vpack.c.bf16 %v920_v29, %v910_v24  ;;  %v5539_v53 = vpack.c.bf16 %v3512_v36, %v3511_v8  ;;  %v939_v24 = vld [vmem:[#allocation5 + $0x1990] sm:$0xff]  ;;  %v3534_v8 = vld [vmem:[#allocation7 + $0xb8] sm:$0xff]  ;;  %v950_v36 = vld [vmem:[#allocation5 + $0x19e8] sm:$0xff] }
 0x29d   :  { %5424 = vmatpush1.bf16.msra.mxu0 %v5423_v12  ;;  %3206 = vmatprep.mubr.f32.mxu0 %v6336_v0  ;;  %v5433_v0 = vpack.c.bf16 %v900_v9, %v890_v51  ;;  %v909_v12 = vld [vmem:[#allocation5 + $0x18a0] sm:$0xff]  ;;  %v3513_v9 = vld [vmem:[#allocation7 + $0x10] sm:$0xff] }
 0x29e   :  { %5426 = vmatprep.subr.bf16.mxu0 %v5425_v19  ;;  %v919_v19 = vld [vmem:[#allocation5 + $0x18f0] sm:$0xff] }
 0x29f   :  { %3005 = vmatmul.mubr.f32.gmra.mrb[32].mxu1 %v6439_v10  ;;  %v5439_v14 = vpack.c.bf16 %v919_v19, %v909_v12  ;;  %v3533_v29 = vld [vmem:[#allocation7 + $0xb0] sm:$0xff]  ;;  %v3518_v19 = vld [vmem:[#allocation7 + $0x38] sm:$0xff] }
 0x2a0   :  { %3010 = vmatprep.mubr.f32.mxu1 %v6442_v49  ;;  %3207 = vmatmul.mubr.f32.gmra.mrb[32].mxu0 %v6339_v15  ;;  %v3528_v15 = vld [vmem:[#allocation7 + $0x88] sm:$0xff]  ;;  %v3517_v12 = vld [vmem:[#allocation7 + $0x30] sm:$0xff] }
 0x2a1   :  { %5428 = vmatpush1.bf16.msra.mxu0 %v5427_v30  ;;  %3212 = vmatprep.mubr.f32.mxu0 %v6342_v21  ;;  %v5537_v21 = vpack.c.bf16 %v3528_v15, %v3527_v13  ;;  %v3529_v30 = vld [vmem:[#allocation7 + $0x90] sm:$0xff]  ;;  %v3515_v13 = vld [vmem:[#allocation7 + $0x20] sm:$0xff]  ;;  %v3516_v15 = vld [vmem:[#allocation7 + $0x28] sm:$0xff] }
 0x2a2   :  { %5430 = vmatprep.subr.bf16.mxu0 %v5429_v50  ;;  %v3530_v50 = vld [vmem:[#allocation7 + $0x98] sm:$0xff] }
 0x2a3   :  { %3011 = vmatmul.mubr.f32.gmra.mrb[34].mxu1 %v6447_v27  ;;  %v5541_v51 = vpack.c.bf16 %v3530_v50, %v3529_v30  ;;  %5538 = vmatprep.subr.bf16.mxu1 %v5537_v21  ;;  %v960_v30 = vld [vmem:[#allocation5 + $0x1a38] sm:$0xff]  ;;  %v5547_v50 = vpack.c.bf16 %v3516_v15, %v3515_v13  ;;  %v3520_v13 = vld [vmem:[#allocation7 + $0x48] sm:$0xff]  ;;  %v979_v15 = vld [vmem:[#allocation5 + $0x1ad0] sm:$0xff] }
 0x2a4   :  { %3213 = vmatmul.mubr.f32.gmra.mrb[34].mxu0 %v6345_v35  ;;  %v940_v35 = vld [vmem:[#allocation5 + $0x1998] sm:$0xff]  ;;  %5540 = vmatpush3.bf16.msra.mxu1 %v5539_v53  ;;  %v949_v53 = vld [vmem:[#allocation5 + $0x19e0] sm:$0xff]  ;;  %v5445_v37 = vpack.c.bf16 %v960_v30, %v950_v36 }
 0x2a5   :  { %5432 = vmatpush1.bf16.msra.mxu0 %v5431_v2  ;;  %3283 = vmatprep.mubr.f32.mxu0 %v6348_v43  ;;  %v5543_v2 = vpack.c.bf16 %v3514_v41, %v3513_v9  ;;  %v929_v43 = vld [vmem:[#allocation5 + $0x1940] sm:$0xff]  ;;  %v5549_v41 = vpack.c.bf16 %v3534_v8, %v3533_v29  ;;  %v5551_v9 = vpack.c.bf16 %v3518_v19, %v3517_v12  ;;  %v990_v29 = vld [vmem:[#allocation5 + $0x1b28] sm:$0xff]  ;;  %v1000_v8 = vld [vmem:[#allocation5 + $0x1b78] sm:$0xff] }
 0x2a6   :  { %5434 = vmatprep.subr.bf16.mxu0 %v5433_v0  ;;  %5542 = vmatprep.subr.bf16.mxu1 %v5541_v51  ;;  %v5441_v0 = vpack.c.bf16 %v940_v35, %v930_v59  ;;  %v5443_v21 = vpack.c.bf16 %v939_v24, %v929_v43  ;;  %v970_v59 = vld [vmem:[#allocation5 + $0x1a88] sm:$0xff]  ;;  %v980_v51 = vld [vmem:[#allocation5 + $0x1ad8] sm:$0xff]  ;;  %v5447_v35 = vpack.c.bf16 %v959_v6, %v949_v53  ;;  %v3519_v43 = vld [vmem:[#allocation7 + $0x40] sm:$0xff] }
 0x2a7   :  { %v3537_v24 = vld [vmem:[#allocation7 + $0xd0] sm:$0xff]  ;;  %v5555_v36 = vpack.c.bf16 %v3520_v13, %v3519_v43  ;;  %v3522_v12 = vld [vmem:[#allocation7 + $0x58] sm:$0xff]  ;;  %v3539_v6 = vld [vmem:[#allocation7 + $0xe0] sm:$0xff] }
 0x2a8   :  { %5544 = vmatpush3.bf16.msra.mxu1 %v5543_v2  ;;  %v969_v2 = vld [vmem:[#allocation5 + $0x1a80] sm:$0xff]  ;;  %v3521_v53 = vld [vmem:[#allocation7 + $0x50] sm:$0xff] }
 0x2a9   :  { %5436 = vmatpush1.bf16.msra.mxu0 %v5435_v54  ;;  %5546 = vmatprep.subr.bf16.mxu1 %v5545_v22  ;;  %v3535_v54 = vld [vmem:[#allocation7 + $0xc0] sm:$0xff]  ;;  %v5449_v22 = vpack.c.bf16 %v980_v51, %v970_v59  ;;  %v5451_v30 = vpack.c.bf16 %v979_v15, %v969_v2  ;;  %v999_v19 = vld [vmem:[#allocation5 + $0x1b70] sm:$0xff]  ;;  %v5559_v59 = vpack.c.bf16 %v3522_v12, %v3521_v53  ;;  %v3524_v2 = vld [vmem:[#allocation7 + $0x68] sm:$0xff] }
 0x2aa   :  { %5438 = vmatprep.subr.bf16.mxu0 %v5437_v17  ;;  %v3536_v17 = vld [vmem:[#allocation7 + $0xc8] sm:$0xff]  ;;  %v1009_v43 = vld [vmem:[#allocation5 + $0x1bc0] sm:$0xff]  ;;  %v1019_v13 = vld [vmem:[#allocation5 + $0x1c10] sm:$0xff] }
 0x2ab   :  { %v1030_v15 = vld [vmem:[#allocation5 + $0x1c68] sm:$0xff]  ;;  %v1049_v12 = vld [vmem:[#allocation5 + $0x1d00] sm:$0xff] }
 0x2ac   :  { %5548 = vmatpush3.bf16.msra.mxu1 %v5547_v50  ;;  %v989_v50 = vld [vmem:[#allocation5 + $0x1b20] sm:$0xff] }
 0x2ad   :  { %5440 = vmatpush1.bf16.msra.mxu0 %v5439_v14  ;;  %5550 = vmatprep.subr.bf16.mxu1 %v5549_v41  ;;  %v5553_v14 = vpack.c.bf16 %v3536_v17, %v3535_v54  ;;  %v5453_v41 = vpack.c.bf16 %v1000_v8, %v990_v29  ;;  %v1010_v54 = vld [vmem:[#allocation5 + $0x1bc8] sm:$0xff]  ;;  %v1020_v17 = vld [vmem:[#allocation5 + $0x1c18] sm:$0xff]  ;;  %v5455_v51 = vpack.c.bf16 %v999_v19, %v989_v50  ;;  %v1029_v8 = vld [vmem:[#allocation5 + $0x1c60] sm:$0xff] }
 0x2ae   :  { %5442 = vmatprep.subr.bf16.mxu0 %v5441_v0  ;;  %v3538_v0 = vld [vmem:[#allocation7 + $0xd8] sm:$0xff]  ;;  %v1070_v19 = vld [vmem:[#allocation5 + $0x1da8] sm:$0xff] }
 0x2af   :  { %v1060_v50 = vld [vmem:[#allocation5 + $0x1d58] sm:$0xff] }
 0x2b0   :  { %5552 = vmatpush3.bf16.msra.mxu1 %v5551_v9 }
 0x2b1   :  { %5444 = vmatpush1.bf16.msra.mxu0 %v5443_v21  ;;  %5554 = vmatprep.subr.bf16.mxu1 %v5553_v14  ;;  %v5557_v21 = vpack.c.bf16 %v3538_v0, %v3537_v24  ;;  %v5457_v14 = vpack.c.bf16 %v1020_v17, %v1010_v54  ;;  %v5459_v0 = vpack.c.bf16 %v1019_v13, %v1009_v43  ;;  %v1069_v17 = vld [vmem:[#allocation5 + $0x1da0] sm:$0xff]  ;;  %v1099_v43 = vld [vmem:[#allocation5 + $0x1e90] sm:$0xff]  ;;  %v1110_v13 = vld [vmem:[#allocation5 + $0x1ee8] sm:$0xff] }
 0x2b2   :  { %5446 = vmatprep.subr.bf16.mxu0 %v5445_v37  ;;  %v3540_v37 = vld [vmem:[#allocation7 + $0xe8] sm:$0xff] }
 0x2b3   :  { %v5561_v9 = vpack.c.bf16 %v3540_v37, %v3539_v6  ;;  %v1080_v6 = vld [vmem:[#allocation5 + $0x1df8] sm:$0xff] }
 0x2b4   :  { %5556 = vmatpush3.bf16.msra.mxu1 %v5555_v36  ;;  %v1039_v36 = vld [vmem:[#allocation5 + $0x1cb0] sm:$0xff]  ;;  %v5469_v54 = vpack.c.bf16 %v1080_v6, %v1070_v19 }
 0x2b5   :  { %5448 = vmatpush1.bf16.msra.mxu0 %v5447_v35  ;;  %5558 = vmatprep.subr.bf16.mxu1 %v5557_v21  ;;  %v3523_v35 = vld [vmem:[#allocation7 + $0x60] sm:$0xff]  ;;  %v5463_v21 = vpack.c.bf16 %v1039_v36, %v1029_v8  ;;  %v1130_v8 = vld [vmem:[#allocation5 + $0x1f88] sm:$0xff]  ;;  %v1140_v36 = vld [vmem:[#allocation5 + $0x1fd8] sm:$0xff] }
 0x2b6   :  { %5450 = vmatprep.subr.bf16.mxu0 %v5449_v22  ;;  %v1040_v22 = vld [vmem:[#allocation5 + $0x1cb8] sm:$0xff]  ;;  %v5563_v24 = vpack.c.bf16 %v3524_v2, %v3523_v35 }
 0x2b7   :  { %v5461_v29 = vpack.c.bf16 %v1040_v22, %v1030_v15  ;;  %v1120_v15 = vld [vmem:[#allocation5 + $0x1f38] sm:$0xff] }
 0x2b8   :  { %5560 = vmatpush3.bf16.msra.mxu1 %v5559_v59  ;;  %v1079_v59 = vld [vmem:[#allocation5 + $0x1df0] sm:$0xff] }
 0x2b9   :  { %5452 = vmatpush1.bf16.msra.mxu0 %v5451_v30  ;;  %5562 = vmatprep.subr.bf16.mxu1 %v5561_v9  ;;  %v1050_v30 = vld [vmem:[#allocation5 + $0x1d08] sm:$0xff]  ;;  %v1100_v9 = vld [vmem:[#allocation5 + $0x1e98] sm:$0xff]  ;;  %v5471_v35 = vpack.c.bf16 %v1079_v59, %v1069_v17 }
 0x2ba   :  { %5454 = vmatprep.subr.bf16.mxu0 %v5453_v41  ;;  %v5465_v53 = vpack.c.bf16 %v1060_v50, %v1050_v30  ;;  %v1059_v41 = vld [vmem:[#allocation5 + $0x1d50] sm:$0xff]  ;;  %v5481_v50 = vpack.c.bf16 %v1140_v36, %v1130_v8  ;;  %v1180_v17 = vld [vmem:[#allocation5 + $0x2118] sm:$0xff] }
 0x2bb   :  { %v5467_v37 = vpack.c.bf16 %v1059_v41, %v1049_v12  ;;  %v1150_v12 = vld [vmem:[#allocation5 + $0x2028] sm:$0xff]  ;;  %v1160_v41 = vld [vmem:[#allocation5 + $0x2078] sm:$0xff] }
 0x2bc   :  { %5564 = vmatpush3.bf16.msra.mxu1 %v5563_v24  ;;  %v5477_v24 = vpack.c.bf16 %v1120_v15, %v1110_v13  ;;  %v5485_v6 = vpack.c.bf16 %v1160_v41, %v1150_v12  ;;  %v1220_v13 = vld [vmem:[#allocation5 + $0x2258] sm:$0xff]  ;;  %v1209_v15 = vld [vmem:[#allocation5 + $0x2200] sm:$0xff] }
 0x2bd   :  { %5456 = vmatpush1.bf16.msra.mxu0 %v5455_v51  ;;  %v1090_v51 = vld [vmem:[#allocation5 + $0x1e48] sm:$0xff]  ;;  %v1240_v8 = vld [vmem:[#allocation5 + $0x22f8] sm:$0xff] }
 0x2be   :  { %5458 = vmatprep.subr.bf16.mxu0 %v5457_v14  ;;  %v5473_v2 = vpack.c.bf16 %v1100_v9, %v1090_v51  ;;  %v1089_v14 = vld [vmem:[#allocation5 + $0x1e40] sm:$0xff]  ;;  %v1190_v9 = vld [vmem:[#allocation5 + $0x2168] sm:$0xff] }
 0x2bf   :  { %v5475_v22 = vpack.c.bf16 %v1099_v43, %v1089_v14  ;;  %v1169_v51 = vld [vmem:[#allocation5 + $0x20c0] sm:$0xff]  ;;  %v1210_v43 = vld [vmem:[#allocation5 + $0x2208] sm:$0xff] }
 0x2c0   :  { %v1189_v14 = vld [vmem:[#allocation5 + $0x2160] sm:$0xff] }
 0x2c1   :  { %5460 = vmatpush1.bf16.msra.mxu0 %v5459_v0  ;;  %v1109_v0 = vld [vmem:[#allocation5 + $0x1ee0] sm:$0xff] }
 0x2c2   :  { %5462 = vmatprep.subr.bf16.mxu0 %v5461_v29  ;;  %v1119_v29 = vld [vmem:[#allocation5 + $0x1f30] sm:$0xff] }
 0x2c3   :  { %v5479_v30 = vpack.c.bf16 %v1119_v29, %v1109_v0  ;;  %v3541_v0 = vld [vmem:[#allocation7 + $0xf0] sm:$0xff]  ;;  %v3542_v29 = vld [vmem:[#allocation7 + $0xf8] sm:$0xff] }
 0x2c4   :  { %v5565_v36 = vpack.c.bf16 %v3542_v29, %v3541_v0  ;;  %v1300_v0 = vld [vmem:[#allocation5 + $0x24d8] sm:$0xff] }
 0x2c5   :  { %5464 = vmatpush1.bf16.msra.mxu0 %v5463_v21  ;;  %v1129_v21 = vld [vmem:[#allocation5 + $0x1f80] sm:$0xff] }
 0x2c6   :  { %5466 = vmatprep.subr.bf16.mxu0 %v5465_v53  ;;  %v1139_v53 = vld [vmem:[#allocation5 + $0x1fd0] sm:$0xff]  ;;  %5566 = vmatprep.subr.bf16.mxu1 %v5565_v36 }
 0x2c7   :  { %v5483_v19 = vpack.c.bf16 %v1139_v53, %v1129_v21  ;;  %v3421_v53 = vmul.f32 %v6292_v28, %v6292_v28  ;;  %v3426_v28 = vmul.f32 %v6298_v47, %v6298_v47 }
 0x2c9   :  { %5468 = vmatpush1.bf16.msra.mxu0 %v5467_v37  ;;  %v1149_v37 = vld [vmem:[#allocation5 + $0x2020] sm:$0xff] }
 0x2ca   :  { %5470 = vmatprep.subr.bf16.mxu0 %v5469_v54  ;;  %v1170_v54 = vld [vmem:[#allocation5 + $0x20c8] sm:$0xff] }
 0x2cb   :  { %v5489_v59 = vpack.c.bf16 %v1180_v17, %v1170_v54  ;;  %v1250_v54 = vld [vmem:[#allocation5 + $0x2348] sm:$0xff] }
 0x2cd   :  { %5472 = vmatpush1.bf16.msra.mxu0 %v5471_v35  ;;  %v1200_v35 = vld [vmem:[#allocation5 + $0x21b8] sm:$0xff] }
 0x2ce   :  { %5474 = vmatprep.subr.bf16.mxu0 %v5473_v2  ;;  %v5493_v2 = vpack.c.bf16 %v1200_v35, %v1190_v9 }
 0x2d0   :  { %3284 = vmatmul.mubr.f32.vlgmr.msra.gmra.mrb[24].mxu0 %v6351_v20  ;;  %v1159_v20 = vld [vmem:[#allocation5 + $0x2070] sm:$0xff] }
 0x2d1   :  { %5476 = vmatpush1.bf16.msra.mxu0 %v5475_v22  ;;  %3289 = vmatprep.mubr.f32.mxu0 %v6354_v4  ;;  %v5487_v4 = vpack.c.bf16 %v1159_v20, %v1149_v37  ;;  %v1219_v22 = vld [vmem:[#allocation5 + $0x2250] sm:$0xff] }
 0x2d2   :  { %5478 = vmatprep.subr.bf16.mxu0 %v5477_v24  ;;  %v1230_v24 = vld [vmem:[#allocation5 + $0x22a8] sm:$0xff] }
 0x2d3   :  { %v5501_v41 = vpack.c.bf16 %v1240_v8, %v1230_v24  ;;  %v1290_v24 = vld [vmem:[#allocation5 + $0x2488] sm:$0xff]  ;;  %v3436_v8 = vmul.f32 %v6310_v23, %v6310_v23 }
 0x2d4   :  { %3290 = vmatmul.mubr.f32.gmra.mrb[26].mxu0 %v6357_v7  ;;  %v1179_v7 = vld [vmem:[#allocation5 + $0x2110] sm:$0xff] }
 0x2d5   :  { %5480 = vmatpush1.bf16.msra.mxu0 %v5479_v30  ;;  %3295 = vmatprep.mubr.f32.mxu0 %v6360_v26  ;;  %v5491_v26 = vpack.c.bf16 %v1179_v7, %v1169_v51  ;;  %v3525_v30 = vld [vmem:[#allocation7 + $0x70] sm:$0xff]  ;;  %v1249_v51 = vld [vmem:[#allocation5 + $0x2340] sm:$0xff] }
 0x2d6   :  { %5482 = vmatprep.subr.bf16.mxu0 %v5481_v50  ;;  %v3526_v50 = vld [vmem:[#allocation7 + $0x78] sm:$0xff]  ;;  %v1259_v7 = vld [vmem:[#allocation5 + $0x2390] sm:$0xff] }
 0x2d7   :  { %v5507_v47 = vpack.c.bf16 %v1259_v7, %v1249_v51  ;;  %v3446_v7 = vmul.f32 %v6322_v56, %v6322_v56  ;;  %v1359_v56 = vld [vmem:[#allocation5 + $0x26b0] sm:$0xff] }
 0x2d8   :  { %3296 = vmatmul.mubr.f32.gmra.mrb[28].mxu0 %v6363_v32  ;;  %v1199_v32 = vld [vmem:[#allocation5 + $0x21b0] sm:$0xff] }
 0x2d9   :  { %5484 = vmatpush1.bf16.msra.mxu0 %v5483_v19  ;;  %3301 = vmatprep.mubr.f32.mxu0 %v6366_v52  ;;  %v5495_v52 = vpack.c.bf16 %v1199_v32, %v1189_v14  ;;  %v1229_v19 = vld [vmem:[#allocation5 + $0x22a0] sm:$0xff]  ;;  %v3431_v32 = vmul.f32 %v6304_v3, %v6304_v3 }
 0x2da   :  { %5486 = vmatprep.subr.bf16.mxu0 %v5485_v6  ;;  %v1239_v6 = vld [vmem:[#allocation5 + $0x22f0] sm:$0xff] }
 0x2dc   :  { %3302 = vmatmul.mubr.f32.gmra.mrb[30].mxu0 %v6369_v55  ;;  %v5497_v55 = vpack.c.bf16 %v1220_v13, %v1210_v43 }
 0x2dd   :  { %5488 = vmatpush1.bf16.msra.mxu0 %v5487_v4  ;;  %3307 = vmatprep.mubr.f32.mxu0 %v6372_v11 }
 0x2de   :  { %5490 = vmatprep.subr.bf16.mxu0 %v5489_v59  ;;  %v5503_v59 = vpack.c.bf16 %v1239_v6, %v1229_v19  ;;  %v3441_v19 = vmul.f32 %v6316_v38, %v6316_v38 }
 0x2e0   :  { %3308 = vmatmul.mubr.f32.gmra.mrb[32].mxu0 %v6375_v18  ;;  %v5567_v18 = vpack.c.bf16 %v3526_v50, %v3525_v30  ;;  %v5513_v30 = vpack.c.bf16 %v1300_v0, %v1290_v24  ;;  %v1289_v50 = vld [vmem:[#allocation5 + $0x2480] sm:$0xff] }
 0x2e1   :  { %5492 = vmatpush1.bf16.msra.mxu0 %v5491_v26  ;;  %3313 = vmatprep.mubr.f32.mxu0 %v6380_v40  ;;  %v5499_v40 = vpack.c.bf16 %v1219_v22, %v1209_v15  ;;  %v1270_v26 = vld [vmem:[#allocation5 + $0x23e8] sm:$0xff]  ;;  %v1279_v15 = vld [vmem:[#allocation5 + $0x2430] sm:$0xff] }
 0x2e2   :  { %5494 = vmatprep.subr.bf16.mxu0 %v5493_v2  ;;  %5568 = vmatpush3.bf16.msra.mxu1 %v5567_v18  ;;  %v1280_v2 = vld [vmem:[#allocation5 + $0x2438] sm:$0xff] }
 0x2e3   :  { %v6462_v11 = vpop.f32.mrb[12].mxu0  ;;  %v5509_v13 = vpack.c.bf16 %v1280_v2, %v1270_v26 }
 0x2e4   :  { %v2580_v21 = vpop.f32.mrb[13].mxu0  ;;  %3314 = vmatmul.mubr.f32.gmra.mrb[34].mxu0 %v6385_v48  ;;  %v1260_v48 = vld [vmem:[#allocation5 + $0x2398] sm:$0xff] }
 0x2e5   :  { %v3451_v12 = vmul.f32 %v2580_v21, %v2580_v21  ;;  %5496 = vmatpush1.bf16.msra.mxu0 %v5495_v52  ;;  %3384 = vmatprep.mubr.f32.mxu0 %v6390_v45  ;;  %v5505_v45 = vpack.c.bf16 %v1260_v48, %v1250_v54  ;;  %v1269_v52 = vld [vmem:[#allocation5 + $0x23e0] sm:$0xff]  ;;  %v1299_v21 = vld [vmem:[#allocation5 + $0x24d0] sm:$0xff] }
 0x2e6   :  { %5498 = vmatprep.subr.bf16.mxu0 %v5497_v55  ;;  %v5511_v3 = vpack.c.bf16 %v1279_v15, %v1269_v52  ;;  %v5515_v23 = vpack.c.bf16 %v1299_v21, %v1289_v50  ;;  %v1309_v48 = vld [vmem:[#allocation5 + $0x2520] sm:$0xff]  ;;  %v3560_v15 = vld [vmem:[#allocation7 + $0x188] sm:$0xff] }
 0x2e7   :  { %v6468_v37 = vadd.f32 %v3451_v12, %v3421_v53  ;;  %v6470_v20 = vpop.f32.mrb[14].mxu0  ;;  %v1310_v12 = vld [vmem:[#allocation5 + $0x2528] sm:$0xff]  ;;  %v3559_v52 = vld [vmem:[#allocation7 + $0x180] sm:$0xff] }
 0x2e8   :  { %v2586_v17 = vpop.f32.mrb[15].mxu0  ;;  %v5569_v0 = vpack.c.bf16 %v3560_v15, %v3559_v52  ;;  %v1369_v21 = vld [vmem:[#allocation5 + $0x2700] sm:$0xff] }
 0x2e9   :  { %v3456_v4 = vmul.f32 %v2586_v17, %v2586_v17  ;;  %5500 = vmatpush1.bf16.msra.mxu0 %v5499_v40  ;;  %v1320_v40 = vld [vmem:[#allocation5 + $0x2578] sm:$0xff]  ;;  %v1319_v17 = vld [vmem:[#allocation5 + $0x2570] sm:$0xff] }
 0x2ea   :  { %5502 = vmatprep.subr.bf16.mxu0 %v5501_v41  ;;  %v5517_v54 = vpack.c.bf16 %v1320_v40, %v1310_v12  ;;  %v5519_v38 = vpack.c.bf16 %v1319_v17, %v1309_v48  ;;  %5570 = vmatprep.subr.bf16.mxu1 %v5569_v0  ;;  %v1379_v12 = vld [vmem:[#allocation5 + $0x2750] sm:$0xff]  ;;  %v1390_v40 = vld [vmem:[#allocation5 + $0x27a8] sm:$0xff] }
 0x2eb   :  { %v6474_v9 = vadd.f32 %v3456_v4, %v3426_v28  ;;  %v6476_v35 = vpop.f32.mrb[16].mxu0  ;;  %v3544_v17 = vld [vmem:[#allocation7 + $0x108] sm:$0xff] }
 0x2ec   :  { %v2592_v14 = vpop.f32.mrb[17].mxu0 }
 0x2ed   :  { %v3461_v43 = vmul.f32 %v2592_v14, %v2592_v14  ;;  %5504 = vmatpush1.bf16.msra.mxu0 %v5503_v59  ;;  %v1330_v59 = vld [vmem:[#allocation5 + $0x25c8] sm:$0xff]  ;;  %v1329_v14 = vld [vmem:[#allocation5 + $0x25c0] sm:$0xff] }
 0x2ee   :  { %5506 = vmatprep.subr.bf16.mxu0 %v5505_v45  ;;  %v1340_v45 = vld [vmem:[#allocation5 + $0x2618] sm:$0xff] }
 0x2ef   :  { %v6480_v22 = vadd.f32 %v3461_v43, %v3431_v32  ;;  %v6482_v55 = vpop.f32.mrb[18].mxu0  ;;  %v5521_v2 = vpack.c.bf16 %v1340_v45, %v1330_v59  ;;  %v1339_v32 = vld [vmem:[#allocation5 + $0x2610] sm:$0xff] }
 0x2f0   :  { %v2598_v29 = vpop.f32.mrb[19].mxu0  ;;  %v5523_v24 = vpack.c.bf16 %v1339_v32, %v1329_v14  ;;  %v3561_v59 = vld [vmem:[#allocation7 + $0x190] sm:$0xff]  ;;  %v3563_v14 = vld [vmem:[#allocation7 + $0x1a0] sm:$0xff]  ;;  %v3564_v32 = vld [vmem:[#allocation7 + $0x1a8] sm:$0xff] }
 0x2f1   :  { %v3466_v36 = vmul.f32 %v2598_v29, %v2598_v29  ;;  %5508 = vmatpush1.bf16.msra.mxu0 %v5507_v47  ;;  %v1350_v47 = vld [vmem:[#allocation5 + $0x2668] sm:$0xff]  ;;  %v5577_v0 = vpack.c.bf16 %v3564_v32, %v3563_v14 }
 0x2f2   :  { %5510 = vmatprep.subr.bf16.mxu0 %v5509_v13  ;;  %v1360_v13 = vld [vmem:[#allocation5 + $0x26b8] sm:$0xff]  ;;  %v6619_v14 = vld [vmem:[#allocation15_spill] sm:$0xff] }
 0x2f3   :  { %v6486_v18 = vadd.f32 %v3466_v36, %v3436_v8  ;;  %v6488_v53 = vpop.f32.mrb[20].mxu0  ;;  %v5525_v29 = vpack.c.bf16 %v1360_v13, %v1350_v47  ;;  %v1349_v8 = vld [vmem:[#allocation5 + $0x2660] sm:$0xff]  ;;  %v1370_v36 = vld [vmem:[#allocation5 + $0x2708] sm:$0xff]  ;;  %v3447_v32 = vmul.f32 %v6619_v14, %v6619_v14  ;;  %v3581_v14 = vld [vmem:[#allocation7 + $0x230] sm:$0xff] }
 0x2f4   :  { %v2604_v41 = vpop.f32.mrb[21].mxu0 }
 0x2f5   :  { %v3471_v6 = vmul.f32 %v2604_v41, %v2604_v41  ;;  %5512 = vmatpush1.bf16.msra.mxu0 %v5511_v3  ;;  %v1380_v3 = vld [vmem:[#allocation5 + $0x2758] sm:$0xff] }
 0x2f6   :  { %5514 = vmatprep.subr.bf16.mxu0 %v5513_v30  ;;  %v5527_v30 = vpack.c.bf16 %v1359_v56, %v1349_v8  ;;  %v5529_v50 = vpack.c.bf16 %v1380_v3, %v1370_v36  ;;  %v1400_v41 = vld [vmem:[#allocation5 + $0x27f8] sm:$0xff]  ;;  %v3432_v8 = vmul.f32 %v6307_v5, %v6307_v5  ;;  %v3549_v5 = vld [vmem:[#allocation7 + $0x130] sm:$0xff] }
 0x2f7   :  { %v6492_v28 = vadd.f32 %v3471_v6, %v3441_v19  ;;  %v6494_v4 = vpop.f32.mrb[22].mxu0  ;;  %v5531_v19 = vpack.c.bf16 %v1379_v12, %v1369_v21  ;;  %v5533_v6 = vpack.c.bf16 %v1400_v41, %v1390_v40  ;;  %v3566_v3 = vld [vmem:[#allocation7 + $0x1b8] sm:$0xff] }
 0x2f8   :  { %v2610_v51 = vpop.f32.mrb[23].mxu0 }
 0x2f9   :  { %v3476_v26 = vmul.f32 %v2610_v51, %v2610_v51  ;;  %5516 = vmatpush1.bf16.msra.mxu0 %v5515_v23  ;;  %v1389_v23 = vld [vmem:[#allocation5 + $0x27a0] sm:$0xff] }
 0x2fa   :  { %5518 = vmatprep.subr.bf16.mxu0 %v5517_v54  ;;  %v1399_v54 = vld [vmem:[#allocation5 + $0x27f0] sm:$0xff] }
 0x2fb   :  { %v6498_v43 = vadd.f32 %v3476_v26, %v3446_v7  ;;  %v5535_v48 = vpack.c.bf16 %v1399_v54, %v1389_v23  ;;  %v3545_v7 = vld [vmem:[#allocation7 + $0x110] sm:$0xff]  ;;  %v3546_v26 = vld [vmem:[#allocation7 + $0x118] sm:$0xff] }
 0x2fc   :  { %v5575_v52 = vpack.c.bf16 %v3546_v26, %v3545_v7 }
 0x2fd   :  { %5520 = vmatpush1.bf16.msra.mxu0 %v5519_v38  ;;  %v3427_v38 = vmul.f32 %v6301_v61, %v6301_v61  ;;  %v3547_v61 = vld [vmem:[#allocation7 + $0x120] sm:$0xff] }
 0x2fe   :  { %5522 = vmatprep.subr.bf16.mxu0 %v5521_v2 }
 0x301   :  { %5524 = vmatpush1.bf16.msra.mxu0 %v5523_v24 }
 0x302   :  { %5526 = vmatprep.subr.bf16.mxu0 %v5525_v29  ;;  %v3548_v29 = vld [vmem:[#allocation7 + $0x128] sm:$0xff] }
 0x303   :  { %v5579_v21 = vpack.c.bf16 %v3548_v29, %v3547_v61 }
 0x305   :  { %5528 = vmatpush1.bf16.msra.mxu0 %v5527_v30 }
 0x306   :  { %5530 = vmatprep.subr.bf16.mxu0 %v5529_v50 }
 0x309   :  { %5532 = vmatpush1.bf16.msra.mxu0 %v5531_v19  ;;  %v3550_v19 = vld [vmem:[#allocation7 + $0x138] sm:$0xff] }
 0x30a   :  { %5534 = vmatprep.subr.bf16.mxu0 %v5533_v6  ;;  %v3437_v6 = vmul.f32 %v6313_v25, %v6313_v25  ;;  %v3551_v25 = vld [vmem:[#allocation7 + $0x140] sm:$0xff] }
 0x30d   :  { %5536 = vmatpush1.bf16.msra.mxu0 %v5535_v48  ;;  %v3568_v48 = vld [vmem:[#allocation7 + $0x1c8] sm:$0xff] }
 0x310   :  { %3385 = vmatmul.mubr.f32.vlgmr.msra.gmra.mrb[24].mxu0 %v6411_v42 }
 0x311   :  { %3390 = vmatprep.mubr.f32.mxu0 %v6414_v44  ;;  %v3543_v44 = vld [vmem:[#allocation7 + $0x100] sm:$0xff] }
 0x314   :  { %3391 = vmatmul.mubr.f32.gmra.mrb[26].mxu0 %v6417_v57  ;;  %v3422_v57 = vmul.f32 %v6295_v31, %v6295_v31 }
 0x315   :  { %3396 = vmatprep.mubr.f32.mxu0 %v6420_v62 }
 0x318   :  { %3397 = vmatmul.mubr.f32.gmra.mrb[28].mxu0 %v6423_v1 }
 0x319   :  { %3402 = vmatprep.mubr.f32.mxu0 %v6426_v16  ;;  %v3562_v16 = vld [vmem:[#allocation7 + $0x198] sm:$0xff] }
 0x31c   :  { %3403 = vmatmul.mubr.f32.gmra.mrb[30].mxu0 %v6431_v60  ;;  %v3423_v60 = vmul.f32 %v6378_v34, %v6378_v34  ;;  %v3428_v34 = vmul.f32 %v6388_v63, %v6388_v63  ;;  %v3565_v63 = vld [vmem:[#allocation7 + $0x1b0] sm:$0xff] }
 0x31d   :  { %3408 = vmatprep.mubr.f32.mxu0 %v6434_v58  ;;  %v5581_v41 = vpack.c.bf16 %v3566_v3, %v3565_v63  ;;  %v3556_v63 = vld [vmem:[#allocation7 + $0x168] sm:$0xff]  ;;  %v3573_v3 = vld [vmem:[#allocation7 + $0x1f0] sm:$0xff] }
 0x320   :  { %3409 = vmatmul.mubr.f32.gmra.mrb[32].mxu0 %v6439_v10  ;;  %v5571_v10 = vpack.c.bf16 %v3544_v17, %v3543_v44  ;;  %v5583_v17 = vpack.c.bf16 %v3550_v19, %v3549_v5 }
 0x321   :  { %3414 = vmatprep.mubr.f32.mxu0 %v6442_v49 }
 0x324   :  { %3415 = vmatmul.mubr.f32.gmra.mrb[34].mxu0 %v6447_v27  ;;  %v5573_v27 = vpack.c.bf16 %v3562_v16, %v3561_v59  ;;  %v3552_v59 = vld [vmem:[#allocation7 + $0x148] sm:$0xff]  ;;  %v3442_v16 = vmul.f32 %v6319_v39, %v6319_v39  ;;  %v3553_v39 = vld [vmem:[#allocation7 + $0x150] sm:$0xff] }
 0x325   :  { %v5587_v7 = vpack.c.bf16 %v3552_v59, %v3551_v25  ;;  %v6622_v59 = vld [vmem:[#allocation17_spill] sm:$0xff] }
 0x362   :  { %v2982_v42 = vpop.f32.mrb[24].mxu1 }
 0x363   :  { %v3452_v62 = vmul.f32 %v2982_v42, %v2982_v42  ;;  %v2984_v1 = vpop.f32.mrb[25].mxu1 }
 0x364   :  { %v3453_v58 = vmul.f32 %v2984_v1, %v2984_v1 }
 0x365   :  { %v3482_v45 = vadd.f32 %v3452_v62, %v3422_v57 }
 0x366   :  { %v6515_v51 = vadd.f32 %v3453_v58, %v3423_v60  ;;  %v2988_v49 = vpop.f32.mrb[26].mxu1 }
 0x367   :  { %v3457_v31 = vmul.f32 %v2988_v49, %v2988_v49  ;;  %v2990_v2 = vpop.f32.mrb[27].mxu1  ;;  %3655 = vmatprep.mubr.f32.mxu1 %v3482_v45  ;;  %v3570_v45 = vld [vmem:[#allocation7 + $0x1d8] sm:$0xff] }
 0x368   :  { %v3458_v47 = vmul.f32 %v2990_v2, %v2990_v2  ;;  %3656 = vmatmul.mubr.f32.vlgmr.msra.gmra.mrb[36].mxu1 %v6468_v37  ;;  %v3433_v37 = vmul.f32 %v6395_v33, %v6395_v33  ;;  %v3567_v33 = vld [vmem:[#allocation7 + $0x1c0] sm:$0xff]  ;;  %v3554_v2 = vld [vmem:[#allocation7 + $0x158] sm:$0xff] }
 0x369   :  { %v3487_v13 = vadd.f32 %v3457_v31, %v3427_v38  ;;  %5572 = vmatpush3.bf16.msra.mxu1 %v5571_v10  ;;  %v5585_v1 = vpack.c.bf16 %v3568_v48, %v3567_v33  ;;  %v6618_v10 = vld [vmem:[#allocation20_spill] sm:$0xff]  ;;  %v5591_v29 = vpack.c.bf16 %v3554_v2, %v3553_v39 }
 0x36a   :  { %v6522_v15 = vadd.f32 %v3458_v47, %v3428_v34  ;;  %v2994_v24 = vpop.f32.mrb[28].mxu1  ;;  %5574 = vmatprep.subr.bf16.mxu1 %v5573_v27  ;;  %v3577_v48 = vld [vmem:[#allocation7 + $0x210] sm:$0xff] }
 0x36b   :  { %v3462_v56 = vmul.f32 %v2994_v24, %v2994_v24  ;;  %v2996_v36 = vpop.f32.mrb[29].mxu1  ;;  %3660 = vmatprep.mubr.f32.mxu1 %v3487_v13  ;;  %v3571_v13 = vld [vmem:[#allocation7 + $0x1e0] sm:$0xff] }
 0x36c   :  { %v3463_v30 = vmul.f32 %v2996_v36, %v2996_v36  ;;  %3661 = vmatmul.mubr.f32.gmra.mrb[38].mxu1 %v6474_v9  ;;  %v3438_v9 = vmul.f32 %v6399_v46, %v6399_v46  ;;  %v3569_v46 = vld [vmem:[#allocation7 + $0x1d0] sm:$0xff]  ;;  %v6620_v24 = vld [vmem:[#allocation22_spill] sm:$0xff] }
 0x36d   :  { %v3492_v50 = vadd.f32 %v3462_v56, %v3432_v8  ;;  %5576 = vmatpush3.bf16.msra.mxu1 %v5575_v52  ;;  %v5589_v31 = vpack.c.bf16 %v3570_v45, %v3569_v46  ;;  %v3572_v52 = vld [vmem:[#allocation7 + $0x1e8] sm:$0xff]  ;;  %v3555_v36 = vld [vmem:[#allocation7 + $0x160] sm:$0xff] }
 0x36e   :  { %v6529_v12 = vadd.f32 %v3463_v30, %v3433_v37  ;;  %v3000_v40 = vpop.f32.mrb[30].mxu1  ;;  %5578 = vmatprep.subr.bf16.mxu1 %v5577_v0  ;;  %v5593_v56 = vpack.c.bf16 %v3572_v52, %v3571_v13  ;;  %v3574_v37 = vld [vmem:[#allocation7 + $0x1f8] sm:$0xff]  ;;  %v5595_v30 = vpack.c.bf16 %v3556_v63, %v3555_v36  ;;  %v3579_v46 = vld [vmem:[#allocation7 + $0x220] sm:$0xff]  ;;  %v3580_v45 = vld [vmem:[#allocation7 + $0x228] sm:$0xff] }
 0x36f   :  { %v3467_v23 = vmul.f32 %v3000_v40, %v3000_v40  ;;  %v3002_v54 = vpop.f32.mrb[31].mxu1  ;;  %3665 = vmatprep.mubr.f32.mxu1 %v3492_v50  ;;  %v5597_v50 = vpack.c.bf16 %v3574_v37, %v3573_v3  ;;  %v3575_v40 = vld [vmem:[#allocation7 + $0x200] sm:$0xff] }
 0x370   :  { %v3468_v42 = vmul.f32 %v3002_v54, %v3002_v54  ;;  %3666 = vmatmul.mubr.f32.gmra.mrb[40].mxu1 %v6480_v22  ;;  %v3443_v22 = vmul.f32 %v6618_v10, %v6618_v10  ;;  %v3430_v10 = vmul.f32 %v6470_v20, %v6470_v20  ;;  %v3435_v20 = vmul.f32 %v6476_v35, %v6476_v35 }
 0x371   :  { %v3497_v44 = vadd.f32 %v3467_v23, %v3437_v6  ;;  %5580 = vmatpush3.bf16.msra.mxu1 %v5579_v21  ;;  %v3557_v21 = vld [vmem:[#allocation7 + $0x170] sm:$0xff]  ;;  %v3440_v35 = vmul.f32 %v6482_v55, %v6482_v55  ;;  %v3445_v55 = vmul.f32 %v6488_v53, %v6488_v53  ;;  %v3450_v53 = vmul.f32 %v6494_v4, %v6494_v4 }
 0x372   :  { %v6536_v57 = vadd.f32 %v3468_v42, %v3438_v9  ;;  %v3006_v62 = vpop.f32.mrb[32].mxu1  ;;  %5582 = vmatprep.subr.bf16.mxu1 %v5581_v41  ;;  %v3576_v41 = vld [vmem:[#allocation7 + $0x208] sm:$0xff]  ;;  %v6621_v23 = vld [vmem:[#allocation16_spill] sm:$0xff]  ;;  %v3578_v9 = vld [vmem:[#allocation7 + $0x218] sm:$0xff]  ;;  %v3425_v42 = vmul.f32 %v6462_v11, %v6462_v11 }
 0x373   :  { %v3472_v60 = vmul.f32 %v3006_v62, %v3006_v62  ;;  %v3008_v58 = vpop.f32.mrb[33].mxu1  ;;  %3670 = vmatprep.mubr.f32.mxu1 %v3497_v44  ;;  %v5601_v19 = vpack.c.bf16 %v3576_v41, %v3575_v40  ;;  %v3424_v54 = vmul.f32 %v6621_v23, %v6621_v23  ;;  %v5605_v25 = vpack.c.bf16 %v3578_v9, %v3577_v48  ;;  %v3585_v40 = vld [vmem:[#allocation7 + $0x250] sm:$0xff]  ;;  %v3586_v41 = vld [vmem:[#allocation7 + $0x258] sm:$0xff]  ;;  %v3587_v9 = vld [vmem:[#allocation7 + $0x260] sm:$0xff] }
 0x374   :  { %v3473_v49 = vmul.f32 %v3008_v58, %v3008_v58  ;;  %3671 = vmatmul.mubr.f32.gmra.mrb[42].mxu1 %v6486_v18  ;;  %v3448_v18 = vmul.f32 %v6620_v24, %v6620_v24  ;;  %v6624_v24 = vld [vmem:[#allocation19_spill] sm:$0xff]  ;;  %v5621_v23 = vpack.c.bf16 %v3586_v41, %v3585_v40 }
 0x375   :  { %v3502_v27 = vadd.f32 %v3472_v60, %v3442_v16  ;;  %5584 = vmatpush3.bf16.msra.mxu1 %v5583_v17  ;;  %v3429_v16 = vmul.f32 %v6622_v59, %v6622_v59  ;;  %v3590_v59 = vld [vmem:[#allocation7 + $0x278] sm:$0xff] }
 0x376   :  { %v6543_v26 = vadd.f32 %v3473_v49, %v3443_v22  ;;  %v3012_v38 = vpop.f32.mrb[34].mxu1  ;;  %5586 = vmatprep.subr.bf16.mxu1 %v5585_v1 }
 0x377   :  { %v3477_v34 = vmul.f32 %v3012_v38, %v3012_v38  ;;  %v3014_v47 = vpop.f32.mrb[35].mxu1  ;;  %3675 = vmatprep.mubr.f32.mxu1 %v3502_v27  ;;  %v6623_v38 = vld [vmem:[#allocation18_spill] sm:$0xff] }
 0x378   :  { %v3478_v0 = vmul.f32 %v3014_v47, %v3014_v47  ;;  %3676 = vmatmul.mubr.f32.gmra.mrb[44].mxu1 %v6492_v28  ;;  %v3558_v28 = vld [vmem:[#allocation7 + $0x178] sm:$0xff] }
 0x379   :  { %v3507_v61 = vadd.f32 %v3477_v34, %v3447_v32  ;;  %5588 = vmatpush3.bf16.msra.mxu1 %v5587_v7  ;;  %v5599_v5 = vpack.c.bf16 %v3558_v28, %v3557_v21  ;;  %v5609_v7 = vpack.c.bf16 %v3580_v45, %v3579_v46  ;;  %v3582_v32 = vld [vmem:[#allocation7 + $0x238] sm:$0xff] }
 0x37a   :  { %v6550_v8 = vadd.f32 %v3478_v0, %v3448_v18  ;;  %5590 = vmatprep.subr.bf16.mxu1 %v5589_v31  ;;  %v3434_v31 = vmul.f32 %v6623_v38, %v6623_v38  ;;  %v5613_v52 = vpack.c.bf16 %v3582_v32, %v3581_v14  ;;  %v3439_v18 = vmul.f32 %v6624_v24, %v6624_v24  ;;  %v3888_v38 = vld [vmem:[#allocation8] sm:$0xff]  ;;  %v3890_v32 = vld [vmem:[#allocation8 + $0x10] sm:$0xff] }
 0x37b   :  { %3680 = vmatprep.mubr.f32.mxu1 %v3507_v61  ;;  %v3894_v24 = vld [vmem:[#allocation8 + $0x30] sm:$0xff] }
 0x37c   :  { %3681 = vmatmul.mubr.f32.gmra.mrb[46].mxu1 %v6498_v43 }
 0x37d   :  { %5592 = vmatpush3.bf16.msra.mxu1 %v5591_v29  ;;  %v3583_v29 = vld [vmem:[#allocation7 + $0x240] sm:$0xff] }
 0x37e   :  { %5594 = vmatprep.subr.bf16.mxu1 %v5593_v56  ;;  %v3584_v56 = vld [vmem:[#allocation7 + $0x248] sm:$0xff] }
 0x37f   :  { %v5617_v37 = vpack.c.bf16 %v3584_v56, %v3583_v29  ;;  %v3896_v29 = vld [vmem:[#allocation8 + $0x40] sm:$0xff]  ;;  %v3897_v56 = vld [vmem:[#allocation8 + $0x48] sm:$0xff] }
 0x381   :  { %5596 = vmatpush3.bf16.msra.mxu1 %v5595_v30  ;;  %v6625_v30 = vld [vmem:[#allocation21_spill] sm:$0xff] }
 0x382   :  { %5598 = vmatprep.subr.bf16.mxu1 %v5597_v50  ;;  %v3444_v50 = vmul.f32 %v6625_v30, %v6625_v30 }
 0x385   :  { %5600 = vmatpush3.bf16.msra.mxu1 %v5599_v5 }
 0x386   :  { %5602 = vmatprep.subr.bf16.mxu1 %v5601_v19 }
 0x3e3   :  { %v3386_v6 = vpop.f32.mrb[24].mxu0 }
 0x3e4   :  { %v3454_v33 = vmul.f32 %v3386_v6, %v3386_v6  ;;  %v3388_v43 = vpop.f32.mrb[25].mxu0 }
 0x3e5   :  { %v3455_v44 = vmul.f32 %v3388_v43, %v3388_v43 }
 0x3e6   :  { %v3484_v17 = vadd.f32 %v3454_v33, %v3424_v54  ;;  %v6626_v54 = vld [vmem:[#allocation23_spill] sm:$0xff] }
 0x3e7   :  { %v6557_v62 = vadd.f32 %v3455_v44, %v3425_v42  ;;  %v3392_v1 = vpop.f32.mrb[26].mxu0  ;;  %v3449_v33 = vmul.f32 %v6626_v54, %v6626_v54  ;;  %v3588_v42 = vld [vmem:[#allocation7 + $0x268] sm:$0xff] }
 0x3e8   :  { %v3459_v60 = vmul.f32 %v3392_v1, %v3392_v1  ;;  %v3394_v58 = vpop.f32.mrb[27].mxu0  ;;  %3750 = vmatprep.mubr.f32.mxu1 %v3484_v17  ;;  %v5625_v1 = vpack.c.bf16 %v3588_v42, %v3587_v9 }
 0x3e9   :  { %v3460_v22 = vmul.f32 %v3394_v58, %v3394_v58  ;;  %3751 = vmatmul.mubr.f32.vlgmr.msra.gmra.mrb[48].mxu1 %v6515_v51 }
 0x3ea   :  { %v3489_v11 = vadd.f32 %v3459_v60, %v3429_v16  ;;  %5604 = vmatpush3.bf16.msra.mxu1 %v5601_v19 }
 0x3eb   :  { %v6564_v49 = vadd.f32 %v3460_v22, %v3430_v10  ;;  %v3398_v27 = vpop.f32.mrb[28].mxu0  ;;  %5606 = vmatprep.subr.bf16.mxu1 %v5605_v25 }
 0x3ec   :  { %v3464_v39 = vmul.f32 %v3398_v27, %v3398_v27  ;;  %v3400_v2 = vpop.f32.mrb[29].mxu0  ;;  %3755 = vmatprep.mubr.f32.mxu1 %v3489_v11 }
 0x3ed   :  { %v3465_v34 = vmul.f32 %v3400_v2, %v3400_v2  ;;  %3756 = vmatmul.mubr.f32.gmra.mrb[50].mxu1 %v6522_v15 }
 0x3ee   :  { %v3494_v51 = vadd.f32 %v3464_v39, %v3434_v31  ;;  %5608 = vmatpush3.bf16.msra.mxu1 %v5605_v25  ;;  %v3589_v25 = vld [vmem:[#allocation7 + $0x270] sm:$0xff] }
 0x3ef   :  { %v3495_v47 = vadd.f32 %v3465_v34, %v3435_v20  ;;  %v3404_v13 = vpop.f32.mrb[30].mxu0  ;;  %5610 = vmatprep.subr.bf16.mxu1 %v5609_v7  ;;  %v5629_v16 = vpack.c.bf16 %v3590_v59, %v3589_v25  ;;  %v3891_v20 = vld [vmem:[#allocation8 + $0x18] sm:$0xff] }
 0x3f0   :  { %v3469_v0 = vmul.f32 %v3404_v13, %v3404_v13  ;;  %v3406_v61 = vpop.f32.mrb[31].mxu0  ;;  %3760 = vmatprep.mubr.f32.mxu1 %v3494_v51  ;;  %v5637_v51 = vpack.c.bf16 %v3891_v20, %v3890_v32  ;;  %v3892_v13 = vld [vmem:[#allocation8 + $0x20] sm:$0xff] }
 0x3f1   :  { %v3470_v36 = vmul.f32 %v3406_v61, %v3406_v61  ;;  %3761 = vmatmul.mubr.f32.gmra.mrb[52].mxu1 %v6529_v12 }
 0x3f2   :  { %v3499_v15 = vadd.f32 %v3469_v0, %v3439_v18  ;;  %5612 = vmatpush3.bf16.msra.mxu1 %v5609_v7  ;;  %v3895_v0 = vld [vmem:[#allocation8 + $0x38] sm:$0xff] }
 0x3f3   :  { %v3500_v63 = vadd.f32 %v3470_v36, %v3440_v35  ;;  %v3410_v3 = vpop.f32.mrb[32].mxu0  ;;  %5614 = vmatprep.subr.bf16.mxu1 %v5613_v52  ;;  %v5645_v61 = vpack.c.bf16 %v3895_v0, %v3894_v24  ;;  %v5649_v35 = vpack.c.bf16 %v3897_v56, %v3896_v29  ;;  %v3898_v36 = vld [vmem:[#allocation8 + $0x50] sm:$0xff] }
 0x3f4   :  { %v3474_v21 = vmul.f32 %v3410_v3, %v3410_v3  ;;  %v3412_v28 = vpop.f32.mrb[33].mxu0  ;;  %3765 = vmatprep.mubr.f32.mxu1 %v3499_v15  ;;  %v3899_v15 = vld [vmem:[#allocation8 + $0x58] sm:$0xff]  ;;  %v3900_v3 = vld [vmem:[#allocation8 + $0x60] sm:$0xff] }
 0x3f5   :  { %v3475_v5 = vmul.f32 %v3412_v28, %v3412_v28  ;;  %3766 = vmatmul.mubr.f32.gmra.mrb[54].mxu1 %v6536_v57 }
 0x3f6   :  { %v3504_v12 = vadd.f32 %v3474_v21, %v3444_v50  ;;  %5616 = vmatpush3.bf16.msra.mxu1 %v5613_v52  ;;  %v3893_v52 = vld [vmem:[#allocation8 + $0x28] sm:$0xff]  ;;  %v3902_v50 = vld [vmem:[#allocation8 + $0x70] sm:$0xff]  ;;  %v3903_v21 = vld [vmem:[#allocation8 + $0x78] sm:$0xff] }
 0x3f7   :  { %v3505_v19 = vadd.f32 %v3475_v5, %v3445_v55  ;;  %v3416_v6 = vpop.f32.mrb[34].mxu0  ;;  %5618 = vmatprep.subr.bf16.mxu1 %v5617_v37  ;;  %v5641_v18 = vpack.c.bf16 %v3893_v52, %v3892_v13  ;;  %v5661_v28 = vpack.c.bf16 %v3903_v21, %v3902_v50 }
 0x3f8   :  { %v3479_v43 = vmul.f32 %v3416_v6, %v3416_v6  ;;  %v3418_v48 = vpop.f32.mrb[35].mxu0  ;;  %3770 = vmatprep.mubr.f32.mxu1 %v3504_v12 }
 0x3f9   :  { %v3480_v44 = vmul.f32 %v3418_v48, %v3418_v48  ;;  %3771 = vmatmul.mubr.f32.gmra.mrb[56].mxu1 %v6543_v26 }
 0x3fa   :  { %v3509_v57 = vadd.f32 %v3479_v43, %v3449_v33  ;;  %5620 = vmatpush3.bf16.msra.mxu1 %v5617_v37  ;;  %v3901_v37 = vld [vmem:[#allocation8 + $0x68] sm:$0xff] }
 0x3fb   :  { %v3510_v17 = vadd.f32 %v3480_v44, %v3450_v53  ;;  %5622 = vmatprep.subr.bf16.mxu1 %v5621_v23  ;;  %v5657_v30 = vpack.c.bf16 %v3901_v37, %v3900_v3 }
 0x3fc   :  { %3775 = vmatprep.mubr.f32.mxu1 %v3509_v57 }
 0x3fd   :  { %3776 = vmatmul.mubr.f32.gmra.mrb[58].mxu1 %v6550_v8 }
 0x3fe   :  { %5624 = vmatpush3.bf16.msra.mxu1 %v5621_v23  ;;  %4207 = vmatprep.mubr.f32.mxu1 %v6557_v62 }
 0x3ff   :  { %5626 = vmatprep.subr.bf16.mxu1 %v5625_v1 }
 0x402   :  { %5628 = vmatpush3.bf16.msra.mxu1 %v5625_v1 }
 0x403   :  { %5630 = vmatprep.subr.bf16.mxu1 %v5629_v16 }
 0x406   :  { %5632 = vmatpush3.bf16.msra.mxu1 %v5629_v16 }
 0x409   :  { %4208 = vmatmul.mubr.f32.vlgmr.msra.gmra.mrb[60].mxu1 %v6564_v49  ;;  %v3889_v49 = vld [vmem:[#allocation8 + $0x8] sm:$0xff] }
 0x40a   :  { %4210 = vmatprep.mubr.f32.mxu1 %v3495_v47  ;;  %v5633_v39 = vpack.c.bf16 %v3889_v49, %v3888_v38 }
 0x40c   :  { %5634 = vmatprep.subr.bf16.mxu1 %v5633_v39 }
 0x40d   :  { %4211 = vmatmul.mubr.f32.gmra.mrb[62].mxu1 %v3500_v63  ;;  %v5653_v63 = vpack.c.bf16 %v3899_v15, %v3898_v36 }
 0x40e   :  { %4213 = vmatprep.mubr.f32.mxu1 %v3505_v19  ;;  %5636 = vmatpush3.bf16.msra.mxu1 %v5633_v39 }
 0x40f   :  { %5638 = vmatprep.subr.bf16.mxu1 %v5637_v51 }
 0x411   :  { %4214 = vmatmul.mubr.f32.gmra.mrb[64].mxu1 %v3510_v17 }
 0x412   :  { %5640 = vmatpush3.bf16.msra.mxu1 %v5637_v51 }
 0x413   :  { %5642 = vmatprep.subr.bf16.mxu1 %v5641_v18 }
 0x416   :  { %5644 = vmatpush3.bf16.msra.mxu1 %v5641_v18 }
 0x417   :  { %5646 = vmatprep.subr.bf16.mxu1 %v5645_v61 }
 0x41a   :  { %5648 = vmatpush3.bf16.msra.mxu1 %v5645_v61 }
 0x41b   :  { %5650 = vmatprep.subr.bf16.mxu1 %v5649_v35 }
 0x41e   :  { %5652 = vmatpush3.bf16.msra.mxu1 %v5649_v35 }
 0x41f   :  { %5654 = vmatprep.subr.bf16.mxu1 %v5653_v63 }
 0x422   :  { %5656 = vmatpush3.bf16.msra.mxu1 %v5653_v63 }
 0x423   :  { %5658 = vmatprep.subr.bf16.mxu1 %v5657_v30 }
 0x426   :  { %5660 = vmatpush3.bf16.msra.mxu1 %v5657_v30 }
 0x427   :  { %5662 = vmatprep.subr.bf16.mxu1 %v5661_v28 }
 0x42a   :  { %5664 = vmatpush3.bf16.msra.mxu1 %v5661_v28 }
 0x43b   :  { %v4063_v4 = vpop.f32.mrb[36].mxu1 }
 0x43c   :  { %v4064_v26 = vpop.f32.mrb[37].mxu1 }
 0x43d   :  { %v4065_v60 = vadd.f32 %v4064_v26, %v4063_v4 }
 0x43f   :  { %v4066_v58 = vpop.f32.mrb[38].mxu1  ;;  %v3658_v55 = vadd.f32 1e-08, %v4065_v60 }
 0x440   :  { %v4067_v46 = vpop.f32.mrb[39].mxu1 }
 0x441   :  { %v4068_v8 = vadd.f32 %v4067_v46, %v4066_v58 }
 0x443   :  { %v4069_v45 = vpop.f32.mrb[40].mxu1  ;;  %v3663_v23 = vadd.f32 1e-08, %v4068_v8 }
 0x444   :  { %v4070_v10 = vpop.f32.mrb[41].mxu1 }
 0x445   :  { %v4071_v62 = vadd.f32 %v4070_v10, %v4069_v45 }
 0x447   :  { %v4072_v22 = vpop.f32.mrb[42].mxu1  ;;  %v3668_v9 = vadd.f32 1e-08, %v4071_v62 }
 0x448   :  { %v4073_v11 = vpop.f32.mrb[43].mxu1 }
 0x449   :  { %v6589_v27 = vadd.f32 %v4073_v11, %v4072_v22 }
 0x44b   :  { %v4075_v7 = vpop.f32.mrb[44].mxu1  ;;  %v3673_v17 = vadd.f32 1e-08, %v6589_v27 }
 0x44c   :  { %v4076_v31 = vpop.f32.mrb[45].mxu1 }
 0x44d   :  { %v4077_v2 = vadd.f32 %v4076_v31, %v4075_v7 }
 0x44f   :  { %v4078_v14 = vpop.f32.mrb[46].mxu1  ;;  %v3678_v4 = vadd.f32 1e-08, %v4077_v2 }
 0x450   :  { %v4079_v34 = vpop.f32.mrb[47].mxu1 }
 0x451   :  { %v4080_v47 = vadd.f32 %v4079_v34, %v4078_v14 }
 0x453   :  { %v3683_v8 = vadd.f32 1e-08, %v4080_v47 }
 0x4bc   :  { %v4113_v40 = vpop.f32.mrb[48].mxu1 }
 0x4bd   :  { %v4114_v41 = vpop.f32.mrb[49].mxu1 }
 0x4be   :  { %v4115_v5 = vadd.f32 %v4114_v41, %v4113_v40 }
 0x4c0   :  { %v4116_v12 = vpop.f32.mrb[50].mxu1  ;;  %v3753_v19 = vadd.f32 %v4115_v5, %v3658_v55 }
 0x4c1   :  { %v4117_v6 = vpop.f32.mrb[51].mxu1 }
 0x4c2   :  { %v4118_v54 = vadd.f32 %v4117_v6, %v4116_v12 }
 0x4c4   :  { %v4119_v33 = vpop.f32.mrb[52].mxu1  ;;  %v3758_v43 = vadd.f32 %v4118_v54, %v3663_v23 }
 0x4c5   :  { %v4120_v48 = vpop.f32.mrb[53].mxu1 }
 0x4c6   :  { %v4121_v42 = vadd.f32 %v4120_v48, %v4119_v33 }
 0x4c8   :  { %v4122_v53 = vpop.f32.mrb[54].mxu1  ;;  %v3763_v44 = vadd.f32 %v4121_v42, %v3668_v9 }
 0x4c9   :  { %v4123_v57 = vpop.f32.mrb[55].mxu1 }
 0x4ca   :  { %v4124_v1 = vadd.f32 %v4123_v57, %v4122_v53 }
 0x4cc   :  { %v4125_v25 = vpop.f32.mrb[56].mxu1  ;;  %v3768_v59 = vadd.f32 %v4124_v1, %v3673_v17 }
 0x4cd   :  { %v4126_v16 = vpop.f32.mrb[57].mxu1 }
 0x4ce   :  { %v4127_v26 = vadd.f32 %v4126_v16, %v4125_v25 }
 0x4d0   :  { %v4128_v60 = vpop.f32.mrb[58].mxu1  ;;  %v3773_v58 = vadd.f32 %v4127_v26, %v3678_v4 }
 0x4d1   :  { %v4129_v46 = vpop.f32.mrb[59].mxu1 }
 0x4d2   :  { %v4130_v45 = vadd.f32 %v4129_v46, %v4128_v60 }
 0x4d4   :  { %v3778_v10 = vadd.f32 %v4130_v45, %v3683_v8 }
 0x4dc   :  { %v4209_v22 = vpop.f32.mrb[60].mxu1 }
 0x4dd   :  { %v3853_v62 = vadd.f32 %v4209_v22, %v3758_v43  ;;  %v3847_v11 = vpop.f32.mrb[61].mxu1 }
 0x4de   :  { %v3848_v7 = vadd.f32 %v3847_v11, %v3753_v19 }
 0x4df   :  { %5856 = vlog2.f32 %v3853_v62 }
 0x4e0   :  { %5858 = vlog2.f32 %v3848_v7  ;;  %v4212_v38 = vpop.f32.mrb[62].mxu1 }
 0x4e1   :  { %v3863_v27 = vadd.f32 %v4212_v38, %v3768_v59  ;;  %v3857_v49 = vpop.f32.mrb[63].mxu1 }
 0x4e2   :  { %v3858_v31 = vadd.f32 %v3857_v49, %v3763_v44 }
 0x4e3   :  { %5860 = vlog2.f32 %v3863_v27 }
 0x4e4   :  { %5862 = vlog2.f32 %v3858_v31  ;;  %v4215_v39 = vpop.f32.mrb[64].mxu1 }
 0x4e5   :  { %v3873_v2 = vadd.f32 %v4215_v39, %v3778_v10  ;;  %v3867_v14 = vpop.f32.mrb[65].mxu1 }
 0x4e6   :  { %v3868_v32 = vadd.f32 %v3867_v14, %v3773_v58 }
 0x4e7   :  { %5864 = vlog2.f32 %v3873_v2 }
 0x4e8   :  { %5866 = vlog2.f32 %v3868_v32 }
 0x4e9   :  { %v5857_v20 = vpop.eup %5856 }
 0x4ea   :  { %v5859_v34 = vpop.eup %5858  ;;  %v3879_v47 = vmul.f32 0.6931472, %v5857_v20 }
 0x4eb   :  { %v3877_v51 = vmul.f32 0.6931472, %v5859_v34 }
 0x4ed   :  { %v5861_v13 = vpop.eup %5860  ;;  %4248 = vmatprep.mubr.f32.mxu1 %v3877_v51 }
 0x4ee   :  { %v5863_v52 = vpop.eup %5862  ;;  %4249 = vmatmul.mubr.f32.vlgmr.msra.gmra.mrb[66].mxu1 %v3879_v47  ;;  %v3883_v18 = vmul.f32 0.6931472, %v5861_v13 }
 0x4ef   :  { %v3881_v24 = vmul.f32 0.6931472, %v5863_v52 }
 0x4f1   :  { %v5865_v0 = vpop.eup %5864  ;;  %4251 = vmatprep.mubr.f32.mxu1 %v3881_v24 }
 0x4f2   :  { %v5867_v61 = vpop.eup %5866  ;;  %4252 = vmatmul.mubr.f32.gmra.mrb[68].mxu1 %v3883_v18  ;;  %v3887_v56 = vmul.f32 0.6931472, %v5865_v0 }
 0x4f3   :  { %v3885_v29 = vmul.f32 0.6931472, %v5867_v61 }
 0x4f5   :  { %4254 = vmatprep.mubr.f32.mxu1 %v3885_v29 }
 0x4f6   :  { %4255 = vmatmul.mubr.f32.gmra.mrb[70].mxu1 %v3887_v56 }
 0x5c1   :  { %v4250_v35 = vpop.f32.mrb[66].mxu1 }
 0x5c2   :  { %v3970_v36 = vpop.f32.mrb[67].mxu1 }
 0x5c5   :  { %v4253_v15 = vpop.f32.mrb[68].mxu1 }
 0x5c6   :  { %v3999_v63 = vsub.f32 %v3970_v36, %v4253_v15  ;;  %v3980_v3 = vpop.f32.mrb[69].mxu1 }
 0x5c8   :  { %v4002_v28 = vand.u32 2147483647, %v3999_v63 }
 0x5c9   :  { %v4256_v37 = vpop.f32.mrb[70].mxu1 }
 0x5ca   :  { %v4001_v30 = vsub.f32 %v3980_v3, %v4256_v37  ;;  %v3990_v50 = vpop.f32.mrb[71].mxu1 }
 0x5cb   :  { %v4000_v21 = vsub.f32 %v4250_v35, %v3990_v50 }
 0x5cc   :  { %v4004_v41 = vand.u32 2147483647, %v4001_v30 }
 0x5cd   :  { %v4003_v40 = vand.u32 2147483647, %v4000_v21 }
 0x5cf   :  { %v4005_v55 = vadd.f32 %v4003_v40, %v4002_v28 }
 0x5d1   :  { %v4006_v5 = vadd.f32 %v4005_v55, %v4004_v41 }
 0x5d3   :  { %v4007_v12 = vrot.slane %v4006_v5, 4 }
 0x5d5   :  { %v4008_v19 = vadd.f32 %v4007_v12, %v4006_v5 }
 0x5d7   :  { %v4009_v6 = vrot.slane %v4008_v19, 2 }
 0x5d9   :  { %v4010_v23 = vadd.f32 %v4009_v6, %v4008_v19 }
 0x5db   :  { %v4011_v54 = vrot.slane %v4010_v23, 1 }
 0x5dd   :  { %v4012_v33 = vadd.f32 %v4011_v54, %v4010_v23 }
 0x5df   :  { %4013 = vst [vmem:[#allocation10] sm:$0xff] %v4012_v33 }
 0x5e0   :  { %6116 = shalt.err (!%p6113_p8)
}
 0x5e1   :  { %s6117_s17 = scalar_lea.hbm %s6608_s4, 128 }
 0x5e2   :  { %p6118_p9 = scmp.ne.s32.totalorder %s6608_s4, %s6117_s17  ;;  %p6121_p10 = scmp.lt.u32.totalorder %s6117_s17, %s6608_s4 }
 0x5e4   :  { %p6123_p11 = pnand %p6121_p10, %p6118_p9 }
 0x5e6   :  { %6126 = shalt.err (!%p6123_p11)
}
 0x5e7   :  { %4023 = dma.vmem_to_hbm [thread:$0]  %s4021_s13, 128, %s6608_s4, [#allocation4]  }
 0x5e8   :  { %6133 = dma.done.wait [#allocation4], 128  }
 0x5e9   :  { %6134 = vsyncadd [#allocation4], 4294967168 }
 0x5ea   :  { %4027 = vsyncpa [#allocation3], 1 }
 0x5eb   :  { %4028 = vsyncpa [#allocation6], 1 }
 0x5ec   :  { %4029 = vsyncpa [#allocation9], 1 }
 0x5ed   :  { %4030 = vsyncpa [#allocation4], 1 }

</bundles_post_ra>
